<compile_context>
chip_gen: v7x
topology: tpu7x:2x2x1
jax: 0.10.0
libtpu: 0.0.40
codegen_flags: <defaults>
</compile_context>

<pallas_src>
import functools

import jax
import jax.numpy as jnp
from jax.experimental import pallas as pl
from jax.experimental.pallas import tpu as pltpu

EXPANSION = 4
BN_EPS = 1e-5


# ------------------------------- fused kernel --------------------------------

def _bottleneck_kernel(x_ref, xup_ref, xdn_ref,
                       w1_ref, b1_ref, w2_ref, b2_ref, w3_ref, b3_ref,
                       o_ref, *, compute_dtype):
    """Fused bottleneck over one (tile_h, W) NHWC row-tile.

    x_ref   : (1, TH, W, Cin)    current row-tile (also the residual source)
    xup_ref : (1, 1,  W, Cin)    row above the tile (index clamped at image top)
    xdn_ref : (1, 1,  W, Cin)    row below the tile (index clamped at image bottom)
    w1_ref  : (Cin, Cmid)        1x1 conv, BN1 scale folded in
    w2_ref  : (9, Cmid, Cmid)    3x3 conv taps (kh*3+kw), BN2 scale folded in
    w3_ref  : (Cmid, Cout)       1x1 conv, BN3 scale folded in
    b*_ref  : (1, C)             folded BN biases (f32)
    o_ref   : (1, TH, W, Cout)
    """
    h = pl.program_id(1)
    num_h = pl.num_programs(1)
    _, th, w, cin = x_ref.shape
    cmid = w1_ref.shape[1]
    cout = w3_ref.shape[1]

    w1 = w1_ref[...]
    b1 = b1_ref[...]

    def conv1x1_bn_relu(rows, nrows):                 # -> (nrows, W, Cmid) compute_dtype
        r2d = rows.reshape(nrows * w, cin).astype(compute_dtype)
        y = jnp.dot(r2d, w1, preferred_element_type=jnp.float32)
        y = jnp.maximum(y + b1, 0.0)                  # BN bias + ReLU in f32
        return y.astype(compute_dtype).reshape(nrows, w, cmid)

    x_tile = x_ref[0]                                 # (TH, W, Cin), io dtype

    # conv1 + bn1 + relu on the tile rows and the two halo rows (all stays in VMEM).
    # The halo rows are zeroed when they fall outside the image (== conv2 zero padding,
    # which applies to o1).
    top_ok = (h > 0).astype(compute_dtype)
    bot_ok = (h < num_h - 1).astype(compute_dtype)
    o1_mid = conv1x1_bn_relu(x_tile, th)                              # (TH, W, Cmid)
    o1_up = conv1x1_bn_relu(xup_ref[0], 1) * top_ok                   # (1,  W, Cmid)
    o1_dn = conv1x1_bn_relu(xdn_ref[0], 1) * bot_ok                   # (1,  W, Cmid)

    o1_ext = jnp.concatenate([o1_up, o1_mid, o1_dn], axis=0)          # (TH+2, W, Cmid)

    # W-shifted views for the kw = 0 / 2 taps (zero at the image border).  Only two
    # shifted copies are ever materialized (in compute_dtype); kh shifts below are
    # free slices along the leading axis.
    zcol = jnp.zeros((th + 2, 1, cmid), compute_dtype)
    s_m1 = jnp.concatenate([zcol, o1_ext[:, :w - 1, :]], axis=1)      # input col w-1
    s_p1 = jnp.concatenate([o1_ext[:, 1:, :], zcol], axis=1)          # input col w+1
    shifted = (s_m1, o1_ext, s_p1)                                    # kw = 0, 1, 2

    # conv2 (3x3, stride=1, pad=1) as 9 accumulated matmuls into an f32 accumulator
    # (no im2col materialization).
    acc = jnp.zeros((th * w, cmid), jnp.float32)
    for kh in range(3):
        for kw in range(3):
            lhs = shifted[kw][kh:kh + th].reshape(th * w, cmid)
            acc = acc + jnp.dot(lhs, w2_ref[kh * 3 + kw],
                                preferred_element_type=jnp.float32)
    o2 = jnp.maximum(acc + b2_ref[...], 0.0)                          # (TH*W, Cmid) f32

    # conv3 (1x1) + bn3 + identity + relu (residual and epilogue in f32).
    y = jnp.dot(o2.astype(compute_dtype), w3_ref[...],
                preferred_element_type=jnp.float32) + b3_ref[...]
    y = y + x_tile.astype(jnp.float32).reshape(th * w, cout)          # Cin == Cout
    o_ref[...] = jnp.maximum(y, 0.0).reshape(1, th, w, cout).astype(o_ref.dtype)


# ------------------------- VMEM budget / tile selection -------------------------

def _vmem_budget_bytes():
    """Generation-aware scoped-VMEM budget (~75% of physical per-core VMEM)."""
    physical = 64 * 1024 * 1024          # conservative default (v7x: 64 MiB per TC)
    try:
        info = pltpu.get_tpu_info()
        cap = getattr(info, "vmem_capacity_bytes", None)
        if cap:
            physical = int(cap)          # v5e/v6e: 128 MiB -> 96 MiB budget
    except Exception:
        pass
    budget = (physical * 3) // 4
    return max(32 * 1024 * 1024, min(budget, 100 * 1024 * 1024))


def _estimate_step_vmem(tile_h, w, cin, cmid, cout, in_bytes, out_bytes,
                        cbytes, weight_bufs):
    """Rough per-grid-step VMEM footprint for a candidate tile_h."""
    rows = tile_h * w
    # double-buffered activation DMAs: x tile + 2 halo rows + output tile
    act_io = 2 * ((rows + 2 * w) * cin * in_bytes + rows * cout * out_bytes)
    # resident weights / biases
    weights = weight_bufs * ((cin * cmid + 9 * cmid * cmid + cmid * cout) * cbytes
                             + 4 * (2 * cmid + cout))
    # live in-kernel intermediates: o1_ext + 2 shifted copies, conv2 acc + o2,
    # conv3 result + f32 residual
    inter = (3 * (tile_h + 2) * w * cmid * cbytes
             + rows * cmid * (8 + cbytes)
             + 2 * rows * cout * 4)
    return act_io + weights + inter


def _auto_tile_h(h, w, n_batch, cin, cmid, cout, in_bytes, out_bytes, cbytes,
                 weight_bufs, vmem_budget, max_rows=4096):
    """Largest divisor of H fitting the VMEM budget (tile_h*W capped at ~4K rows)."""
    cands = [c for c in range(1, h + 1) if h % c == 0]
    ok = [c for c in cands
          if c * w <= max_rows
          and _estimate_step_vmem(c, w, cin, cmid, cout, in_bytes, out_bytes,
                                  cbytes, weight_bufs) <= vmem_budget]
    if not ok:
        ok = [1]
    # Keep >= 2 (parallel) grid steps so both v7x TensorCores get work even at N == 1.
    if n_batch == 1:
        multi = [c for c in ok if h // c >= 2]
        if multi:
            ok = multi
    # Prefer tiles whose row count matches the sublane packing (8 f32 / 16 bf16).
    sub = 16 if cbytes < 4 else 8
    pref = [c for c in ok if (c * w) % sub == 0]
    if pref:
        ok = pref
    return max(ok)


# ------------------------------- host wrappers ---------------------------------

def bottleneck_forward_nhwc(x_nhwc, params, *, tile_h=None,
                            compute_dtype=jnp.float32, io_dtype=None,
                            weight_buffering=1):
    """Fused Bottleneck forward on NHWC input (stride=1, downsample=None, eval BN)."""
    n, h_dim, w_dim, cin = x_nhwc.shape
    cmid = params["w1"].shape[1]
    cout = params["w3"].shape[1]
    assert cout == cin, "identity add requires inplanes == planes * expansion"

    if io_dtype is None:
        io_dtype = compute_dtype            # bf16 compute -> bf16 HBM I/O
    in_bytes = out_bytes = jnp.dtype(io_dtype).itemsize
    cbytes = jnp.dtype(compute_dtype).itemsize
    weight_bufs = 1 if weight_buffering == 1 else 2

    vmem_budget = _vmem_budget_bytes()
    if tile_h is None:
        tile_h = _auto_tile_h(h_dim, w_dim, n, cin, cmid, cout, in_bytes,
                              out_bytes, cbytes, weight_bufs, vmem_budget)
    assert h_dim % tile_h == 0, "tile_h must divide H"
    n_h_tiles = h_dim // tile_h

    x_io = x_nhwc.astype(io_dtype)
    w1 = params["w1"].astype(compute_dtype)
    w2 = params["w2"].astype(compute_dtype)
    w3 = params["w3"].astype(compute_dtype)
    b1, b2, b3 = params["b1"], params["b2"], params["b3"]               # f32

    def tile_map(i, j):
        return (i, j, 0, 0)

    def up_map(i, j):    # single row just above the tile, clamped at the image top
        return (i, jnp.maximum(j * tile_h - 1, 0), 0, 0)

    def dn_map(i, j):    # single row just below the tile, clamped at the image bottom
        return (i, jnp.minimum(j * tile_h + tile_h, h_dim - 1), 0, 0)

    def rep_spec(shape):  # replicated weights / biases; single-buffered when supported
        kwargs = {}
        if weight_buffering is not None:
            kwargs["pipeline_mode"] = pl.Buffered(weight_buffering)
        return pl.BlockSpec(shape, lambda i, j: (0,) * len(shape), **kwargs)

    kernel = functools.partial(_bottleneck_kernel, compute_dtype=compute_dtype)

    return pl.pallas_call(
        kernel,
        out_shape=jax.ShapeDtypeStruct((n, h_dim, w_dim, cout), io_dtype),
        grid=(n, n_h_tiles),
        in_specs=[
            pl.BlockSpec((1, tile_h, w_dim, cin), tile_map),   # x tile (+ residual)
            pl.BlockSpec((1, 1, w_dim, cin), up_map),          # halo row above
            pl.BlockSpec((1, 1, w_dim, cin), dn_map),          # halo row below
            rep_spec((cin, cmid)),                             # w1 (BN1 folded)
            rep_spec((1, cmid)),                               # b1
            rep_spec((9, cmid, cmid)),                         # w2 taps (BN2 folded)
            rep_spec((1, cmid)),                               # b2
            rep_spec((cmid, cout)),                            # w3 (BN3 folded)
            rep_spec((1, cout)),                               # b3
        ],
        out_specs=pl.BlockSpec((1, tile_h, w_dim, cout), tile_map),
        compiler_params=pltpu.CompilerParams(
            # Independent grid steps -> v7x shards them over its 2 TensorCores.
            dimension_semantics=("parallel", "parallel"),
            vmem_limit_bytes=int(vmem_budget),
        ),
    )(x_io, x_io, x_io, w1, b1, w2, b2, w3, b3)


def bottleneck_forward(x_nchw, params, **kwargs):
    """NCHW (PyTorch-layout) interface.  In a full network keep activations NHWC
    end-to-end and call bottleneck_forward_nhwc directly to avoid these transposes."""
    x_nhwc = jnp.transpose(x_nchw, (0, 2, 3, 1))
    out_nhwc = bottleneck_forward_nhwc(x_nhwc, params, **kwargs)
    return jnp.transpose(out_nhwc, (0, 3, 1, 2))


# --------------------------- parameter construction ----------------------------

def make_params(key, inplanes, planes):
    """Deterministic synthetic parameters (conv weights + eval-mode BN stats)."""
    ks = jax.random.split(key, 6)

    def conv_w(k, co, ci, kh, kw):
        fan_in = ci * kh * kw
        return (jax.random.normal(k, (co, ci, kh, kw), jnp.float32)
                / jnp.sqrt(jnp.float32(fan_in)))

    def bn(k, c):
        k0, k1, k2, k3 = jax.random.split(k, 4)
        gamma = jax.random.uniform(k0, (c,), jnp.float32, 0.5, 1.5)
        beta = jax.random.normal(k1, (c,), jnp.float32) * 0.1
        mean = jax.random.normal(k2, (c,), jnp.float32) * 0.1
        var = jax.random.uniform(k3, (c,), jnp.float32, 0.5, 1.5)
        scale = gamma / jnp.sqrt(var + BN_EPS)
        bias = beta - mean * scale
        return scale, bias

    cout = planes * EXPANSION
    w1 = conv_w(ks[0], planes, inplanes, 1, 1)     # OIHW
    w2 = conv_w(ks[1], planes, planes, 3, 3)       # OIHW
    w3 = conv_w(ks[2], cout, planes, 1, 1)         # OIHW
    s1, b1 = bn(ks[3], planes)
    s2, b2 = bn(ks[4], planes)
    s3, b3 = bn(ks[5], cout)

    # Kernel layouts: BN scale folded into the conv weights (per output channel),
    # transposed to (Cin, Cout) matmul form.  conv2 stored as (9, Cmid, Cmid) with tap
    # index kh*3+kw, matching the kernel's per-tap accumulation order.
    w1_f = (w1[:, :, 0, 0] * s1[:, None]).T                                 # (Cin, Cmid)
    w2_f = jnp.transpose(w2 * s2[:, None, None, None],
                         (2, 3, 1, 0)).reshape(9, planes, planes)           # (9, Cmid, Cmid)
    w3_f = (w3[:, :, 0, 0] * s3[:, None]).T                                 # (Cmid, Cout)

    return {
        # raw weights / BN affine for the pure-JAX references
        "w1_oihw": w1, "w2_oihw": w2, "w3_oihw": w3,
        "s1": s1, "s2": s2, "s3": s3,
        # kernel-side folded parameters
        "w1": w1_f, "w2": w2_f, "w3": w3_f,
        "b1": b1.reshape(1, planes), "b2": b2.reshape(1, planes),
        "b3": b3.reshape(1, cout),
    }


# ------------------------------ pure-JAX references -----------------------------

def _conv(x, w, pad):
    return jax.lax.conv_general_dilated(
        x, w, (1, 1), [(pad, pad), (pad, pad)],
        dimension_numbers=("NCHW", "OIHW", "NCHW"))


def bottleneck_reference(x_nchw, params):
    """Textbook conv -> BN -> ReLU reference (BN applied after each conv)."""
    def bn(x, s, b):
        return x * s.reshape(1, -1, 1, 1) + b.reshape(1, -1, 1, 1)

    out = jax.nn.relu(bn(_conv(x_nchw, params["w1_oihw"], 0), params["s1"], params["b1"]))
    out = jax.nn.relu(bn(_conv(out, params["w2_oihw"], 1), params["s2"], params["b2"]))
    out = bn(_conv(out, params["w3_oihw"], 0), params["s3"], params["b3"])
    return jax.nn.relu(out + x_nchw)


def bottleneck_reference_folded(x_nchw, params):
    """Mathematically identical reference with BN scale folded into the conv weights
    (same weight values the kernel consumes -> tight numerical comparison)."""
    w1f = params["w1_oihw"] * params["s1"][:, None, None, None]
    w2f = params["w2_oihw"] * params["s2"][:, None, None, None]
    w3f = params["w3_oihw"] * params["s3"][:, None, None, None]
    b = lambda v: v.reshape(1, -1, 1, 1)
    out = jax.nn.relu(_conv(x_nchw, w1f, 0) + b(params["b1"]))
    out = jax.nn.relu(_conv(out, w2f, 1) + b(params["b2"]))
    out = _conv(out, w3f, 0) + b(params["b3"])
    return jax.nn.relu(out + x_nchw)


# ------------------------------------- main --------------------------------------

if __name__ == "__main__":
    key = jax.random.PRNGKey(0)
    k_x, k_p = jax.random.split(key)

    planes = 32
    inplanes = planes * EXPANSION          # 128: residual valid and lane-dense output
    batch, height, width = 2, 16, 16

    x = jax.random.normal(k_x, (batch, inplanes, height, width), jnp.float32)
    params = make_params(k_p, inplanes, planes)

    ref = jax.block_until_ready(bottleneck_reference(x, params))
    ref_folded = jax.block_until_ready(bottleneck_reference_folded(x, params))

    def run_all(weight_buffering):
        # f32, 4 row-tiles (exercises top / interior / bottom halo handling).
        out = jax.block_until_ready(
            bottleneck_forward(x, params, tile_h=4, weight_buffering=weight_buffering))
        assert out.shape == (batch, inplanes, height, width)
        assert jnp.allclose(out, ref_folded, atol=2e-3, rtol=2e-3), (
            f"f32 tile_h=4: max |diff| = {jnp.max(jnp.abs(out - ref_folded))}")
        assert jnp.allclose(out, ref, atol=3e-2, rtol=3e-2), (
            f"f32 vs unfolded reference: max |diff| = {jnp.max(jnp.abs(out - ref))}")

        # f32, VMEM-budget-derived tile size (full-H tile at this small shape).
        out_auto = jax.block_until_ready(
            bottleneck_forward(x, params, weight_buffering=weight_buffering))
        assert jnp.allclose(out_auto, ref_folded, atol=2e-3, rtol=2e-3), "auto-tile mismatch"

        # batch-1: auto tiling must keep >= 2 parallel grid steps for the v7x megacore.
        out_b1 = jax.block_until_ready(
            bottleneck_forward(x[:1], params, weight_buffering=weight_buffering))
        assert jnp.allclose(out_b1, ref_folded[:1], atol=2e-3, rtol=2e-3), "batch-1 mismatch"

        # bf16 matmuls + bf16 HBM I/O (f32 accumulation, f32 BN/ReLU/residual epilogue).
        out_bf16 = jax.block_until_ready(
            bottleneck_forward(x, params, tile_h=8, compute_dtype=jnp.bfloat16,
                               weight_buffering=weight_buffering))
        rel_l2 = (jnp.linalg.norm(out_bf16.astype(jnp.float32) - ref_folded)
                  / jnp.linalg.norm(ref_folded))
        assert rel_l2 < 3e-2, f"bf16 path relative L2 error {rel_l2}"

    try:
        # Preferred configuration: resident weights single-buffered to reclaim VMEM.
        run_all(weight_buffering=1)
    except Exception:
        # Fallback if this JAX/Mosaic build rejects pipeline_mode=pl.Buffered(1);
        # genuine kernel bugs would fail here as well and still surface.
        run_all(weight_buffering=None)

    print("KERNEL_OK")
</pallas_src>

<mosaic_0001>
module attributes {stable_mosaic.version = 11 : i64} {
  func.func @_bottleneck_kernel(%arg0: i32, %arg1: i32, %arg2: memref<1x4x16x128xf32, #tpu.memory_space<vmem>>, %arg3: memref<1x1x16x128xf32, #tpu.memory_space<vmem>>, %arg4: memref<1x1x16x128xf32, #tpu.memory_space<vmem>>, %arg5: memref<128x32xf32, #tpu.memory_space<vmem>>, %arg6: memref<1x32xf32, #tpu.memory_space<vmem>>, %arg7: memref<9x32x32xf32, #tpu.memory_space<vmem>>, %arg8: memref<1x32xf32, #tpu.memory_space<vmem>>, %arg9: memref<32x128xf32, #tpu.memory_space<vmem>>, %arg10: memref<1x128xf32, #tpu.memory_space<vmem>>, %arg11: memref<1x4x16x128xf32, #tpu.memory_space<vmem>>) attributes {dimension_semantics = [#tpu.dimension_semantics<parallel>, #tpu.dimension_semantics<parallel>], iteration_bounds = array<i64: 2, 4>, scalar_prefetch = 0 : i64, scratch_operands = 0 : i64, tpu.core_type = #tpu.core_type<tc>, window_params = [{transform_indices = @transform_0, window_bounds = array<i64: 1, 4, 16, 128>}, {transform_indices = @transform_1, window_bounds = array<i64: 1, 1, 16, 128>}, {transform_indices = @transform_2, window_bounds = array<i64: 1, 1, 16, 128>}, {pipeline_mode = #tpu.pipeline_mode<synchronous>, transform_indices = @transform_3, window_bounds = array<i64: 128, 32>}, {pipeline_mode = #tpu.pipeline_mode<synchronous>, transform_indices = @transform_4, window_bounds = array<i64: 1, 32>}, {pipeline_mode = #tpu.pipeline_mode<synchronous>, transform_indices = @transform_5, window_bounds = array<i64: 9, 32, 32>}, {pipeline_mode = #tpu.pipeline_mode<synchronous>, transform_indices = @transform_6, window_bounds = array<i64: 1, 32>}, {pipeline_mode = #tpu.pipeline_mode<synchronous>, transform_indices = @transform_7, window_bounds = array<i64: 32, 128>}, {pipeline_mode = #tpu.pipeline_mode<synchronous>, transform_indices = @transform_8, window_bounds = array<i64: 1, 128>}, {transform_indices = @transform_9, window_bounds = array<i64: 1, 4, 16, 128>}]} {
    %c0 = arith.constant 0 : index
    %c0_0 = arith.constant 0 : index
    %0 = vector.load %arg5[%c0, %c0_0] : memref<128x32xf32, #tpu.memory_space<vmem>>, vector<128x32xf32>
    %c0_1 = arith.constant 0 : index
    %c0_2 = arith.constant 0 : index
    %1 = vector.load %arg6[%c0_1, %c0_2] : memref<1x32xf32, #tpu.memory_space<vmem>>, vector<1x32xf32>
    %c0_3 = arith.constant 0 : index
    %c0_4 = arith.constant 0 : index
    %c0_5 = arith.constant 0 : index
    %c0_6 = arith.constant 0 : index
    %2 = vector.load %arg2[%c0_3, %c0_4, %c0_5, %c0_6] : memref<1x4x16x128xf32, #tpu.memory_space<vmem>>, vector<1x4x16x128xf32>
    %3 = vector.shape_cast %2 : vector<1x4x16x128xf32> to vector<4x16x128xf32>
    %c0_i32 = arith.constant 0 : i32
    %4 = arith.cmpi sgt, %arg1, %c0_i32 : i32
    %5 = arith.extui %4 : i1 to i32
    %6 = arith.sitofp %5 : i32 to f32
    %c3_i32 = arith.constant 3 : i32
    %7 = arith.cmpi slt, %arg1, %c3_i32 : i32
    %8 = arith.extui %7 : i1 to i32
    %9 = arith.sitofp %8 : i32 to f32
    %10 = vector.shape_cast %3 : vector<4x16x128xf32> to vector<64x128xf32>
    %cst = arith.constant dense<0.000000e+00> : vector<64x32xf32>
    %11 = tpu.matmul %10, %0, %cst {dimension_numbers = #tpu.dot_dimension_numbers<[1], [0], [0], [1], [0, 0, 1, 1], [], []>} : vector<64x128xf32>, vector<128x32xf32>, vector<64x32xf32> -> vector<64x32xf32>
    %12 = vector.broadcast %1 : vector<1x32xf32> to vector<64x32xf32>
    %13 = arith.addf %11, %12 : vector<64x32xf32>
    %cst_7 = arith.constant 0.000000e+00 : f32
    %14 = vector.broadcast %cst_7 : f32 to vector<64x32xf32>
    %15 = arith.maximumf %13, %14 : vector<64x32xf32>
    %16 = vector.shape_cast %15 : vector<64x32xf32> to vector<4x16x32xf32>
    %c0_8 = arith.constant 0 : index
    %c0_9 = arith.constant 0 : index
    %c0_10 = arith.constant 0 : index
    %c0_11 = arith.constant 0 : index
    %17 = vector.load %arg3[%c0_8, %c0_9, %c0_10, %c0_11] : memref<1x1x16x128xf32, #tpu.memory_space<vmem>>, vector<1x1x16x128xf32>
    %18 = vector.shape_cast %17 : vector<1x1x16x128xf32> to vector<1x16x128xf32>
    %19 = vector.shape_cast %18 : vector<1x16x128xf32> to vector<16x128xf32>
    %cst_12 = arith.constant dense<0.000000e+00> : vector<16x32xf32>
    %20 = tpu.matmul %19, %0, %cst_12 {dimension_numbers = #tpu.dot_dimension_numbers<[1], [0], [0], [1], [0, 0, 1, 1], [], []>} : vector<16x128xf32>, vector<128x32xf32>, vector<16x32xf32> -> vector<16x32xf32>
    %21 = vector.broadcast %1 : vector<1x32xf32> to vector<16x32xf32>
    %22 = arith.addf %20, %21 : vector<16x32xf32>
    %cst_13 = arith.constant 0.000000e+00 : f32
    %23 = vector.broadcast %cst_13 : f32 to vector<16x32xf32>
    %24 = arith.maximumf %22, %23 : vector<16x32xf32>
    %25 = vector.shape_cast %24 : vector<16x32xf32> to vector<1x16x32xf32>
    %26 = vector.broadcast %6 : f32 to vector<1x16x32xf32>
    %27 = arith.mulf %25, %26 : vector<1x16x32xf32>
    %c0_14 = arith.constant 0 : index
    %c0_15 = arith.constant 0 : index
    %c0_16 = arith.constant 0 : index
    %c0_17 = arith.constant 0 : index
    %28 = vector.load %arg4[%c0_14, %c0_15, %c0_16, %c0_17] : memref<1x1x16x128xf32, #tpu.memory_space<vmem>>, vector<1x1x16x128xf32>
    %29 = vector.shape_cast %28 : vector<1x1x16x128xf32> to vector<1x16x128xf32>
    %30 = vector.shape_cast %29 : vector<1x16x128xf32> to vector<16x128xf32>
    %cst_18 = arith.constant dense<0.000000e+00> : vector<16x32xf32>
    %31 = tpu.matmul %30, %0, %cst_18 {dimension_numbers = #tpu.dot_dimension_numbers<[1], [0], [0], [1], [0, 0, 1, 1], [], []>} : vector<16x128xf32>, vector<128x32xf32>, vector<16x32xf32> -> vector<16x32xf32>
    %32 = vector.broadcast %1 : vector<1x32xf32> to vector<16x32xf32>
    %33 = arith.addf %31, %32 : vector<16x32xf32>
    %cst_19 = arith.constant 0.000000e+00 : f32
    %34 = vector.broadcast %cst_19 : f32 to vector<16x32xf32>
    %35 = arith.maximumf %33, %34 : vector<16x32xf32>
    %36 = vector.shape_cast %35 : vector<16x32xf32> to vector<1x16x32xf32>
    %37 = vector.broadcast %9 : f32 to vector<1x16x32xf32>
    %38 = arith.mulf %36, %37 : vector<1x16x32xf32>
    %39 = tpu.concatenate %27, %16, %38 in 0 : vector<1x16x32xf32>, vector<4x16x32xf32>, vector<1x16x32xf32> -> vector<6x16x32xf32>
    %cst_20 = arith.constant 0.000000e+00 : f32
    %40 = vector.broadcast %cst_20 : f32 to vector<6x1x32xf32>
    %41 = vector.extract_strided_slice %39 {offsets = [0, 0, 0], sizes = [6, 15, 32], strides = [1, 1, 1]} : vector<6x16x32xf32> to vector<6x15x32xf32>
    %42 = tpu.concatenate %40, %41 in 1 : vector<6x1x32xf32>, vector<6x15x32xf32> -> vector<6x16x32xf32>
    %43 = vector.extract_strided_slice %39 {offsets = [0, 1, 0], sizes = [6, 15, 32], strides = [1, 1, 1]} : vector<6x16x32xf32> to vector<6x15x32xf32>
    %44 = tpu.concatenate %43, %40 in 1 : vector<6x15x32xf32>, vector<6x1x32xf32> -> vector<6x16x32xf32>
    %cst_21 = arith.constant 0.000000e+00 : f32
    %45 = vector.broadcast %cst_21 : f32 to vector<64x32xf32>
    %46 = vector.extract_strided_slice %42 {offsets = [0, 0, 0], sizes = [4, 16, 32], strides = [1, 1, 1]} : vector<6x16x32xf32> to vector<4x16x32xf32>
    %47 = vector.shape_cast %46 : vector<4x16x32xf32> to vector<64x32xf32>
    %c0_22 = arith.constant 0 : index
    %c0_23 = arith.constant 0 : index
    %c0_24 = arith.constant 0 : index
    %48 = vector.load %arg7[%c0_22, %c0_23, %c0_24] : memref<9x32x32xf32, #tpu.memory_space<vmem>>, vector<1x32x32xf32>
    %49 = vector.shape_cast %48 : vector<1x32x32xf32> to vector<32x32xf32>
    %cst_25 = arith.constant dense<0.000000e+00> : vector<64x32xf32>
    %50 = tpu.matmul %47, %49, %cst_25 {dimension_numbers = #tpu.dot_dimension_numbers<[1], [0], [0], [1], [0, 0, 1, 1], [], []>} : vector<64x32xf32>, vector<32x32xf32>, vector<64x32xf32> -> vector<64x32xf32>
    %51 = arith.addf %45, %50 : vector<64x32xf32>
    %52 = vector.extract_strided_slice %39 {offsets = [0, 0, 0], sizes = [4, 16, 32], strides = [1, 1, 1]} : vector<6x16x32xf32> to vector<4x16x32xf32>
    %53 = vector.shape_cast %52 : vector<4x16x32xf32> to vector<64x32xf32>
    %c1 = arith.constant 1 : index
    %c0_26 = arith.constant 0 : index
    %c0_27 = arith.constant 0 : index
    %54 = vector.load %arg7[%c1, %c0_26, %c0_27] : memref<9x32x32xf32, #tpu.memory_space<vmem>>, vector<1x32x32xf32>
    %55 = vector.shape_cast %54 : vector<1x32x32xf32> to vector<32x32xf32>
    %cst_28 = arith.constant dense<0.000000e+00> : vector<64x32xf32>
    %56 = tpu.matmul %53, %55, %cst_28 {dimension_numbers = #tpu.dot_dimension_numbers<[1], [0], [0], [1], [0, 0, 1, 1], [], []>} : vector<64x32xf32>, vector<32x32xf32>, vector<64x32xf32> -> vector<64x32xf32>
    %57 = arith.addf %51, %56 : vector<64x32xf32>
    %58 = vector.extract_strided_slice %44 {offsets = [0, 0, 0], sizes = [4, 16, 32], strides = [1, 1, 1]} : vector<6x16x32xf32> to vector<4x16x32xf32>
    %59 = vector.shape_cast %58 : vector<4x16x32xf32> to vector<64x32xf32>
    %c2 = arith.constant 2 : index
    %c0_29 = arith.constant 0 : index
    %c0_30 = arith.constant 0 : index
    %60 = vector.load %arg7[%c2, %c0_29, %c0_30] : memref<9x32x32xf32, #tpu.memory_space<vmem>>, vector<1x32x32xf32>
    %61 = vector.shape_cast %60 : vector<1x32x32xf32> to vector<32x32xf32>
    %cst_31 = arith.constant dense<0.000000e+00> : vector<64x32xf32>
    %62 = tpu.matmul %59, %61, %cst_31 {dimension_numbers = #tpu.dot_dimension_numbers<[1], [0], [0], [1], [0, 0, 1, 1], [], []>} : vector<64x32xf32>, vector<32x32xf32>, vector<64x32xf32> -> vector<64x32xf32>
    %63 = arith.addf %57, %62 : vector<64x32xf32>
    %64 = vector.extract_strided_slice %42 {offsets = [1, 0, 0], sizes = [4, 16, 32], strides = [1, 1, 1]} : vector<6x16x32xf32> to vector<4x16x32xf32>
    %65 = vector.shape_cast %64 : vector<4x16x32xf32> to vector<64x32xf32>
    %c3 = arith.constant 3 : index
    %c0_32 = arith.constant 0 : index
    %c0_33 = arith.constant 0 : index
    %66 = vector.load %arg7[%c3, %c0_32, %c0_33] : memref<9x32x32xf32, #tpu.memory_space<vmem>>, vector<1x32x32xf32>
    %67 = vector.shape_cast %66 : vector<1x32x32xf32> to vector<32x32xf32>
    %cst_34 = arith.constant dense<0.000000e+00> : vector<64x32xf32>
    %68 = tpu.matmul %65, %67, %cst_34 {dimension_numbers = #tpu.dot_dimension_numbers<[1], [0], [0], [1], [0, 0, 1, 1], [], []>} : vector<64x32xf32>, vector<32x32xf32>, vector<64x32xf32> -> vector<64x32xf32>
    %69 = arith.addf %63, %68 : vector<64x32xf32>
    %70 = vector.extract_strided_slice %39 {offsets = [1, 0, 0], sizes = [4, 16, 32], strides = [1, 1, 1]} : vector<6x16x32xf32> to vector<4x16x32xf32>
    %71 = vector.shape_cast %70 : vector<4x16x32xf32> to vector<64x32xf32>
    %c4 = arith.constant 4 : index
    %c0_35 = arith.constant 0 : index
    %c0_36 = arith.constant 0 : index
    %72 = vector.load %arg7[%c4, %c0_35, %c0_36] : memref<9x32x32xf32, #tpu.memory_space<vmem>>, vector<1x32x32xf32>
    %73 = vector.shape_cast %72 : vector<1x32x32xf32> to vector<32x32xf32>
    %cst_37 = arith.constant dense<0.000000e+00> : vector<64x32xf32>
    %74 = tpu.matmul %71, %73, %cst_37 {dimension_numbers = #tpu.dot_dimension_numbers<[1], [0], [0], [1], [0, 0, 1, 1], [], []>} : vector<64x32xf32>, vector<32x32xf32>, vector<64x32xf32> -> vector<64x32xf32>
    %75 = arith.addf %69, %74 : vector<64x32xf32>
    %76 = vector.extract_strided_slice %44 {offsets = [1, 0, 0], sizes = [4, 16, 32], strides = [1, 1, 1]} : vector<6x16x32xf32> to vector<4x16x32xf32>
    %77 = vector.shape_cast %76 : vector<4x16x32xf32> to vector<64x32xf32>
    %c5 = arith.constant 5 : index
    %c0_38 = arith.constant 0 : index
    %c0_39 = arith.constant 0 : index
    %78 = vector.load %arg7[%c5, %c0_38, %c0_39] : memref<9x32x32xf32, #tpu.memory_space<vmem>>, vector<1x32x32xf32>
    %79 = vector.shape_cast %78 : vector<1x32x32xf32> to vector<32x32xf32>
    %cst_40 = arith.constant dense<0.000000e+00> : vector<64x32xf32>
    %80 = tpu.matmul %77, %79, %cst_40 {dimension_numbers = #tpu.dot_dimension_numbers<[1], [0], [0], [1], [0, 0, 1, 1], [], []>} : vector<64x32xf32>, vector<32x32xf32>, vector<64x32xf32> -> vector<64x32xf32>
    %81 = arith.addf %75, %80 : vector<64x32xf32>
    %82 = vector.extract_strided_slice %42 {offsets = [2, 0, 0], sizes = [4, 16, 32], strides = [1, 1, 1]} : vector<6x16x32xf32> to vector<4x16x32xf32>
    %83 = vector.shape_cast %82 : vector<4x16x32xf32> to vector<64x32xf32>
    %c6 = arith.constant 6 : index
    %c0_41 = arith.constant 0 : index
    %c0_42 = arith.constant 0 : index
    %84 = vector.load %arg7[%c6, %c0_41, %c0_42] : memref<9x32x32xf32, #tpu.memory_space<vmem>>, vector<1x32x32xf32>
    %85 = vector.shape_cast %84 : vector<1x32x32xf32> to vector<32x32xf32>
    %cst_43 = arith.constant dense<0.000000e+00> : vector<64x32xf32>
    %86 = tpu.matmul %83, %85, %cst_43 {dimension_numbers = #tpu.dot_dimension_numbers<[1], [0], [0], [1], [0, 0, 1, 1], [], []>} : vector<64x32xf32>, vector<32x32xf32>, vector<64x32xf32> -> vector<64x32xf32>
    %87 = arith.addf %81, %86 : vector<64x32xf32>
    %88 = vector.extract_strided_slice %39 {offsets = [2, 0, 0], sizes = [4, 16, 32], strides = [1, 1, 1]} : vector<6x16x32xf32> to vector<4x16x32xf32>
    %89 = vector.shape_cast %88 : vector<4x16x32xf32> to vector<64x32xf32>
    %c7 = arith.constant 7 : index
    %c0_44 = arith.constant 0 : index
    %c0_45 = arith.constant 0 : index
    %90 = vector.load %arg7[%c7, %c0_44, %c0_45] : memref<9x32x32xf32, #tpu.memory_space<vmem>>, vector<1x32x32xf32>
    %91 = vector.shape_cast %90 : vector<1x32x32xf32> to vector<32x32xf32>
    %cst_46 = arith.constant dense<0.000000e+00> : vector<64x32xf32>
    %92 = tpu.matmul %89, %91, %cst_46 {dimension_numbers = #tpu.dot_dimension_numbers<[1], [0], [0], [1], [0, 0, 1, 1], [], []>} : vector<64x32xf32>, vector<32x32xf32>, vector<64x32xf32> -> vector<64x32xf32>
    %93 = arith.addf %87, %92 : vector<64x32xf32>
    %94 = vector.extract_strided_slice %44 {offsets = [2, 0, 0], sizes = [4, 16, 32], strides = [1, 1, 1]} : vector<6x16x32xf32> to vector<4x16x32xf32>
    %95 = vector.shape_cast %94 : vector<4x16x32xf32> to vector<64x32xf32>
    %c8 = arith.constant 8 : index
    %c0_47 = arith.constant 0 : index
    %c0_48 = arith.constant 0 : index
    %96 = vector.load %arg7[%c8, %c0_47, %c0_48] : memref<9x32x32xf32, #tpu.memory_space<vmem>>, vector<1x32x32xf32>
    %97 = vector.shape_cast %96 : vector<1x32x32xf32> to vector<32x32xf32>
    %cst_49 = arith.constant dense<0.000000e+00> : vector<64x32xf32>
    %98 = tpu.matmul %95, %97, %cst_49 {dimension_numbers = #tpu.dot_dimension_numbers<[1], [0], [0], [1], [0, 0, 1, 1], [], []>} : vector<64x32xf32>, vector<32x32xf32>, vector<64x32xf32> -> vector<64x32xf32>
    %99 = arith.addf %93, %98 : vector<64x32xf32>
    %c0_50 = arith.constant 0 : index
    %c0_51 = arith.constant 0 : index
    %100 = vector.load %arg8[%c0_50, %c0_51] : memref<1x32xf32, #tpu.memory_space<vmem>>, vector<1x32xf32>
    %101 = vector.broadcast %100 : vector<1x32xf32> to vector<64x32xf32>
    %102 = arith.addf %99, %101 : vector<64x32xf32>
    %cst_52 = arith.constant 0.000000e+00 : f32
    %103 = vector.broadcast %cst_52 : f32 to vector<64x32xf32>
    %104 = arith.maximumf %102, %103 : vector<64x32xf32>
    %c0_53 = arith.constant 0 : index
    %c0_54 = arith.constant 0 : index
    %105 = vector.load %arg9[%c0_53, %c0_54] : memref<32x128xf32, #tpu.memory_space<vmem>>, vector<32x128xf32>
    %cst_55 = arith.constant dense<0.000000e+00> : vector<64x128xf32>
    %106 = tpu.matmul %104, %105, %cst_55 {dimension_numbers = #tpu.dot_dimension_numbers<[1], [0], [0], [1], [0, 0, 1, 1], [], []>} : vector<64x32xf32>, vector<32x128xf32>, vector<64x128xf32> -> vector<64x128xf32>
    %c0_56 = arith.constant 0 : index
    %c0_57 = arith.constant 0 : index
    %107 = vector.load %arg10[%c0_56, %c0_57] : memref<1x128xf32, #tpu.memory_space<vmem>>, vector<1x128xf32>
    %108 = vector.broadcast %107 : vector<1x128xf32> to vector<64x128xf32>
    %109 = arith.addf %106, %108 : vector<64x128xf32>
    %110 = vector.shape_cast %3 : vector<4x16x128xf32> to vector<64x128xf32>
    %111 = arith.addf %109, %110 : vector<64x128xf32>
    %cst_58 = arith.constant 0.000000e+00 : f32
    %112 = vector.broadcast %cst_58 : f32 to vector<64x128xf32>
    %113 = arith.maximumf %111, %112 : vector<64x128xf32>
    %114 = vector.shape_cast %113 : vector<64x128xf32> to vector<1x4x16x128xf32>
    %c0_59 = arith.constant 0 : index
    %c0_60 = arith.constant 0 : index
    %c0_61 = arith.constant 0 : index
    %c0_62 = arith.constant 0 : index
    %115 = vector.load %arg11[%c0_59, %c0_60, %c0_61, %c0_62] : memref<1x4x16x128xf32, #tpu.memory_space<vmem>>, vector<1x4x16x128xf32>
    tpu.vector_store %arg11[%c0_59, %c0_60, %c0_61, %c0_62], %114 {strides = array<i32>} : memref<1x4x16x128xf32, #tpu.memory_space<vmem>>, vector<1x4x16x128xf32>,
    return
  }
  func.func @transform_0(%arg0: i32, %arg1: i32) -> (i32, i32, i32, i32) {
    %c0_i32 = arith.constant 0 : i32
    %c0_i32_0 = arith.constant 0 : i32
    %c0_i32_1 = arith.constant 0 : i32
    return %arg0, %arg1, %c0_i32, %c0_i32_0 : i32, i32, i32, i32
  }
  func.func @transform_1(%arg0: i32, %arg1: i32) -> (i32, i32, i32, i32) {
    %c4_i32 = arith.constant 4 : i32
    %0 = arith.muli %arg1, %c4_i32 : i32
    %c1_i32 = arith.constant 1 : i32
    %1 = arith.subi %0, %c1_i32 : i32
    %c0_i32 = arith.constant 0 : i32
    %2 = arith.maxsi %1, %c0_i32 : i32
    %c0_i32_0 = arith.constant 0 : i32
    %c0_i32_1 = arith.constant 0 : i32
    %c0_i32_2 = arith.constant 0 : i32
    return %arg0, %2, %c0_i32_0, %c0_i32_1 : i32, i32, i32, i32
  }
  func.func @transform_2(%arg0: i32, %arg1: i32) -> (i32, i32, i32, i32) {
    %c4_i32 = arith.constant 4 : i32
    %0 = arith.muli %arg1, %c4_i32 : i32
    %c4_i32_0 = arith.constant 4 : i32
    %1 = arith.addi %0, %c4_i32_0 : i32
    %c15_i32 = arith.constant 15 : i32
    %2 = arith.minsi %1, %c15_i32 : i32
    %c0_i32 = arith.constant 0 : i32
    %c0_i32_1 = arith.constant 0 : i32
    %c0_i32_2 = arith.constant 0 : i32
    return %arg0, %2, %c0_i32, %c0_i32_1 : i32, i32, i32, i32
  }
  func.func @transform_3(%arg0: i32, %arg1: i32) -> (i32, i32) {
    %c0_i32 = arith.constant 0 : i32
    %c0_i32_0 = arith.constant 0 : i32
    %c0_i32_1 = arith.constant 0 : i32
    return %c0_i32, %c0_i32_0 : i32, i32
  }
  func.func @transform_4(%arg0: i32, %arg1: i32) -> (i32, i32) {
    %c0_i32 = arith.constant 0 : i32
    %c0_i32_0 = arith.constant 0 : i32
    %c0_i32_1 = arith.constant 0 : i32
    return %c0_i32, %c0_i32_0 : i32, i32
  }
  func.func @transform_5(%arg0: i32, %arg1: i32) -> (i32, i32, i32) {
    %c0_i32 = arith.constant 0 : i32
    %c0_i32_0 = arith.constant 0 : i32
    %c0_i32_1 = arith.constant 0 : i32
    %c0_i32_2 = arith.constant 0 : i32
    return %c0_i32, %c0_i32_0, %c0_i32_1 : i32, i32, i32
  }
  func.func @transform_6(%arg0: i32, %arg1: i32) -> (i32, i32) {
    %c0_i32 = arith.constant 0 : i32
    %c0_i32_0 = arith.constant 0 : i32
    %c0_i32_1 = arith.constant 0 : i32
    return %c0_i32, %c0_i32_0 : i32, i32
  }
  func.func @transform_7(%arg0: i32, %arg1: i32) -> (i32, i32) {
    %c0_i32 = arith.constant 0 : i32
    %c0_i32_0 = arith.constant 0 : i32
    %c0_i32_1 = arith.constant 0 : i32
    return %c0_i32, %c0_i32_0 : i32, i32
  }
  func.func @transform_8(%arg0: i32, %arg1: i32) -> (i32, i32) {
    %c0_i32 = arith.constant 0 : i32
    %c0_i32_0 = arith.constant 0 : i32
    %c0_i32_1 = arith.constant 0 : i32
    return %c0_i32, %c0_i32_0 : i32, i32
  }
  func.func @transform_9(%arg0: i32, %arg1: i32) -> (i32, i32, i32, i32) {
    %c0_i32 = arith.constant 0 : i32
    %c0_i32_0 = arith.constant 0 : i32
    %c0_i32_1 = arith.constant 0 : i32
    return %arg0, %arg1, %c0_i32, %c0_i32_0 : i32, i32, i32, i32
  }
}

module attributes {stable_mosaic.version = 11 : i64} {
  func.func @_bottleneck_kernel(%arg0: i32, %arg1: i32, %arg2: memref<1x4x16x128xf32, #tpu.memory_space<vmem>>, %arg3: memref<1x1x16x128xf32, #tpu.memory_space<vmem>>, %arg4: memref<1x1x16x128xf32, #tpu.memory_space<vmem>>, %arg5: memref<128x32xf32, #tpu.memory_space<vmem>>, %arg6: memref<1x32xf32, #tpu.memory_space<vmem>>, %arg7: memref<9x32x32xf32, #tpu.memory_space<vmem>>, %arg8: memref<1x32xf32, #tpu.memory_space<vmem>>, %arg9: memref<32x128xf32, #tpu.memory_space<vmem>>, %arg10: memref<1x128xf32, #tpu.memory_space<vmem>>, %arg11: memref<1x4x16x128xf32, #tpu.memory_space<vmem>>) attributes {dimension_semantics = [#tpu.dimension_semantics<parallel>, #tpu.dimension_semantics<parallel>], iteration_bounds = array<i64: 2, 4>, scalar_prefetch = 0 : i64, scratch_operands = 0 : i64, tpu.core_type = #tpu.core_type<tc>, window_params = [{transform_indices = @transform_0, window_bounds = array<i64: 1, 4, 16, 128>}, {transform_indices = @transform_1, window_bounds = array<i64: 1, 1, 16, 128>}, {transform_indices = @transform_2, window_bounds = array<i64: 1, 1, 16, 128>}, {pipeline_mode = #tpu.pipeline_mode<synchronous>, transform_indices = @transform_3, window_bounds = array<i64: 128, 32>}, {pipeline_mode = #tpu.pipeline_mode<synchronous>, transform_indices = @transform_4, window_bounds = array<i64: 1, 32>}, {pipeline_mode = #tpu.pipeline_mode<synchronous>, transform_indices = @transform_5, window_bounds = array<i64: 9, 32, 32>}, {pipeline_mode = #tpu.pipeline_mode<synchronous>, transform_indices = @transform_6, window_bounds = array<i64: 1, 32>}, {pipeline_mode = #tpu.pipeline_mode<synchronous>, transform_indices = @transform_7, window_bounds = array<i64: 32, 128>}, {pipeline_mode = #tpu.pipeline_mode<synchronous>, transform_indices = @transform_8, window_bounds = array<i64: 1, 128>}, {transform_indices = @transform_9, window_bounds = array<i64: 1, 4, 16, 128>}]} {
    %c0 = arith.constant 0 : index
    %c0_0 = arith.constant 0 : index
    %0 = vector.load %arg5[%c0, %c0_0] : memref<128x32xf32, #tpu.memory_space<vmem>>, vector<128x32xf32>
    %c0_1 = arith.constant 0 : index
    %c0_2 = arith.constant 0 : index
    %1 = vector.load %arg6[%c0_1, %c0_2] : memref<1x32xf32, #tpu.memory_space<vmem>>, vector<1x32xf32>
    %c0_3 = arith.constant 0 : index
    %c0_4 = arith.constant 0 : index
    %c0_5 = arith.constant 0 : index
    %c0_6 = arith.constant 0 : index
    %2 = vector.load %arg2[%c0_3, %c0_4, %c0_5, %c0_6] : memref<1x4x16x128xf32, #tpu.memory_space<vmem>>, vector<1x4x16x128xf32>
    %3 = vector.shape_cast %2 : vector<1x4x16x128xf32> to vector<4x16x128xf32>
    %c0_i32 = arith.constant 0 : i32
    %4 = arith.cmpi sgt, %arg1, %c0_i32 : i32
    %5 = arith.extui %4 : i1 to i32
    %6 = arith.sitofp %5 : i32 to f32
    %c3_i32 = arith.constant 3 : i32
    %7 = arith.cmpi slt, %arg1, %c3_i32 : i32
    %8 = arith.extui %7 : i1 to i32
    %9 = arith.sitofp %8 : i32 to f32
    %10 = vector.shape_cast %3 : vector<4x16x128xf32> to vector<64x128xf32>
    %cst = arith.constant dense<0.000000e+00> : vector<64x32xf32>
    %11 = tpu.matmul %10, %0, %cst {dimension_numbers = #tpu.dot_dimension_numbers<[1], [0], [0], [1], [0, 0, 1, 1], [], []>} : vector<64x128xf32>, vector<128x32xf32>, vector<64x32xf32> -> vector<64x32xf32>
    %12 = vector.broadcast %1 : vector<1x32xf32> to vector<64x32xf32>
    %13 = arith.addf %11, %12 : vector<64x32xf32>
    %cst_7 = arith.constant 0.000000e+00 : f32
    %14 = vector.broadcast %cst_7 : f32 to vector<64x32xf32>
    %15 = arith.maximumf %13, %14 : vector<64x32xf32>
    %16 = vector.shape_cast %15 : vector<64x32xf32> to vector<4x16x32xf32>
    %c0_8 = arith.constant 0 : index
    %c0_9 = arith.constant 0 : index
    %c0_10 = arith.constant 0 : index
    %c0_11 = arith.constant 0 : index
    %17 = vector.load %arg3[%c0_8, %c0_9, %c0_10, %c0_11] : memref<1x1x16x128xf32, #tpu.memory_space<vmem>>, vector<1x1x16x128xf32>
    %18 = vector.shape_cast %17 : vector<1x1x16x128xf32> to vector<1x16x128xf32>
    %19 = vector.shape_cast %18 : vector<1x16x128xf32> to vector<16x128xf32>
    %cst_12 = arith.constant dense<0.000000e+00> : vector<16x32xf32>
    %20 = tpu.matmul %19, %0, %cst_12 {dimension_numbers = #tpu.dot_dimension_numbers<[1], [0], [0], [1], [0, 0, 1, 1], [], []>} : vector<16x128xf32>, vector<128x32xf32>, vector<16x32xf32> -> vector<16x32xf32>
    %21 = vector.broadcast %1 : vector<1x32xf32> to vector<16x32xf32>
    %22 = arith.addf %20, %21 : vector<16x32xf32>
    %cst_13 = arith.constant 0.000000e+00 : f32
    %23 = vector.broadcast %cst_13 : f32 to vector<16x32xf32>
    %24 = arith.maximumf %22, %23 : vector<16x32xf32>
    %25 = vector.shape_cast %24 : vector<16x32xf32> to vector<1x16x32xf32>
    %26 = vector.broadcast %6 : f32 to vector<1x16x32xf32>
    %27 = arith.mulf %25, %26 : vector<1x16x32xf32>
    %c0_14 = arith.constant 0 : index
    %c0_15 = arith.constant 0 : index
    %c0_16 = arith.constant 0 : index
    %c0_17 = arith.constant 0 : index
    %28 = vector.load %arg4[%c0_14, %c0_15, %c0_16, %c0_17] : memref<1x1x16x128xf32, #tpu.memory_space<vmem>>, vector<1x1x16x128xf32>
    %29 = vector.shape_cast %28 : vector<1x1x16x128xf32> to vector<1x16x128xf32>
    %30 = vector.shape_cast %29 : vector<1x16x128xf32> to vector<16x128xf32>
    %cst_18 = arith.constant dense<0.000000e+00> : vector<16x32xf32>
    %31 = tpu.matmul %30, %0, %cst_18 {dimension_numbers = #tpu.dot_dimension_numbers<[1], [0], [0], [1], [0, 0, 1, 1], [], []>} : vector<16x128xf32>, vector<128x32xf32>, vector<16x32xf32> -> vector<16x32xf32>
    %32 = vector.broadcast %1 : vector<1x32xf32> to vector<16x32xf32>
    %33 = arith.addf %31, %32 : vector<16x32xf32>
    %cst_19 = arith.constant 0.000000e+00 : f32
    %34 = vector.broadcast %cst_19 : f32 to vector<16x32xf32>
    %35 = arith.maximumf %33, %34 : vector<16x32xf32>
    %36 = vector.shape_cast %35 : vector<16x32xf32> to vector<1x16x32xf32>
    %37 = vector.broadcast %9 : f32 to vector<1x16x32xf32>
    %38 = arith.mulf %36, %37 : vector<1x16x32xf32>
    %39 = tpu.concatenate %27, %16, %38 in 0 : vector<1x16x32xf32>, vector<4x16x32xf32>, vector<1x16x32xf32> -> vector<6x16x32xf32>
    %cst_20 = arith.constant 0.000000e+00 : f32
    %40 = vector.broadcast %cst_20 : f32 to vector<6x1x32xf32>
    %41 = vector.extract_strided_slice %39 {offsets = [0, 0, 0], sizes = [6, 15, 32], strides = [1, 1, 1]} : vector<6x16x32xf32> to vector<6x15x32xf32>
    %42 = tpu.concatenate %40, %41 in 1 : vector<6x1x32xf32>, vector<6x15x32xf32> -> vector<6x16x32xf32>
    %43 = vector.extract_strided_slice %39 {offsets = [0, 1, 0], sizes = [6, 15, 32], strides = [1, 1, 1]} : vector<6x16x32xf32> to vector<6x15x32xf32>
    %44 = tpu.concatenate %43, %40 in 1 : vector<6x15x32xf32>, vector<6x1x32xf32> -> vector<6x16x32xf32>
    %cst_21 = arith.constant 0.000000e+00 : f32
    %45 = vector.broadcast %cst_21 : f32 to vector<64x32xf32>
    %46 = vector.extract_strided_slice %42 {offsets = [0, 0, 0], sizes = [4, 16, 32], strides = [1, 1, 1]} : vector<6x16x32xf32> to vector<4x16x32xf32>
    %47 = vector.shape_cast %46 : vector<4x16x32xf32> to vector<64x32xf32>
    %c0_22 = arith.constant 0 : index
    %c0_23 = arith.constant 0 : index
    %c0_24 = arith.constant 0 : index
    %48 = vector.load %arg7[%c0_22, %c0_23, %c0_24] : memref<9x32x32xf32, #tpu.memory_space<vmem>>, vector<1x32x32xf32>
    %49 = vector.shape_cast %48 : vector<1x32x32xf32> to vector<32x32xf32>
    %cst_25 = arith.constant dense<0.000000e+00> : vector<64x32xf32>
    %50 = tpu.matmul %47, %49, %cst_25 {dimension_numbers = #tpu.dot_dimension_numbers<[1], [0], [0], [1], [0, 0, 1, 1], [], []>} : vector<64x32xf32>, vector<32x32xf32>, vector<64x32xf32> -> vector<64x32xf32>
    %51 = arith.addf %45, %50 : vector<64x32xf32>
    %52 = vector.extract_strided_slice %39 {offsets = [0, 0, 0], sizes = [4, 16, 32], strides = [1, 1, 1]} : vector<6x16x32xf32> to vector<4x16x32xf32>
    %53 = vector.shape_cast %52 : vector<4x16x32xf32> to vector<64x32xf32>
    %c1 = arith.constant 1 : index
    %c0_26 = arith.constant 0 : index
    %c0_27 = arith.constant 0 : index
    %54 = vector.load %arg7[%c1, %c0_26, %c0_27] : memref<9x32x32xf32, #tpu.memory_space<vmem>>, vector<1x32x32xf32>
    %55 = vector.shape_cast %54 : vector<1x32x32xf32> to vector<32x32xf32>
    %cst_28 = arith.constant dense<0.000000e+00> : vector<64x32xf32>
    %56 = tpu.matmul %53, %55, %cst_28 {dimension_numbers = #tpu.dot_dimension_numbers<[1], [0], [0], [1], [0, 0, 1, 1], [], []>} : vector<64x32xf32>, vector<32x32xf32>, vector<64x32xf32> -> vector<64x32xf32>
    %57 = arith.addf %51, %56 : vector<64x32xf32>
    %58 = vector.extract_strided_slice %44 {offsets = [0, 0, 0], sizes = [4, 16, 32], strides = [1, 1, 1]} : vector<6x16x32xf32> to vector<4x16x32xf32>
    %59 = vector.shape_cast %58 : vector<4x16x32xf32> to vector<64x32xf32>
    %c2 = arith.constant 2 : index
    %c0_29 = arith.constant 0 : index
    %c0_30 = arith.constant 0 : index
    %60 = vector.load %arg7[%c2, %c0_29, %c0_30] : memref<9x32x32xf32, #tpu.memory_space<vmem>>, vector<1x32x32xf32>
    %61 = vector.shape_cast %60 : vector<1x32x32xf32> to vector<32x32xf32>
    %cst_31 = arith.constant dense<0.000000e+00> : vector<64x32xf32>
    %62 = tpu.matmul %59, %61, %cst_31 {dimension_numbers = #tpu.dot_dimension_numbers<[1], [0], [0], [1], [0, 0, 1, 1], [], []>} : vector<64x32xf32>, vector<32x32xf32>, vector<64x32xf32> -> vector<64x32xf32>
    %63 = arith.addf %57, %62 : vector<64x32xf32>
    %64 = vector.extract_strided_slice %42 {offsets = [1, 0, 0], sizes = [4, 16, 32], strides = [1, 1, 1]} : vector<6x16x32xf32> to vector<4x16x32xf32>
    %65 = vector.shape_cast %64 : vector<4x16x32xf32> to vector<64x32xf32>
    %c3 = arith.constant 3 : index
    %c0_32 = arith.constant 0 : index
    %c0_33 = arith.constant 0 : index
    %66 = vector.load %arg7[%c3, %c0_32, %c0_33] : memref<9x32x32xf32, #tpu.memory_space<vmem>>, vector<1x32x32xf32>
    %67 = vector.shape_cast %66 : vector<1x32x32xf32> to vector<32x32xf32>
    %cst_34 = arith.constant dense<0.000000e+00> : vector<64x32xf32>
    %68 = tpu.matmul %65, %67, %cst_34 {dimension_numbers = #tpu.dot_dimension_numbers<[1], [0], [0], [1], [0, 0, 1, 1], [], []>} : vector<64x32xf32>, vector<32x32xf32>, vector<64x32xf32> -> vector<64x32xf32>
    %69 = arith.addf %63, %68 : vector<64x32xf32>
    %70 = vector.extract_strided_slice %39 {offsets = [1, 0, 0], sizes = [4, 16, 32], strides = [1, 1, 1]} : vector<6x16x32xf32> to vector<4x16x32xf32>
    %71 = vector.shape_cast %70 : vector<4x16x32xf32> to vector<64x32xf32>
    %c4 = arith.constant 4 : index
    %c0_35 = arith.constant 0 : index
    %c0_36 = arith.constant 0 : index
    %72 = vector.load %arg7[%c4, %c0_35, %c0_36] : memref<9x32x32xf32, #tpu.memory_space<vmem>>, vector<1x32x32xf32>
    %73 = vector.shape_cast %72 : vector<1x32x32xf32> to vector<32x32xf32>
    %cst_37 = arith.constant dense<0.000000e+00> : vector<64x32xf32>
    %74 = tpu.matmul %71, %73, %cst_37 {dimension_numbers = #tpu.dot_dimension_numbers<[1], [0], [0], [1], [0, 0, 1, 1], [], []>} : vector<64x32xf32>, vector<32x32xf32>, vector<64x32xf32> -> vector<64x32xf32>
    %75 = arith.addf %69, %74 : vector<64x32xf32>
    %76 = vector.extract_strided_slice %44 {offsets = [1, 0, 0], sizes = [4, 16, 32], strides = [1, 1, 1]} : vector<6x16x32xf32> to vector<4x16x32xf32>
    %77 = vector.shape_cast %76 : vector<4x16x32xf32> to vector<64x32xf32>
    %c5 = arith.constant 5 : index
    %c0_38 = arith.constant 0 : index
    %c0_39 = arith.constant 0 : index
    %78 = vector.load %arg7[%c5, %c0_38, %c0_39] : memref<9x32x32xf32, #tpu.memory_space<vmem>>, vector<1x32x32xf32>
    %79 = vector.shape_cast %78 : vector<1x32x32xf32> to vector<32x32xf32>
    %cst_40 = arith.constant dense<0.000000e+00> : vector<64x32xf32>
    %80 = tpu.matmul %77, %79, %cst_40 {dimension_numbers = #tpu.dot_dimension_numbers<[1], [0], [0], [1], [0, 0, 1, 1], [], []>} : vector<64x32xf32>, vector<32x32xf32>, vector<64x32xf32> -> vector<64x32xf32>
    %81 = arith.addf %75, %80 : vector<64x32xf32>
    %82 = vector.extract_strided_slice %42 {offsets = [2, 0, 0], sizes = [4, 16, 32], strides = [1, 1, 1]} : vector<6x16x32xf32> to vector<4x16x32xf32>
    %83 = vector.shape_cast %82 : vector<4x16x32xf32> to vector<64x32xf32>
    %c6 = arith.constant 6 : index
    %c0_41 = arith.constant 0 : index
    %c0_42 = arith.constant 0 : index
    %84 = vector.load %arg7[%c6, %c0_41, %c0_42] : memref<9x32x32xf32, #tpu.memory_space<vmem>>, vector<1x32x32xf32>
    %85 = vector.shape_cast %84 : vector<1x32x32xf32> to vector<32x32xf32>
    %cst_43 = arith.constant dense<0.000000e+00> : vector<64x32xf32>
    %86 = tpu.matmul %83, %85, %cst_43 {dimension_numbers = #tpu.dot_dimension_numbers<[1], [0], [0], [1], [0, 0, 1, 1], [], []>} : vector<64x32xf32>, vector<32x32xf32>, vector<64x32xf32> -> vector<64x32xf32>
    %87 = arith.addf %81, %86 : vector<64x32xf32>
    %88 = vector.extract_strided_slice %39 {offsets = [2, 0, 0], sizes = [4, 16, 32], strides = [1, 1, 1]} : vector<6x16x32xf32> to vector<4x16x32xf32>
    %89 = vector.shape_cast %88 : vector<4x16x32xf32> to vector<64x32xf32>
    %c7 = arith.constant 7 : index
    %c0_44 = arith.constant 0 : index
    %c0_45 = arith.constant 0 : index
    %90 = vector.load %arg7[%c7, %c0_44, %c0_45] : memref<9x32x32xf32, #tpu.memory_space<vmem>>, vector<1x32x32xf32>
    %91 = vector.shape_cast %90 : vector<1x32x32xf32> to vector<32x32xf32>
    %cst_46 = arith.constant dense<0.000000e+00> : vector<64x32xf32>
    %92 = tpu.matmul %89, %91, %cst_46 {dimension_numbers = #tpu.dot_dimension_numbers<[1], [0], [0], [1], [0, 0, 1, 1], [], []>} : vector<64x32xf32>, vector<32x32xf32>, vector<64x32xf32> -> vector<64x32xf32>
    %93 = arith.addf %87, %92 : vector<64x32xf32>
    %94 = vector.extract_strided_slice %44 {offsets = [2, 0, 0], sizes = [4, 16, 32], strides = [1, 1, 1]} : vector<6x16x32xf32> to vector<4x16x32xf32>
    %95 = vector.shape_cast %94 : vector<4x16x32xf32> to vector<64x32xf32>
    %c8 = arith.constant 8 : index
    %c0_47 = arith.constant 0 : index
    %c0_48 = arith.constant 0 : index
    %96 = vector.load %arg7[%c8, %c0_47, %c0_48] : memref<9x32x32xf32, #tpu.memory_space<vmem>>, vector<1x32x32xf32>
    %97 = vector.shape_cast %96 : vector<1x32x32xf32> to vector<32x32xf32>
    %cst_49 = arith.constant dense<0.000000e+00> : vector<64x32xf32>
    %98 = tpu.matmul %95, %97, %cst_49 {dimension_numbers = #tpu.dot_dimension_numbers<[1], [0], [0], [1], [0, 0, 1, 1], [], []>} : vector<64x32xf32>, vector<32x32xf32>, vector<64x32xf32> -> vector<64x32xf32>
    %99 = arith.addf %93, %98 : vector<64x32xf32>
    %c0_50 = arith.constant 0 : index
    %c0_51 = arith.constant 0 : index
    %100 = vector.load %arg8[%c0_50, %c0_51] : memref<1x32xf32, #tpu.memory_space<vmem>>, vector<1x32xf32>
    %101 = vector.broadcast %100 : vector<1x32xf32> to vector<64x32xf32>
    %102 = arith.addf %99, %101 : vector<64x32xf32>
    %cst_52 = arith.constant 0.000000e+00 : f32
    %103 = vector.broadcast %cst_52 : f32 to vector<64x32xf32>
    %104 = arith.maximumf %102, %103 : vector<64x32xf32>
    %c0_53 = arith.constant 0 : index
    %c0_54 = arith.constant 0 : index
    %105 = vector.load %arg9[%c0_53, %c0_54] : memref<32x128xf32, #tpu.memory_space<vmem>>, vector<32x128xf32>
    %cst_55 = arith.constant dense<0.000000e+00> : vector<64x128xf32>
    %106 = tpu.matmul %104, %105, %cst_55 {dimension_numbers = #tpu.dot_dimension_numbers<[1], [0], [0], [1], [0, 0, 1, 1], [], []>} : vector<64x32xf32>, vector<32x128xf32>, vector<64x128xf32> -> vector<64x128xf32>
    %c0_56 = arith.constant 0 : index
    %c0_57 = arith.constant 0 : index
    %107 = vector.load %arg10[%c0_56, %c0_57] : memref<1x128xf32, #tpu.memory_space<vmem>>, vector<1x128xf32>
    %108 = vector.broadcast %107 : vector<1x128xf32> to vector<64x128xf32>
    %109 = arith.addf %106, %108 : vector<64x128xf32>
    %110 = vector.shape_cast %3 : vector<4x16x128xf32> to vector<64x128xf32>
    %111 = arith.addf %109, %110 : vector<64x128xf32>
    %cst_58 = arith.constant 0.000000e+00 : f32
    %112 = vector.broadcast %cst_58 : f32 to vector<64x128xf32>
    %113 = arith.maximumf %111, %112 : vector<64x128xf32>
    %114 = vector.shape_cast %113 : vector<64x128xf32> to vector<1x4x16x128xf32>
    %c0_59 = arith.constant 0 : index
    %c0_60 = arith.constant 0 : index
    %c0_61 = arith.constant 0 : index
    %c0_62 = arith.constant 0 : index
    %115 = vector.load %arg11[%c0_59, %c0_60, %c0_61, %c0_62] : memref<1x4x16x128xf32, #tpu.memory_space<vmem>>, vector<1x4x16x128xf32>
    tpu.vector_store %arg11[%c0_59, %c0_60, %c0_61, %c0_62], %114 {strides = array<i32>} : memref<1x4x16x128xf32, #tpu.memory_space<vmem>>, vector<1x4x16x128xf32>,
    return
  }
  func.func @transform_0(%arg0: i32, %arg1: i32) -> (i32, i32, i32, i32) {
    %c0_i32 = arith.constant 0 : i32
    %c0_i32_0 = arith.constant 0 : i32
    %c0_i32_1 = arith.constant 0 : i32
    return %arg0, %arg1, %c0_i32, %c0_i32_0 : i32, i32, i32, i32
  }
  func.func @transform_1(%arg0: i32, %arg1: i32) -> (i32, i32, i32, i32) {
    %c4_i32 = arith.constant 4 : i32
    %0 = arith.muli %arg1, %c4_i32 : i32
    %c1_i32 = arith.constant 1 : i32
    %1 = arith.subi %0, %c1_i32 : i32
    %c0_i32 = arith.constant 0 : i32
    %2 = arith.maxsi %1, %c0_i32 : i32
    %c0_i32_0 = arith.constant 0 : i32
    %c0_i32_1 = arith.constant 0 : i32
    %c0_i32_2 = arith.constant 0 : i32
    return %arg0, %2, %c0_i32_0, %c0_i32_1 : i32, i32, i32, i32
  }
  func.func @transform_2(%arg0: i32, %arg1: i32) -> (i32, i32, i32, i32) {
    %c4_i32 = arith.constant 4 : i32
    %0 = arith.muli %arg1, %c4_i32 : i32
    %c4_i32_0 = arith.constant 4 : i32
    %1 = arith.addi %0, %c4_i32_0 : i32
    %c15_i32 = arith.constant 15 : i32
    %2 = arith.minsi %1, %c15_i32 : i32
    %c0_i32 = arith.constant 0 : i32
    %c0_i32_1 = arith.constant 0 : i32
    %c0_i32_2 = arith.constant 0 : i32
    return %arg0, %2, %c0_i32, %c0_i32_1 : i32, i32, i32, i32
  }
  func.func @transform_3(%arg0: i32, %arg1: i32) -> (i32, i32) {
    %c0_i32 = arith.constant 0 : i32
    %c0_i32_0 = arith.constant 0 : i32
    %c0_i32_1 = arith.constant 0 : i32
    return %c0_i32, %c0_i32_0 : i32, i32
  }
  func.func @transform_4(%arg0: i32, %arg1: i32) -> (i32, i32) {
    %c0_i32 = arith.constant 0 : i32
    %c0_i32_0 = arith.constant 0 : i32
    %c0_i32_1 = arith.constant 0 : i32
    return %c0_i32, %c0_i32_0 : i32, i32
  }
  func.func @transform_5(%arg0: i32, %arg1: i32) -> (i32, i32, i32) {
    %c0_i32 = arith.constant 0 : i32
    %c0_i32_0 = arith.constant 0 : i32
    %c0_i32_1 = arith.constant 0 : i32
    %c0_i32_2 = arith.constant 0 : i32
    return %c0_i32, %c0_i32_0, %c0_i32_1 : i32, i32, i32
  }
  func.func @transform_6(%arg0: i32, %arg1: i32) -> (i32, i32) {
    %c0_i32 = arith.constant 0 : i32
    %c0_i32_0 = arith.constant 0 : i32
    %c0_i32_1 = arith.constant 0 : i32
    return %c0_i32, %c0_i32_0 : i32, i32
  }
  func.func @transform_7(%arg0: i32, %arg1: i32) -> (i32, i32) {
    %c0_i32 = arith.constant 0 : i32
    %c0_i32_0 = arith.constant 0 : i32
    %c0_i32_1 = arith.constant 0 : i32
    return %c0_i32, %c0_i32_0 : i32, i32
  }
  func.func @transform_8(%arg0: i32, %arg1: i32) -> (i32, i32) {
    %c0_i32 = arith.constant 0 : i32
    %c0_i32_0 = arith.constant 0 : i32
    %c0_i32_1 = arith.constant 0 : i32
    return %c0_i32, %c0_i32_0 : i32, i32
  }
  func.func @transform_9(%arg0: i32, %arg1: i32) -> (i32, i32, i32, i32) {
    %c0_i32 = arith.constant 0 : i32
    %c0_i32_0 = arith.constant 0 : i32
    %c0_i32_1 = arith.constant 0 : i32
    return %arg0, %arg1, %c0_i32, %c0_i32_0 : i32, i32, i32, i32
  }
}

</mosaic_0001>

<bundles_post_ra>
// kernel: tpu_custom_call.1
= control target key start
LH: loop header
LB: loop body
LE: loop exit
PB: predicated region body
PF: predicated region fallthrough
CT: control target
= control target key end

     0   :  { %s4643_s0 = inlined_call_operand.hbm [shape: f32[2,16,16,128], index: 0, kind: input, shape index: {}]   ;;  %s4644_s1 = inlined_call_operand.hbm [shape: f32[2,16,16,128], index: 1, kind: input, shape index: {}]   ;;  %s4645_s2 = inlined_call_operand.hbm [shape: f32[2,16,16,128], index: 2, kind: input, shape index: {}]   ;;  %s4646_s3 = inlined_call_operand.vmem [shape: f32[128,32], index: 3, kind: input, shape index: {}]   ;;  %s4647_s4 = inlined_call_operand.vmem [shape: f32[1,32], index: 4, kind: input, shape index: {}]   ;;  %s4648_s5 = inlined_call_operand.hbm [shape: f32[9,32,32], index: 5, kind: input, shape index: {}]   ;;  %s4649_s6 = inlined_call_operand.vmem [shape: f32[1,32], index: 6, kind: input, shape index: {}]   ;;  %s4650_s7 = inlined_call_operand.vmem [shape: f32[32,128], index: 7, kind: input, shape index: {}]   ;;  %s4651_s8 = inlined_call_operand.vmem [shape: f32[1,128], index: 8, kind: input, shape index: {}]   ;;  %s4652_s9 = inlined_call_operand.hbm [shape: f32[2,16,16,128], index: 9, kind: output, shape index: {}]  }
   0x1   :  { %4681 = sst [smem:[#allocation32_spill]] %s4643_s0 }
   0x2   :  { %4682 = sst [smem:[#allocation33_spill]] %s4644_s1 }
   0x3   :  { %4683 = sst [smem:[#allocation34_spill]] %s4645_s2 }
   0x4   :  { %4684 = sst [smem:[#allocation35_spill]] %s4646_s3 }
   0x5   :  { %4685 = sst [smem:[#allocation36_spill]] %s4647_s4 }
   0x6   :  { %4686 = sst [smem:[#allocation37_spill]] %s4648_s5 }
   0x7   :  { %4687 = sst [smem:[#allocation38_spill]] %s4649_s6 }
   0x8   :  { %4688 = sst [smem:[#allocation39_spill]] %s4650_s7 }
   0x9   :  { %4689 = sst [smem:[#allocation40_spill]] %s4651_s8 }
   0xa   :  { %4690 = sst [smem:[#allocation41_spill]] %s4652_s9 }
   0xb   :  { %14 = vsyncpa [#allocation3], 0 }
   0xc   :  { %16 = vsyncpa [#allocation3 + $0x1], 0 }
   0xd   :  { %17 = vsyncpa [#allocation6], 0 }
   0xe   :  { %19 = vsyncpa [#allocation6 + $0x1], 0 }
   0xf   :  { %20 = vsyncpa [#allocation9], 0 }
  0x10   :  { %21 = vsyncpa [#allocation4], 0 }
  0x11   :  { %23 = vsyncpa [#allocation4 + $0x1], 0  ;;  %s3722_s30 = smov 0   ;;  %s3724_s10 = smov 0  }
  0x12   :  { %s3726_s11 = smov 0   ;;  %s3728_s12 = smov 0  }
  0x13   :  { %s3730_s13 = smov 0   ;;  %s3732_s14 = smov 0  }
  0x14   :  { %s3734_s15 = smov 0   ;;  %s3736_s16 = smov 0  }
  0x15   :  { %s3738_s17 = smov 0   ;;  %s3740_s18 = smov 0  }
  0x16   :  { %s3742_s19 = smov 0   ;;  %s3744_s20 = smov 0  }
  0x17   :  { %s3746_s21 = smov 0   ;;  %s3748_s22 = smov 0  }
  0x18 LB: > { %4691 = sst [smem:[#allocation16_spill]] %s3609_s30  ;;  %s38_s23 = sadd.s32 1, %s3653_s20  ;;  %s3661_s22 = sphi %s3748_s22, %s29_s22   ;;  %s3657_s21 = sphi %s3746_s21, %s4777_s21   ;;  %s3653_s20 = sphi %s3744_s20, %s4769_s20   ;;  %s3649_s19 = sphi %s3742_s19, %s4768_s19   ;;  %s3645_s18 = sphi %s3740_s18, %s4767_s18   ;;  %s3641_s17 = sphi %s3738_s17, %s4766_s17   ;;  %s3637_s16 = sphi %s3736_s16, %s4776_s16   ;;  %s3633_s15 = sphi %s3734_s15, %s4775_s15   ;;  %s3629_s14 = sphi %s3732_s14, %s4764_s14   ;;  %s3625_s13 = sphi %s3730_s13, %s4774_s13   ;;  %s3621_s12 = sphi %s3728_s12, %s4773_s12   ;;  %s3617_s11 = sphi %s3726_s11, %s4772_s11   ;;  %s3613_s10 = sphi %s3724_s10, %s4762_s10   ;;  %s3609_s30 = sphi %s3722_s30, %s4761_s30  }
  0x19   : > { %4692 = sst [smem:[#allocation17_spill]] %s3613_s10  ;;  %s41_s24 = sadd.s32 1, %s3657_s21 }
  0x1a   : > { %4693 = sst [smem:[#allocation18_spill]] %s3617_s11  ;;  %p39_p0 = scmp.ge.s32.totalorder %s38_s23, 4 }
  0x1b   : > { %4694 = sst [smem:[#allocation19_spill]] %s3629_s14  ;;  %p4666_p1 = scmp.eq.s32.totalorder %s3661_s22, 0 }
  0x1c   : > { %4695 = sst [smem:[#allocation20_spill]] %s3641_s17  ;;  %s2377_s25 = sshll.u32 %s3653_s20, 2 }
  0x1d   : > { %4696 = sst [smem:[#allocation21_spill]] %s3645_s18  ;;  %s86_s26 = sadd.s32 1, %s3629_s14 }
  0x1e   : > { %4697 = sst [smem:[#allocation22_spill]] %s3649_s19  ;;  %s4779_s23 = smov (%p39_p0, %s38_s23), 0 }
  0x1f   : > { %4698 = sst [smem:[#allocation23_spill]] %s3653_s20  ;;  %s4781_s24 = smov (!%p39_p0, %s41_s24), %s3657_s21 }
  0x20   : > { %4699 = sst [smem:[#allocation24_spill]] %s3657_s21  ;;  %s46_s27 = ssub.s32 %s3653_s20, %s4779_s23 }
  0x21   : > { %4700 = sst [smem:[#allocation25_spill]] %s4779_s23  ;;  %s2378_s28 = sadd.s32 4294967295, %s2377_s25 }
  0x22   : > { %p43_p2 = scmp.ge.s32.totalorder %s4781_s24, 2  ;;  %p75_p3 = scmp.gt.s32.totalorder %s2378_s28, 0 }
  0x23   : > { %s2379_s29 = sshll.u32 %s4779_s23, 2  ;;  %p93_p4 = scmp.ne.s32.totalorder %s3629_s14, %s3625_s13 }
  0x24   : > { %s4783_s24 = smov (%p43_p2, %s4781_s24), 0  ;;  %s4785_s28 = smov (!%p75_p3, %s2378_s28), 0 }
  0x25   : > { %4701 = sst [smem:[#allocation26_spill]] %s4783_s24  ;;  %s3809_s9 = ssub.s32 %s3657_s21, %s4783_s24 }
  0x26   : > { %4702 = sst [smem:[#allocation27_spill]] %s3809_s9  ;;  %s2380_s19 = sadd.s32 4294967295, %s2379_s29 }
  0x27   : > { %s3812_s8 = sor.u32 %s46_s27, %s3809_s9  ;;  %p79_p5 = scmp.gt.s32.totalorder %s2380_s19, 0 }
  0x28   : > { %p3817_p7 = por %p93_p4, %p4666_p1  ;;  %p99_p8 = scmp.ne.s32.totalorder %s3625_s13, %s3621_s12 }
  0x29   : > { %s4787_s19 = smov (!%p79_p5, %s2380_s19), 0  ;;  %s3823_s24 = sadd.s32 4, %s2377_s25 }
  0x2a   : > { %4704 = sst [smem:[#allocation28_spill]] %s3823_s24  ;;  %s82_s6 = ssub.s32 %s4785_s28, %s4787_s19 }
  0x2b   : > { %s83_s7 = sor.u32 %s82_s6, %s3809_s9  ;;  %s3827_s27 = sadd.s32 4, %s2379_s29 }
  0x2c   : > { %p84_p10 = scmp.eq.s32.totalorder %s83_s7, 0  ;;  %p4665_p12 = scmp.lt.s32.totalorder %s3661_s22, 8 }
  0x2d   : > { %s3835_s4 = sshll.u32 %s3657_s21, 5  ;;  %s365_s3 = sand.u32 1, %s3661_s22  }
  0x2e   : > { %s3831_s18 = scalar_select %p84_p10, %s3629_s14, %s86_s26  }
  0x2f   : > { %s367_s25 = sand.u32 1, %s3629_s14   ;;  %s2394_s30 = sshll.u32 %s4785_s28, 1 }
  0x30   : > { %4705 = sst [smem:[#allocation29_spill]] %s3831_s18  ;;  %s2391_s2 = sshll.u32 %s367_s25, 4 }
  0x31   : > { %s379_s19 = sadd.s32 %s2394_s30, %s3835_s4  ;;  %s369_s6 = scalar_lea.vmem [#allocation5], %s2391_s2 }
  0x32   : > { %s2396_s10 = sshll.u32 %s379_s19, 7  ;;  %s382_s29 = sshll.u32 %s369_s6, 4  ;;  %s3845_s29 = int_to_ptr.vmem [resolvable:$true] %s382_s29 }
  0x33   : > { %s4706_s1 = sld [smem:[#allocation33_spill]]  ;;  %p3851_p13 = pnand %p4665_p12, %p3817_p7 }
  0x34   : > { %s3855_s2 = scalar_lea.sflag [#allocation6], %s365_s3 }
  0x35   : > { %p3387_p2 = pneg %p3851_p13 }
  0x39   : > { %s3843_s11 = scalar_lea.hbm %s4706_s1, %s2396_s10  ;;  %s3390_s23 = scalar_lea.hbm %s4706_s1, 8192 }
  0x3a   : > { %s3385_s30 = scalar_lea.hbm %s3843_s11, 256  ;;  %p3391_p5 = scmp.lt.u32.totalorder %s3843_s11, %s4706_s1 }
  0x3b   : > { %p3386_p0 = scmp.ne.s32.totalorder %s3843_s11, %s3385_s30  ;;  %p3392_p7 = scmp.lt.u32.totalorder %s3390_s23, %s3385_s30 }
  0x3c   : > { %p3394_p11 = scmp.lt.u32.totalorder %s3385_s30, %s3843_s11 }
  0x3d   : > { %p3388_p3 = pnand %p3387_p2, %p3386_p0  ;;  %p3393_p10 = por %p3392_p7, %p3391_p5 }
  0x3f   : > { %p3389_p4 = pneg %p3388_p3  ;;  %p3395_p9 = por %p3394_p11, %p3393_p10 }
  0x41   : > { %p3396_p12 = pnand %p3395_p9, %p3389_p4 }
  0x43   : > { %3399 = shalt.err (!%p3396_p12)
}
  0x44   : > { %s3400_s3 = scalar_lea.vmem %s3845_s29, 256  ;;  %s3663_s28 = smov [#allocation5]  }
  0x45   : > { %p3401_p0 = scmp.ne.s32.totalorder %s3845_s29, %s3400_s3  ;;  %s3405_s25 = sshll.u32 %s3663_s28, 4  ;;  %s3406_s25 = int_to_ptr.vmem [resolvable:$false] %s3405_s25 }
  0x46   : > { %s3407_s19 = scalar_lea.vmem %s3406_s25, 512  ;;  %p3408_p6 = scmp.lt.s32.totalorder %s3845_s29, %s3406_s25 }
  0x47   : > { %p3403_p3 = pnand %p3401_p0, %p3387_p2  ;;  %p3409_p5 = scmp.lt.s32.totalorder %s3407_s19, %s3400_s3 }
  0x49   : > { %p3404_p1 = pneg %p3403_p3  ;;  %p3410_p7 = por %p3409_p5, %p3408_p6 }
  0x4b   : > { %p3411_p11 = pnand %p3410_p7, %p3404_p1 }
  0x4d   : > { %3414 = shalt.err (!%p3411_p11)
}
  0x4e   : > { %s4667_s6 = smov 128   ;;  %s4669_s30 = smov 8  }
  0x4f   : > { %3256 = dma.hbm_to_vmem [thread:$0]  (!%p3851_p13), %s3843_s11, 256, %s3845_s29, %s3855_s2, %s4667_s6, %s4667_s6, %s4669_s30  }
  0x50   : > { %s3887_s9 = sadd.s32 4294967295, %s3661_s22   ;;  %p2383_p1 = scmp.ge.s32.totalorder %s3661_s22, 1 }
  0x51   : > { %p4671_p6 = scmp.eq.s32.totalorder %s3887_s9, 0  ;;  %p300_p12 = scmp.lt.s32.totalorder %s3661_s22, 9 }
  0x52   : > { %s3666_s11 = smov [#allocation8]   ;;  %s2376_s12 = sadd.s32 4294967294, %s3661_s22  }
  0x53   : > { %p3898_p2 = por %p99_p8, %p4671_p6  ;;  %p3902_p4 = pnand %p2383_p1, %p300_p12 }
  0x54   : > { %s318_s29 = sshll.u32 %s3666_s11, 4  ;;  %s50_s24 = sadd.s32 1, %s3641_s17  ;;  %s319_s29 = int_to_ptr.vmem [resolvable:$true] %s318_s29 }
  0x55   : > { %s4708_s10 = scalar_select %p3898_p2, 1, 0 }
  0x56   : > { %s4709_s7 = scalar_select %p3902_p4, 1, 0 }
  0x57   : > { %p3246_p13 = pneg %p3902_p4  ;;  %s4711_s5 = sld [smem:[#allocation37_spill]] }
  0x59   : > { %p3910_p10 = pnand %p3246_p13, %p4671_p6 }
  0x5b   : > { %p3417_p0 = pneg %p3910_p10 }
  0x5d   : > { %s3415_s28 = scalar_lea.hbm %s4711_s5, 4608 }
  0x5e   : > { %p3416_p8 = scmp.ne.s32.totalorder %s4711_s5, %s3415_s28  ;;  %p3422_p7 = scmp.lt.u32.totalorder %s3415_s28, %s4711_s5 }
  0x60   : > { %p3418_p3 = pnand %p3417_p0, %p3416_p8 }
  0x62   : > { %p3419_p5 = pneg %p3418_p3 }
  0x64   : > { %p3424_p11 = pnand %p3422_p7, %p3419_p5 }
  0x66   : > { %3427 = shalt.err (!%p3424_p11)
}
  0x67   : > { %s3428_s30 = scalar_lea.vmem %s319_s29, 4608  ;;  %p3436_p9 = scmp.lt.s32.totalorder %s319_s29, %s319_s29 }
  0x68   : > { %p3429_p1 = scmp.ne.s32.totalorder %s319_s29, %s3428_s30  ;;  %p3437_p6 = scmp.lt.s32.totalorder %s3428_s30, %s3428_s30 }
  0x6a   : > { %p3431_p12 = pnand %p3429_p1, %p3417_p0  ;;  %p3438_p2 = por %p3437_p6, %p3436_p9 }
  0x6c   : > { %p3432_p13 = pneg %p3431_p12 }
  0x6e   : > { %p3439_p4 = pnand %p3438_p2, %p3432_p13 }
  0x70   : > { %3442 = shalt.err (!%p3439_p4)
}
  0x71   : > { %s4712_s26 = smov 8   ;;  %s4713_s3 = smov 128  }
  0x72   : > { %3249 = dma.hbm_to_vmem [thread:$0]  (!%p3910_p10), %s4711_s5, 4608, %s319_s29, [#allocation9], %s4713_s3, %s4713_s3, %s4712_s26  }
  0x73   : > { %p4714_p6 = scmp.eq.s32.totalorder %s3812_s8, 0  ;;  %p57_p9 = scmp.ne.s32.totalorder %s3641_s17, %s3637_s16 }
  0x74   : > { %p63_p2 = scmp.ne.s32.totalorder %s3637_s16, %s3633_s15  ;;  %p293_p4 = scmp.eq.s32.totalorder %s2376_s12, 7 }
  0x75   : > { %s3938_s6 = scalar_select %p4714_p6, %s3641_s17, %s50_s24  }
  0x76   : > { %s341_s30 = sand.u32 1, %s3641_s17   ;;  %p4716_p8 = scmp.eq.s32.totalorder %s3661_s22, 0 }
  0x77   : > { %4715 = sst [smem:[#allocation30_spill]] %s3938_s6  ;;  %p4717_p3 = scmp.eq.s32.totalorder %s3887_s9, 0 }
  0x78   : > { %p59_p0 = por %p4716_p8, %p57_p9  ;;  %p4719_p7 = scmp.eq.s32.totalorder %s3887_s9, 7 }
  0x79   : > { %p3949_p5 = por %p4717_p3, %p63_p2  ;;  %p3959_p10 = por %p293_p4, %p63_p2 }
  0x7a   : > { %p3955_p11 = por %p4719_p7, %p57_p9  ;;  %s2386_s29 = sshll.u32 %s341_s30, 6 }
  0x7b   : > { %s4721_s8 = scalar_select %p3959_p10, 1, 0 }
  0x7c   : > { %s4720_s28 = scalar_select %p3955_p11, 1, 0 }
  0x7d   : > { %4722 = sst [smem:[#allocation31_spill]] %s4721_s8  ;;  %s2498_s24 = sshll.u32 %s3653_s20, 3 }
  0x7e   : > { %s352_s12 = sadd.s32 %s2498_s24, %s3835_s4  ;;  %s345_s11 = scalar_lea.vmem [#allocation2], %s2386_s29 }
  0x7f   : > { %s355_s25 = sshll.u32 %s345_s11, 4  ;;  %s2390_s19 = sshll.u32 %s352_s12, 7  ;;  %s3965_s25 = int_to_ptr.vmem [resolvable:$true] %s355_s25 }
  0x80   : > { %s4723_s0 = sld [smem:[#allocation32_spill]]  ;;  %p4724_p1 = scmp.lt.s32.totalorder %s3661_s22, 8 }
  0x81   : > { %s3978_s29 = scalar_lea.sflag [#allocation3], %s341_s30 }
  0x82   : > { %p3974_p12 = pnand %p4724_p1, %p59_p0 }
  0x84   : > { %p3445_p6 = pneg %p3974_p12 }
  0x86   : > { %s3970_s21 = scalar_lea.hbm %s4723_s0, %s2390_s19  ;;  %s3448_s12 = scalar_lea.hbm %s4723_s0, 8192 }
  0x87   : > { %s3443_s24 = scalar_lea.hbm %s3970_s21, 1024  ;;  %p3449_p4 = scmp.lt.u32.totalorder %s3970_s21, %s4723_s0 }
  0x88   : > { %p3444_p13 = scmp.ne.s32.totalorder %s3970_s21, %s3443_s24  ;;  %p3450_p8 = scmp.lt.u32.totalorder %s3448_s12, %s3443_s24 }
  0x89   : > { %p3452_p3 = scmp.lt.u32.totalorder %s3443_s24, %s3970_s21 }
  0x8a   : > { %p3446_p9 = pnand %p3445_p6, %p3444_p13  ;;  %p3451_p0 = por %p3450_p8, %p3449_p4 }
  0x8c   : > { %p3447_p2 = pneg %p3446_p9  ;;  %p3453_p7 = por %p3452_p3, %p3451_p0 }
  0x8e   : > { %p3454_p1 = pnand %p3453_p7, %p3447_p2 }
  0x90   : > { %3457 = shalt.err (!%p3454_p1)
}
  0x91   : > { %s3458_s30 = scalar_lea.vmem %s3965_s25, 1024  ;;  %s3667_s1 = smov [#allocation2]  }
  0x92   : > { %p3459_p13 = scmp.ne.s32.totalorder %s3965_s25, %s3458_s30  ;;  %s3463_s5 = sshll.u32 %s3667_s1, 4  ;;  %s3464_s5 = int_to_ptr.vmem [resolvable:$false] %s3463_s5 }
  0x93   : > { %s3465_s11 = scalar_lea.vmem %s3464_s5, 2048  ;;  %p3466_p11 = scmp.lt.s32.totalorder %s3965_s25, %s3464_s5 }
  0x94   : > { %p3461_p9 = pnand %p3459_p13, %p3445_p6  ;;  %p3467_p4 = scmp.lt.s32.totalorder %s3465_s11, %s3458_s30 }
  0x96   : > { %p3462_p10 = pneg %p3461_p9  ;;  %p3468_p8 = por %p3467_p4, %p3466_p11 }
  0x98   : > { %p3469_p0 = pnand %p3468_p8, %p3462_p10 }
  0x9a   : > { %3472 = shalt.err (!%p3469_p0)
}
  0x9b   : > { %s4726_s24 = sld [smem:[#allocation18_spill]]  ;;  %s4727_s12 = sld [smem:[#allocation28_spill]] }
  0x9c   : > { %s4728_s19 = sld [smem:[#allocation17_spill]]  ;;  %s4729_s1 = sld [smem:[#allocation16_spill]] }
  0x9d   : > { %s4730_s30 = sld [smem:[#allocation27_spill]]  ;;  %p4732_p10 = scmp.lt.s32.totalorder %s3827_s27, 15 }
  0x9e   : > { %3253 = dma.hbm_to_vmem [thread:$0]  (!%p3974_p12), %s3970_s21, 1024, %s3965_s25, %s3978_s29, %s4713_s3, %s4713_s3, %s4712_s26  }
  0x9f   : > { %s4791_s27 = smov (!%p4732_p10, %s3827_s27), 15  ;;  %p4733_p3 = scmp.eq.s32.totalorder %s3661_s22, 0 }
  0xa0   : > { %p4734_p13 = scmp.eq.s32.totalorder %s3887_s9, 0  ;;  %s4736_s14 = sld [smem:[#allocation34_spill]] }
  0xa1   : > { %s122_s6 = sadd.s32 1, %s4726_s24  ;;  %p4731_p11 = scmp.lt.s32.totalorder %s4727_s12, 15 }
  0xa2   : > { %p129_p6 = scmp.ne.s32.totalorder %s4726_s24, %s4728_s19  ;;  %p135_p2 = scmp.ne.s32.totalorder %s4728_s19, %s4729_s1 }
  0xa3   : > { %s4789_s12 = smov (!%p4731_p11, %s4727_s12), 15  ;;  %s394_s11 = sand.u32 1, %s4726_s24  }
  0xa4   : > { %s118_s5 = ssub.s32 %s4789_s12, %s4791_s27  ;;  %p131_p7 = por %p129_p6, %p4733_p3 }
  0xa5   : > { %s119_s0 = sor.u32 %s118_s5, %s4730_s30  ;;  %p4026_p9 = por %p135_p2, %p4734_p13 }
  0xa6   : > { %p120_p1 = scmp.eq.s32.totalorder %s119_s0, 0  ;;  %s2397_s21 = sshll.u32 %s394_s11, 4 }
  0xa7   : > { %s4735_s20 = scalar_select %p4026_p9, 1, 0 }
  0xa8   : > { %s2399_s25 = sshll.u32 %s4789_s12, 1  ;;  %s4793_s24 = smov (!%p120_p1, %s4726_s24), %s122_s6 }
  0xa9   : > { %s406_s29 = sadd.s32 %s2399_s25, %s3835_s4  ;;  %s396_s18 = scalar_lea.vmem [#allocation7], %s2397_s21 }
  0xaa   : > { %s2401_s17 = sshll.u32 %s406_s29, 7  ;;  %s409_s19 = sshll.u32 %s396_s18, 4  ;;  %s4039_s19 = int_to_ptr.vmem [resolvable:$true] %s409_s19 }
  0xab   : > { %s4737_s8 = smov %s4736_s14  ;;  %s4037_s30 = scalar_lea.hbm %s4736_s14, %s2401_s17 }
  0xac   : > { %p4738_p12 = scmp.lt.s32.totalorder %s3661_s22, 8  ;;  %s3473_s4 = scalar_lea.hbm %s4037_s30, 256 }
  0xad   : > { %p3474_p8 = scmp.ne.s32.totalorder %s4037_s30, %s3473_s4  ;;  %s3478_s18 = scalar_lea.hbm %s4737_s8, 8192 }
  0xae   : > { %p4043_p4 = pnand %p4738_p12, %p131_p7  ;;  %p3479_p6 = scmp.lt.u32.totalorder %s4037_s30, %s4737_s8 }
  0xaf   : > { %p3480_p2 = scmp.lt.u32.totalorder %s3478_s18, %s3473_s4  ;;  %p3482_p7 = scmp.lt.u32.totalorder %s3473_s4, %s4037_s30 }
  0xb0   : > { %p3475_p0 = pneg %p4043_p4 }
  0xb1   : > { %p3481_p3 = por %p3480_p2, %p3479_p6 }
  0xb2   : > { %p3476_p11 = pnand %p3475_p0, %p3474_p8 }
  0xb3   : > { %p3483_p1 = por %p3482_p7, %p3481_p3 }
  0xb4   : > { %p3477_p10 = pneg %p3476_p11 }
  0xb6   : > { %p3484_p13 = pnand %p3483_p1, %p3477_p10 }
  0xb8   : > { %3487 = shalt.err (!%p3484_p13)
}
  0xb9   : > { %s3488_s5 = scalar_lea.vmem %s4039_s19, 256  ;;  %s3668_s11 = smov [#allocation7]  }
  0xba   : > { %p3489_p12 = scmp.ne.s32.totalorder %s4039_s19, %s3488_s5  ;;  %s3493_s21 = sshll.u32 %s3668_s11, 4  ;;  %s3494_s21 = int_to_ptr.vmem [resolvable:$false] %s3493_s21 }
  0xbb   : > { %s3495_s25 = scalar_lea.vmem %s3494_s21, 512  ;;  %p3496_p9 = scmp.lt.s32.totalorder %s4039_s19, %s3494_s21 }
  0xbc   : > { %p3491_p8 = pnand %p3489_p12, %p3475_p0  ;;  %p3497_p6 = scmp.lt.s32.totalorder %s3495_s25, %s3488_s5 }
  0xbe   : > { %p3492_p11 = pneg %p3491_p8  ;;  %p3498_p2 = por %p3497_p6, %p3496_p9 }
  0xc0   : > { %p3499_p3 = pnand %p3498_p2, %p3492_p11 }
  0xc2   : > { %3502 = shalt.err (!%p3499_p3)
}
  0xc3   : > { %3259 = dma.hbm_to_vmem [thread:$0]  (!%p4043_p4), %s4037_s30, 256, %s4039_s19, %s3855_s2, %s4713_s3, %s4713_s3, %s4712_s26  }
  0xc4   : > { %p4740_p0 = scmp.ne.s32.totalorder %s4709_s7, 0 }
  0xc5   : > { %s4079_s29 = sand.u32 (!%p4740_p0), 1, %s3637_s16  }
  0xc6   : > { %421 = sbr.rel (%p4740_p0) target bundleno = 1099 (0x44b), region = 56  ;;  %s2403_s1 = sshll.u32 (!%p4740_p0), %s4079_s29, 6 }
  0xc7   : > { %s424_s27 = scalar_lea.sflag (!%p4740_p0), [#allocation3], %s4079_s29  ;;  %s4085_s0 = scalar_lea.vmem (!%p4740_p0), [#allocation2], %s2403_s1 }
  0xcd   : > { %3588 = dma.done.wait (%p3949_p5), %s424_s27, 1024  }
  0xce   : > { %3590 = vsyncadd (%p3949_p5), %s424_s27, 4294966272  ;;  %s432_s2 = sand.u32 1, %s3887_s9   ;;  %s434_s7 = sand.u32 1, %s3625_s13  }
  0xcf   : > { %s4093_s26 = sshll.u32 %s434_s7, 4  ;;  %s433_s3 = scalar_lea.sflag [#allocation6], %s432_s2 }
  0xd0   : > { %s436_s19 = scalar_lea.vmem [#allocation5], %s4093_s26  ;;  %p4741_p9 = scmp.ne.s32.totalorder %s4708_s10, 0 }
  0xd2   : > { %3592 = dma.done.wait (%p4741_p9), %s433_s3, 256  }
  0xd3   : > { %3594 = vsyncadd (%p4741_p9), %s433_s3, 4294967040  ;;  %s4742_s30 = sld [smem:[#allocation17_spill]]  ;;  %p4743_p5 = scmp.ne.s32.totalorder %s4735_s20, 0 }
  0xd9   : > { %s443_s4 = sand.u32 1, %s4742_s30  }
  0xda   : > { %s4101_s23 = sshll.u32 %s443_s4, 4 }
  0xdb   : > { %s445_s14 = scalar_lea.vmem [#allocation7], %s4101_s23 }
  0xdc   : > { %3596 = dma.done.wait (%p4743_p5), %s433_s3, 256  }
  0xdd   : > { %3598 = vsyncadd (%p4743_p5), %s433_s3, 4294967040  ;;  %p4744_p4 = scmp.eq.s32.totalorder %s3887_s9, 0 }
  0xdf   : > { %3600 = dma.done.wait (%p4744_p4), [#allocation9], 4608   ;;  %p4745_p10 = pmov %p4744_p4 }
  0xe0   : > { %s4746_s18 = sld [smem:[#allocation35_spill]]  ;;  %v4140_v9 = vld [vmem:[%s4085_s0] sm:$0xff]  ;;  %v4185_v25 = vld [vmem:[%s4085_s0 + $0x8] sm:$0xff]  ;;  %v4189_v26 = vld [vmem:[%s4085_s0 + $0x10] sm:$0xff]  ;;  %vm830_vm0 = vcmask 1040384   ;;  %vm861_vm1 = vcmask 1046528  }
  0xe1   : > { %3602 = vsyncadd (%p4745_p10), [#allocation9], 4294962688  ;;  %2712 = vmatprep.mubr.f32.mxu0 %v4140_v9  ;;  %v4195_v27 = vld [vmem:[%s4085_s0 + $0x18] sm:$0xff]  ;;  %v4199_v28 = vld [vmem:[%s4085_s0 + $0x20] sm:$0xff]  ;;  %s4749_s23 = sld [smem:[#allocation21_spill]]  ;;  %vm901_vm2 = vcmask 261120  }
  0xe2   : > { %v4205_v29 = vld [vmem:[%s4085_s0 + $0x28] sm:$0xff]  ;;  %v4209_v30 = vld [vmem:[%s4085_s0 + $0x30] sm:$0xff]  ;;  %v4215_v31 = vld [vmem:[%s4085_s0 + $0x38] sm:$0xff]  ;;  %s4750_s21 = sld [smem:[#allocation39_spill]]  ;;  %s4752_s10 = sld [smem:[#allocation38_spill]] }
  0xe3   : > { %v654_v32 = vld [vmem:[%s436_s19] sm:$0xff]  ;;  %v655_v33 = vld [vmem:[%s436_s19 + $0x8] sm:$0xff]  ;;  %s4748_s19 = sld [smem:[#allocation36_spill]]  ;;  %s4755_s20 = sld [smem:[#allocation41_spill]] }
  0xe4   : > { %v736_v34 = vld [vmem:[%s445_s14] sm:$0xff]  ;;  %v737_v35 = vld [vmem:[%s445_s14 + $0x8] sm:$0xff]  ;;  %s2210_s2 = scalar_lea.sflag [#allocation4], %s4079_s29  ;;  %p4757_p12 = scmp.ne.s32.totalorder %s4720_s28, 0 }
  0xe5   : > { %v897_v36 = vld [vmem:[#allocation8 + $0x20] sm:$0xff]  ;;  %v898_v37 = vld [vmem:[#allocation8 + $0x28] sm:$0xff]  ;;  %v899_v42 = vld [vmem:[#allocation8 + $0x30] sm:$0xff]  ;;  %s3669_s3 = smov [#allocation10]  }
  0xe6   : > { %s4747_s6 = smov %s4746_s18  ;;  %v504_v0 = vld [vmem:[%s4746_s18] sm:$0xff]  ;;  %v3090_v38 = vpack.c.bf16 %v898_v37, %v897_v36  ;;  %v893_v40 = vld [vmem:[#allocation8 + $0x8] sm:$0xff]  ;;  %v900_v43 = vld [vmem:[#allocation8 + $0x38] sm:$0xff]  ;;  %s3507_s30 = sshll.u32 %s3669_s3, 4  ;;  %s3508_s30 = int_to_ptr.vmem [resolvable:$false] %s3507_s30 }
  0xe7   : > { %v505_v1 = vld [vmem:[%s4747_s6 + $0x8] sm:$0xff]  ;;  %v506_v2 = vld [vmem:[%s4747_s6 + $0x10] sm:$0xff]  ;;  %v507_v4 = vld [vmem:[%s4747_s6 + $0x18] sm:$0xff]  ;;  %v3094_v44 = vpack.c.bf16 %v900_v43, %v899_v42  ;;  %p529_p7 = scmp.gt.s32.totalorder %s4749_s23, 0  ;;  %p532_p1 = scmp.lt.s32.totalorder %s4749_s23, 3 }
  0xe8   : > { %v4121_v3 = vpack.c.bf16 %v505_v1, %v504_v0  ;;  %v4126_v5 = vpack.c.bf16 %v507_v4, %v506_v2  ;;  %v508_v6 = vld [vmem:[%s4747_s6 + $0x20] sm:$0xff]  ;;  %v509_v7 = vld [vmem:[%s4747_s6 + $0x28] sm:$0xff]  ;;  %v510_v10 = vld [vmem:[%s4747_s6 + $0x30] sm:$0xff]  ;;  %s4751_s25 = smov %s4750_s21  ;;  %s3509_s4 = scalar_lea.vmem %s3508_s30, 2048 }
  0xe9   : > { %v4137_v8 = vpack.c.bf16 %v509_v7, %v508_v6  ;;  %v511_v11 = vld [vmem:[%s4747_s6 + $0x38] sm:$0xff]  ;;  %v512_v13 = vld [vmem:[%s4747_s6 + $0x40] sm:$0xff]  ;;  %v513_v14 = vld [vmem:[%s4747_s6 + $0x48] sm:$0xff]  ;;  %s530_s14 = scalar_select %p529_p7, 1, 0 }
  0xea   : > { %2995 = vmatprep.subr.bf16.mxu0 %v4121_v3  ;;  %v4151_v12 = vpack.c.bf16 %v511_v11, %v510_v10  ;;  %v4161_v15 = vpack.c.bf16 %v513_v14, %v512_v13  ;;  %v514_v16 = vld [vmem:[%s4747_s6 + $0x50] sm:$0xff]  ;;  %v515_v17 = vld [vmem:[%s4747_s6 + $0x58] sm:$0xff]  ;;  %v516_v19 = vld [vmem:[%s4747_s6 + $0x60] sm:$0xff]  ;;  %s533_s18 = scalar_select %p532_p1, 1, 0 }
  0xeb   : > { %2997 = vmatpush3.bf16.msra.mxu0 %v4121_v3  ;;  %v3014_v18 = vpack.c.bf16 %v515_v17, %v514_v16  ;;  %v517_v20 = vld [vmem:[%s4747_s6 + $0x68] sm:$0xff]  ;;  %v518_v22 = vld [vmem:[%s4747_s6 + $0x70] sm:$0xff]  ;;  %v519_v23 = vld [vmem:[%s4747_s6 + $0x78] sm:$0xff]  ;;  %s531_s17 = scvt.s32.f32 %s530_s14  ;;  %s4754_s14 = sld [smem:[#allocation22_spill]] }
  0xec   : > { %2999 = vmatprep.subr.bf16.mxu0 %v4126_v5  ;;  %v3018_v21 = vpack.c.bf16 %v517_v20, %v516_v19  ;;  %v3022_v24 = vpack.c.bf16 %v519_v23, %v518_v22  ;;  %v892_v39 = vld [vmem:[#allocation8] sm:$0xff]  ;;  %v894_v45 = vld [vmem:[#allocation8 + $0x10] sm:$0xff]  ;;  %v895_v46 = vld [vmem:[#allocation8 + $0x18] sm:$0xff]  ;;  %s534_s12 = scvt.s32.f32 %s533_s18  ;;  %s2499_s18 = sshll.u32 %s4749_s23, 3 }
  0xed   : > { %v3098_v41 = vpack.c.bf16 %v893_v40, %v892_v39  ;;  %v3102_v47 = vpack.c.bf16 %v895_v46, %v894_v45  ;;  %v1149_v48 = vld [vmem:[#allocation8 + $0x40] sm:$0xff]  ;;  %v1150_v49 = vld [vmem:[#allocation8 + $0x48] sm:$0xff]  ;;  %v733_v20 = vstv %s531_s17  ;;  %v1152_v42 = vld [vmem:[#allocation8 + $0x58] sm:$0xff]  ;;  %s4541_s17 = scalar_lea.vmem [#allocation10], %s2403_s1  ;;  %s4756_s9 = smov %s4755_s20 }
  0xee   : > { %v4240_v50 = vpack.c.bf16 %v1150_v49, %v1149_v48  ;;  %v4246_v51 = vld [vmem:[%s4748_s19] ss:$0 sm:$0xff]  ;;  %s4753_s19 = sld [smem:[#allocation40_spill]]  ;;  %s2226_s5 = sshll.u32 %s4541_s17, 4  ;;  %s4556_s5 = int_to_ptr.vmem [resolvable:$true] %s2226_s5 }
  0xef   : > { %3001 = vmatpush3.bf16.msra.mxu0 %v4126_v5  ;;  %3099 = vmatprep.subr.bf16.mxu1 %v3098_v41  ;;  %s3503_s7 = scalar_lea.vmem %s4556_s5, 1024  ;;  %p3510_p6 = scmp.lt.s32.totalorder %s4556_s5, %s3508_s30 }
  0xf0   : > { %3003 = vmatprep.subr.bf16.mxu0 %v4137_v8  ;;  %3101 = vmatpush3.bf16.msra.mxu1 %v3098_v41  ;;  %v1151_v41 = vld [vmem:[#allocation8 + $0x50] sm:$0xff]  ;;  %p3504_p13 = scmp.ne.s32.totalorder %s4556_s5, %s3503_s7  ;;  %p3511_p2 = scmp.lt.s32.totalorder %s3509_s4, %s3503_s7 }
  0xf1   : > { %3103 = vmatprep.subr.bf16.mxu1 %v3102_v47  ;;  %v3110_v48 = vpack.c.bf16 %v1152_v42, %v1151_v41 }
  0xf2   : > { %p3505_p8 = pnand %p3504_p13, %p4757_p12  ;;  %p3512_p3 = por %p3511_p2, %p3510_p6 }
  0xf3   : > { %3005 = vmatpush3.bf16.msra.mxu0 %v4137_v8 }
  0xf4   : > { %3007 = vmatprep.subr.bf16.mxu0 %v4151_v12  ;;  %3105 = vmatpush3.bf16.msra.mxu1 %v3102_v47  ;;  %p3506_p11 = pneg %p3505_p8 }
  0xf5   : > { %3107 = vmatprep.subr.bf16.mxu1 %v4240_v50 }
  0xf6   : > { %p3513_p0 = pnand %p3512_p3, %p3506_p11 }
  0xf7   : > { %3009 = vmatpush3.bf16.msra.mxu0 %v4151_v12 }
  0xf8   : > { %3011 = vmatprep.subr.bf16.mxu0 %v4161_v15 }
  0xfb   : > { %3013 = vmatpush3.bf16.msra.mxu0 %v4161_v15 }
  0xfc   : > { %3015 = vmatprep.subr.bf16.mxu0 %v3014_v18 }
  0xff   : > { %3017 = vmatpush3.bf16.msra.mxu0 %v3014_v18 }
 0x100   : > { %3019 = vmatprep.subr.bf16.mxu0 %v3018_v21 }
 0x103   : > { %3021 = vmatpush3.bf16.msra.mxu0 %v3018_v21 }
 0x104   : > { %3023 = vmatprep.subr.bf16.mxu0 %v3022_v24 }
 0x107   : > { %3025 = vmatpush3.bf16.msra.mxu0 %v3022_v24 }
 0x108   : > { %3027 = vmatprep.subr.bf16.mxu0 %v4121_v3 }
 0x10a   : > { %2713 = vmatmul.mubr.f32.vlgmr.msra.gmra.mrb[0].mxu0 %v4185_v25 }
 0x10b   : > { %3029 = vmatpush3.bf16.msra.mxu0 %v4121_v3  ;;  %2715 = vmatprep.mubr.f32.mxu0 %v4189_v26 }
 0x10c   : > { %3031 = vmatprep.subr.bf16.mxu0 %v4126_v5 }
 0x10e   : > { %2716 = vmatmul.mubr.f32.gmra.mrb[2].mxu0 %v4195_v27 }
 0x10f   : > { %3033 = vmatpush3.bf16.msra.mxu0 %v4126_v5  ;;  %2718 = vmatprep.mubr.f32.mxu0 %v4199_v28 }
 0x110   : > { %3035 = vmatprep.subr.bf16.mxu0 %v4137_v8 }
 0x112   : > { %2719 = vmatmul.mubr.f32.gmra.mrb[4].mxu0 %v4205_v29 }
 0x113   : > { %3037 = vmatpush3.bf16.msra.mxu0 %v4137_v8  ;;  %2721 = vmatprep.mubr.f32.mxu0 %v4209_v30 }
 0x114   : > { %3039 = vmatprep.subr.bf16.mxu0 %v4151_v12 }
 0x116   : > { %2722 = vmatmul.mubr.f32.gmra.mrb[6].mxu0 %v4215_v31 }
 0x117   : > { %3041 = vmatpush3.bf16.msra.mxu0 %v4151_v12  ;;  %2756 = vmatprep.mubr.f32.mxu0 %v654_v32 }
 0x118   : > { %3043 = vmatprep.subr.bf16.mxu0 %v4161_v15 }
 0x11b   : > { %3045 = vmatpush3.bf16.msra.mxu0 %v4161_v15 }
 0x11c   : > { %3047 = vmatprep.subr.bf16.mxu0 %v3014_v18 }
 0x11f   : > { %3049 = vmatpush3.bf16.msra.mxu0 %v3014_v18 }
 0x120   : > { %3051 = vmatprep.subr.bf16.mxu0 %v3018_v21 }
 0x123   : > { %3053 = vmatpush3.bf16.msra.mxu0 %v3018_v21 }
 0x124   : > { %3055 = vmatprep.subr.bf16.mxu0 %v3022_v24 }
 0x127   : > { %3057 = vmatpush3.bf16.msra.mxu0 %v3022_v24 }
 0x128   : > { %3059 = vmatprep.subr.bf16.mxu0 %v4121_v3 }
 0x12a   : > { %2757 = vmatmul.mubr.f32.vlgmr.msra.gmra.mrb[8].mxu0 %v655_v33 }
 0x12b   : > { %3061 = vmatpush3.bf16.msra.mxu0 %v4121_v3  ;;  %2791 = vmatprep.mubr.f32.mxu0 %v736_v34 }
 0x12c   : > { %3063 = vmatprep.subr.bf16.mxu0 %v4126_v5 }
 0x12f   : > { %3065 = vmatpush3.bf16.msra.mxu0 %v4126_v5 }
 0x130   : > { %3067 = vmatprep.subr.bf16.mxu0 %v4137_v8 }
 0x133   : > { %3069 = vmatpush3.bf16.msra.mxu0 %v4137_v8 }
 0x134   : > { %3071 = vmatprep.subr.bf16.mxu0 %v4151_v12 }
 0x137   : > { %3073 = vmatpush3.bf16.msra.mxu0 %v4151_v12 }
 0x138   : > { %3075 = vmatprep.subr.bf16.mxu0 %v4161_v15 }
 0x13b   : > { %3077 = vmatpush3.bf16.msra.mxu0 %v4161_v15 }
 0x13c   : > { %3079 = vmatprep.subr.bf16.mxu0 %v3014_v18 }
 0x13f   : > { %3081 = vmatpush3.bf16.msra.mxu0 %v3014_v18 }
 0x140   : > { %3083 = vmatprep.subr.bf16.mxu0 %v3018_v21 }
 0x143   : > { %3085 = vmatpush3.bf16.msra.mxu0 %v3018_v21 }
 0x144   : > { %3087 = vmatprep.subr.bf16.mxu0 %v3022_v24 }
 0x147   : > { %3089 = vmatpush3.bf16.msra.mxu0 %v3022_v24 }
 0x148   : > { %3091 = vmatprep.subr.bf16.mxu0 %v3090_v38 }
 0x14a   : > { %2792 = vmatmul.mubr.f32.vlgmr.msra.gmra.mrb[10].mxu0 %v737_v35 }
 0x14b   : > { %3093 = vmatpush3.bf16.msra.mxu0 %v3090_v38 }
 0x14c   : > { %3095 = vmatprep.subr.bf16.mxu0 %v3094_v44 }
 0x14f   : > { %3097 = vmatpush3.bf16.msra.mxu0 %v3094_v44 }
 0x1dd   : > { %v2714_v52 = vpop.f32.mrb[0].mxu0 }
 0x1de   : > { %v613_v53 = vadd.f32 %v2714_v52, %v4246_v51  ;;  %v607_v54 = vpop.f32.mrb[1].mxu0 }
 0x1df   : > { %v608_v55 = vadd.f32 %v4246_v51, %v607_v54  ;;  %v1288_v54 = vld [vmem:[#allocation8 + $0x68] sm:$0xff] }
 0x1e0   : > { %v4250_v56 = vmax.f32 %v613_v53, 0.0  ;;  %v1287_v53 = vld [vmem:[#allocation8 + $0x60] sm:$0xff] }
 0x1e1   : > { %v4252_v57 = vmax.f32 %v608_v55, 0.0  ;;  %v2717_v58 = vpop.f32.mrb[2].mxu0 }
 0x1e2   : > { %v617_v59 = vpop.f32.mrb[3].mxu0  ;;  %v835_v60 = vrot.slane %v4250_v56, 7  ;;  %v866_v61 = vrot.slane %v4250_v56, 1  ;;  %v623_v34 = vadd.f32 %v2717_v58, %v4246_v51 }
 0x1e3   : > { %v834_v62 = vrot.slane %v4252_v57, 7  ;;  %v865_v63 = vrot.slane %v4252_v57, 1  ;;  %v618_v23 = vadd.f32 %v4246_v51, %v617_v59 }
 0x1e4   : > { %v4301_v46 = vmax.f32 %v623_v34, 0.0 }
 0x1e5   : > { %v2720_v0 = vpop.f32.mrb[4].mxu0  ;;  %v4259_v1 = vsel %vm830_vm0, %v834_v62, %v835_v60  ;;  %v4264_v2 = vsel %vm861_vm1, %v865_v63, %v866_v61  ;;  %v4291_v37 = vmax.f32 %v618_v23, 0.0  ;;  %v4313_v55 = vsel %vm830_vm0, 0.0, %v834_v62 }
 0x1e6   : > { %v627_v3 = vpop.f32.mrb[5].mxu0  ;;  %v633_v47 = vadd.f32 %v2720_v0, %v4246_v51  ;;  %v838_v59 = vrot.slane %v4301_v46, 7  ;;  %v3114_v60 = vpack.c.bf16 %v1288_v54, %v1287_v53 }
 0x1e7   : > { %v628_v38 = vadd.f32 %v4246_v51, %v627_v3  ;;  %v837_v52 = vrot.slane %v4291_v37, 7 }
 0x1e8   : > { %v4319_v58 = vmax.f32 %v633_v47, 0.0 }
 0x1e9   : > { %v2723_v4 = vpop.f32.mrb[6].mxu0  ;;  %v4305_v49 = vmax.f32 %v628_v38, 0.0  ;;  %v4335_v63 = vsel %vm830_vm0, %v837_v52, %v838_v59 }
 0x1ea   : > { %v643_v5 = vadd.f32 %v2723_v4, %v4246_v51  ;;  %v637_v6 = vpop.f32.mrb[7].mxu0  ;;  %v841_v0 = vrot.slane %v4319_v58, 7 }
 0x1eb   : > { %v638_v7 = vadd.f32 %v4246_v51, %v637_v6  ;;  %v840_v62 = vrot.slane %v4305_v49, 7  ;;  %v1290_v6 = vld [vmem:[#allocation8 + $0x78] sm:$0xff]  ;;  %v871_v23 = vrot.slane %v4305_v49, 1 }
 0x1ec   : > { %v4268_v8 = vmax.f32 %v643_v5, 0.0  ;;  %v1289_v5 = vld [vmem:[#allocation8 + $0x70] sm:$0xff] }
 0x1ed   : > { %v4270_v10 = vmax.f32 %v638_v7, 0.0  ;;  %v4341_v3 = vsel %vm830_vm0, 0.0, %v840_v62  ;;  %v4349_v4 = vsel %vm830_vm0, %v840_v62, %v841_v0  ;;  %v3118_v7 = vpack.c.bf16 %v1290_v6, %v1289_v5  ;;  %v1533_v62 = vld [vmem:[#allocation8 + $0xa8] sm:$0xff]  ;;  %v1534_v0 = vld [vmem:[#allocation8 + $0xb0] sm:$0xff]  ;;  %v1535_v5 = vld [vmem:[#allocation8 + $0xb8] sm:$0xff] }
 0x1ee   : > { %v844_v11 = vrot.slane %v4268_v8, 7  ;;  %v875_v12 = vrot.slane %v4268_v8, 1  ;;  %v3134_v6 = vpack.c.bf16 %v1535_v5, %v1534_v0 }
 0x1ef   : > { %v843_v13 = vrot.slane %v4270_v10, 7  ;;  %v874_v14 = vrot.slane %v4270_v10, 1 }
 0x1f1   : > { %v4279_v15 = vsel %vm830_vm0, %v843_v13, %v844_v11  ;;  %v4284_v16 = vsel %vm861_vm1, %v874_v14, %v875_v12  ;;  %v1410_v14 = vld [vmem:[#allocation8 + $0x80] sm:$0xff] }
 0x1fd   : > { %v2758_v17 = vpop.f32.mrb[8].mxu0 }
 0x1fe   : > { %v728_v18 = vadd.f32 %v2758_v17, %v4246_v51  ;;  %v722_v19 = vpop.f32.mrb[9].mxu0  ;;  %v1411_v17 = vld [vmem:[#allocation8 + $0x88] sm:$0xff] }
 0x1ff   : > { %v723_v21 = vadd.f32 %v4246_v51, %v722_v19  ;;  %v869_v19 = vrot.slane %v4301_v46, 1 }
 0x200   : > { %v732_v22 = vmax.f32 %v728_v18, 0.0  ;;  %v868_v18 = vrot.slane %v4291_v37, 1 }
 0x201   : > { %v731_v24 = vmax.f32 %v723_v21, 0.0  ;;  %v4363_v21 = vsel %vm861_vm1, %v866_v61, 0.0  ;;  %v815_v61 = vstv %s534_s12  ;;  %s2494_s12 = sshll.u32 %s4754_s14, 5 }
 0x202   : > { %v735_v32 = vmul.f32 %v733_v20, %v732_v22  ;;  %v4368_v22 = vsel %vm861_vm1, %v868_v18, %v869_v19  ;;  %v1779_v18 = vld [vmem:[#allocation8 + $0xe8] sm:$0xff]  ;;  %s2223_s1 = sadd.s32 %s2499_s18, %s2494_s12 }
 0x203   : > { %v734_v33 = vmul.f32 %v733_v20, %v731_v24  ;;  %v3122_v20 = vpack.c.bf16 %v1411_v17, %v1410_v14  ;;  %v872_v24 = vrot.slane %v4319_v58, 1  ;;  %v1778_v17 = vld [vmem:[#allocation8 + $0xe0] sm:$0xff]  ;;  %s2495_s23 = sshll.u32 %s2223_s1, 7 }
 0x204   : > { %v832_v35 = vrot.slane %v735_v32, 7  ;;  %v863_v36 = vrot.slane %v735_v32, 1  ;;  %s4563_s27 = scalar_lea.hbm %s4755_s20, %s2495_s23 }
 0x205   : > { %v862_v39 = vrot.slane %v734_v33, 1  ;;  %2802 = vmatprep.mubr.msk.f32.mxu0 %vm901_vm2, %v734_v33  ;;  %v831_v40 = vrot.slane %v734_v33, 7 }
 0x206   : > { %2803 = vmatmul.mubr.msk.f32.vlgmr.msra.gmra.mrb[12].mxu0 %vm901_vm2, %v735_v32  ;;  %v886_v11 = vsel %vm861_vm1, %v863_v36, 0.0 }
 0x207   : > { %2805 = vmatprep.mubr.msk.f32.mxu0 %vm901_vm2, %v4252_v57  ;;  %v855_v43 = vsel %vm830_vm0, 0.0, %v831_v40  ;;  %v833_v44 = vsel %vm830_vm0, %v831_v40, %v832_v35  ;;  %v864_v45 = vsel %vm861_vm1, %v862_v39, %v863_v36  ;;  %v4377_v36 = vsel %vm861_vm1, %v869_v19, 0.0 }
 0x208   : > { %2822 = vmatprep.mubr.msk.f32.mxu1 %vm901_vm2, %v855_v43  ;;  %v4382_v39 = vsel %vm861_vm1, %v871_v23, %v872_v24  ;;  %v1412_v43 = vld [vmem:[#allocation8 + $0x90] sm:$0xff]  ;;  %v3146_v19 = vpack.c.bf16 %v1779_v18, %v1778_v17 }
 0x209   : > { %2823 = vmatmul.mubr.msk.f32.vlgmr.msra.gmra.mrb[0].mxu1 %vm901_vm2, %v833_v44  ;;  %v1413_v44 = vld [vmem:[#allocation8 + $0x98] sm:$0xff] }
 0x20a   : > { %3109 = vmatpush3.bf16.msra.mxu1 %v4240_v50  ;;  %2806 = vmatmul.mubr.msk.f32.gmra.mrb[14].mxu0 %vm901_vm2, %v4250_v56  ;;  %v4325_v50 = vsel %vm830_vm0, 0.0, %v837_v52  ;;  %v3126_v53 = vpack.c.bf16 %v1413_v44, %v1412_v43 }
 0x20b   : > { %2825 = vmatprep.mubr.msk.f32.mxu1 %vm901_vm2, %v4313_v55  ;;  %2808 = vmatprep.mubr.msk.f32.mxu0 %vm901_vm2, %v4291_v37 }
 0x20c   : > { %3111 = vmatprep.subr.bf16.mxu1 %v3110_v48 }
 0x20d   : > { %2826 = vmatmul.mubr.msk.f32.gmra.mrb[2].mxu1 %vm901_vm2, %v4259_v1 }
 0x20e   : > { %2809 = vmatmul.mubr.msk.f32.gmra.mrb[16].mxu0 %vm901_vm2, %v4301_v46  ;;  %2828 = vmatprep.mubr.msk.f32.mxu1 %vm901_vm2, %v4325_v50 }
 0x20f   : > { %2811 = vmatprep.mubr.msk.f32.mxu0 %vm901_vm2, %v4305_v49  ;;  %3113 = vmatpush3.bf16.msra.mxu1 %v3110_v48 }
 0x210   : > { %3115 = vmatprep.subr.bf16.mxu1 %v3114_v60 }
 0x211   : > { %2829 = vmatmul.mubr.msk.f32.gmra.mrb[4].mxu1 %vm901_vm2, %v4335_v63 }
 0x212   : > { %2812 = vmatmul.mubr.msk.f32.gmra.mrb[18].mxu0 %vm901_vm2, %v4319_v58  ;;  %2831 = vmatprep.mubr.msk.f32.mxu1 %vm901_vm2, %v4341_v3 }
 0x215   : > { %2832 = vmatmul.mubr.msk.f32.gmra.mrb[6].mxu1 %vm901_vm2, %v4349_v4 }
 0x216   : > { %2842 = vmatprep.mubr.msk.f32.mxu1 %vm901_vm2, %v864_v45 }
 0x219   : > { %2843 = vmatmul.mubr.msk.f32.vlgmr.msra.gmra.mrb[0].mxu1 %vm901_vm2, %v886_v11  ;;  %v1656_v11 = vld [vmem:[#allocation8 + $0xc8] sm:$0xff] }
 0x21a   : > { %3117 = vmatpush3.bf16.msra.mxu1 %v3114_v60  ;;  %2845 = vmatprep.mubr.msk.f32.mxu1 %vm901_vm2, %v4264_v2  ;;  %v1532_v60 = vld [vmem:[#allocation8 + $0xa0] sm:$0xff] }
 0x21b   : > { %3119 = vmatprep.subr.bf16.mxu1 %v3118_v7 }
 0x21d   : > { %2846 = vmatmul.mubr.msk.f32.gmra.mrb[2].mxu1 %vm901_vm2, %v4363_v21  ;;  %v2793_v32 = vpop.f32.mrb[10].mxu0 }
 0x21e   : > { %2848 = vmatprep.mubr.msk.f32.mxu1 %vm901_vm2, %v4368_v22  ;;  %3121 = vmatpush3.bf16.msra.mxu1 %v3118_v7  ;;  %v810_v33 = vadd.f32 %v2793_v32, %v4246_v51  ;;  %v804_v34 = vpop.f32.mrb[11].mxu0  ;;  %v1655_v7 = vld [vmem:[#allocation8 + $0xc0] sm:$0xff]  ;;  %v1901_v32 = vld [vmem:[#allocation8 + $0x108] sm:$0xff] }
 0x21f   : > { %3123 = vmatprep.subr.bf16.mxu1 %v3122_v20  ;;  %v805_v35 = vadd.f32 %v4246_v51, %v804_v34  ;;  %v4391_v51 = vsel %vm861_vm1, %v872_v24, 0.0  ;;  %v1900_v24 = vld [vmem:[#allocation8 + $0x100] sm:$0xff] }
 0x220   : > { %v814_v38 = vmax.f32 %v810_v33, 0.0  ;;  %v3154_v33 = vpack.c.bf16 %v1901_v32, %v1900_v24 }
 0x221   : > { %2849 = vmatmul.mubr.msk.f32.gmra.mrb[4].mxu1 %vm901_vm2, %v4377_v36  ;;  %v813_v40 = vmax.f32 %v805_v35, 0.0 }
 0x222   : > { %2851 = vmatprep.mubr.msk.f32.mxu1 %vm901_vm2, %v4382_v39  ;;  %v4386_v41 = vmul.f32 %v815_v61, %v814_v38 }
 0x223   : > { %v4388_v42 = vmul.f32 %v815_v61, %v813_v40  ;;  %v2481_v40 = vld [vmem:[%s4752_s10] ss:$0 sm:$0xff] }
 0x224   : > { %v847_v45 = vrot.slane %v4386_v41, 7  ;;  %v878_v47 = vrot.slane %v4386_v41, 1 }
 0x225   : > { %2852 = vmatmul.mubr.msk.f32.gmra.mrb[6].mxu1 %vm901_vm2, %v4391_v51  ;;  %v877_v48 = vrot.slane %v4388_v42, 1  ;;  %v846_v52 = vrot.slane %v4388_v42, 7 }
 0x226   : > { %2862 = vmatprep.mubr.msk.f32.mxu1 %vm901_vm2, %v4313_v55  ;;  %v3130_v55 = vpack.c.bf16 %v1533_v62, %v1532_v60 }
 0x227   : > { %v4404_v54 = vsel %vm830_vm0, %v846_v52, %v847_v45  ;;  %v4409_v59 = vsel %vm861_vm1, %v877_v48, %v878_v47 }
 0x229   : > { %2863 = vmatmul.mubr.msk.f32.vlgmr.msra.gmra.mrb[0].mxu1 %vm901_vm2, %v4259_v1  ;;  %v859_v1 = vsel %vm830_vm0, 0.0, %v843_v13  ;;  %v3138_v13 = vpack.c.bf16 %v1656_v11, %v1655_v7 }
 0x22a   : > { %3125 = vmatpush3.bf16.msra.mxu1 %v3122_v20  ;;  %2865 = vmatprep.mubr.msk.f32.mxu1 %vm901_vm2, %v4325_v50  ;;  %v1780_v20 = vld [vmem:[#allocation8 + $0xf0] sm:$0xff] }
 0x22b   : > { %3127 = vmatprep.subr.bf16.mxu1 %v3126_v53 }
 0x22d   : > { %2866 = vmatmul.mubr.msk.f32.gmra.mrb[2].mxu1 %vm901_vm2, %v4335_v63 }
 0x22e   : > { %2868 = vmatprep.mubr.msk.f32.mxu1 %vm901_vm2, %v4341_v3  ;;  %3129 = vmatpush3.bf16.msra.mxu1 %v3126_v53 }
 0x22f   : > { %3131 = vmatprep.subr.bf16.mxu1 %v3130_v55 }
 0x231   : > { %2869 = vmatmul.mubr.msk.f32.gmra.mrb[4].mxu1 %vm901_vm2, %v4349_v4 }
 0x232   : > { %2871 = vmatprep.mubr.msk.f32.mxu1 %vm901_vm2, %v859_v1 }
 0x235   : > { %2872 = vmatmul.mubr.msk.f32.gmra.mrb[6].mxu1 %vm901_vm2, %v4279_v15 }
 0x236   : > { %2882 = vmatprep.mubr.msk.f32.mxu1 %vm901_vm2, %v4252_v57  ;;  %v1658_v57 = vld [vmem:[#allocation8 + $0xd8] sm:$0xff] }
 0x239   : > { %2883 = vmatmul.mubr.msk.f32.vlgmr.msra.gmra.mrb[0].mxu1 %vm901_vm2, %v4250_v56  ;;  %v1657_v56 = vld [vmem:[#allocation8 + $0xd0] sm:$0xff] }
 0x23a   : > { %3133 = vmatpush3.bf16.msra.mxu1 %v3130_v55  ;;  %2885 = vmatprep.mubr.msk.f32.mxu1 %vm901_vm2, %v4291_v37  ;;  %v3142_v14 = vpack.c.bf16 %v1658_v57, %v1657_v56 }
 0x23b   : > { %3135 = vmatprep.subr.bf16.mxu1 %v3134_v6 }
 0x23d   : > { %2886 = vmatmul.mubr.msk.f32.gmra.mrb[2].mxu1 %vm901_vm2, %v4301_v46 }
 0x23e   : > { %2888 = vmatprep.mubr.msk.f32.mxu1 %vm901_vm2, %v4305_v49  ;;  %3137 = vmatpush3.bf16.msra.mxu1 %v3134_v6 }
 0x23f   : > { %3139 = vmatprep.subr.bf16.mxu1 %v3138_v13 }
 0x241   : > { %2889 = vmatmul.mubr.msk.f32.gmra.mrb[4].mxu1 %vm901_vm2, %v4319_v58 }
 0x242   : > { %2891 = vmatprep.mubr.msk.f32.mxu1 %vm901_vm2, %v4270_v10 }
 0x245   : > { %2892 = vmatmul.mubr.msk.f32.gmra.mrb[6].mxu1 %vm901_vm2, %v4268_v8 }
 0x246   : > { %2902 = vmatprep.mubr.msk.f32.mxu1 %vm901_vm2, %v4264_v2  ;;  %v890_v2 = vsel %vm861_vm1, %v875_v12, 0.0  ;;  %v860_v12 = vsel %vm830_vm0, 0.0, %v846_v52 }
 0x249   : > { %2903 = vmatmul.mubr.msk.f32.vlgmr.msra.gmra.mrb[0].mxu1 %vm901_vm2, %v4363_v21  ;;  %v1781_v21 = vld [vmem:[#allocation8 + $0xf8] sm:$0xff] }
 0x24a   : > { %3141 = vmatpush3.bf16.msra.mxu1 %v3138_v13  ;;  %2905 = vmatprep.mubr.msk.f32.mxu1 %vm901_vm2, %v4368_v22  ;;  %v3150_v23 = vpack.c.bf16 %v1781_v21, %v1780_v20 }
 0x24b   : > { %3143 = vmatprep.subr.bf16.mxu1 %v3142_v14 }
 0x24d   : > { %2906 = vmatmul.mubr.msk.f32.gmra.mrb[2].mxu1 %vm901_vm2, %v4377_v36 }
 0x24e   : > { %2908 = vmatprep.mubr.msk.f32.mxu1 %vm901_vm2, %v4382_v39  ;;  %3145 = vmatpush3.bf16.msra.mxu1 %v3142_v14 }
 0x24f   : > { %3147 = vmatprep.subr.bf16.mxu1 %v3146_v19 }
 0x251   : > { %2909 = vmatmul.mubr.msk.f32.gmra.mrb[4].mxu1 %vm901_vm2, %v4391_v51 }
 0x252   : > { %2911 = vmatprep.mubr.msk.f32.mxu1 %vm901_vm2, %v4284_v16 }
 0x255   : > { %2912 = vmatmul.mubr.msk.f32.gmra.mrb[6].mxu1 %vm901_vm2, %v890_v2 }
 0x256   : > { %2922 = vmatprep.mubr.msk.f32.mxu1 %vm901_vm2, %v4325_v50  ;;  %v1902_v50 = vld [vmem:[#allocation8 + $0x110] sm:$0xff] }
 0x259   : > { %2923 = vmatmul.mubr.msk.f32.vlgmr.msra.gmra.mrb[0].mxu1 %vm901_vm2, %v4335_v63  ;;  %v1903_v63 = vld [vmem:[#allocation8 + $0x118] sm:$0xff] }
 0x25a   : > { %3149 = vmatpush3.bf16.msra.mxu1 %v3146_v19  ;;  %2925 = vmatprep.mubr.msk.f32.mxu1 %vm901_vm2, %v4341_v3  ;;  %v2045_v3 = vld [vmem:[%s4750_s21] sm:$0xff]  ;;  %v3158_v34 = vpack.c.bf16 %v1903_v63, %v1902_v50 }
 0x25b   : > { %3151 = vmatprep.subr.bf16.mxu1 %v3150_v23 }
 0x25d   : > { %2926 = vmatmul.mubr.msk.f32.gmra.mrb[2].mxu1 %vm901_vm2, %v4349_v4  ;;  %v2046_v4 = vld [vmem:[%s4751_s25 + $0x8] sm:$0xff] }
 0x25e   : > { %2928 = vmatprep.mubr.msk.f32.mxu1 %vm901_vm2, %v859_v1  ;;  %3153 = vmatpush3.bf16.msra.mxu1 %v3150_v23  ;;  %v2482_v23 = vld [vmem:[%s4753_s19] ss:$0 sm:$0xff] }
 0x25f   : > { %3155 = vmatprep.subr.bf16.mxu1 %v3154_v33 }
 0x261   : > { %2929 = vmatmul.mubr.msk.f32.gmra.mrb[4].mxu1 %vm901_vm2, %v4279_v15  ;;  %v3162_v15 = vpack.c.bf16 %v2046_v4, %v2045_v3 }
 0x262   : > { %2931 = vmatprep.mubr.msk.f32.mxu1 %vm901_vm2, %v860_v12 }
 0x263   : > { %3163 = vmatprep.subr.bf16.mxu0 %v3162_v15 }
 0x264   : > { %3165 = vmatpush3.bf16.msra.mxu0 %v3162_v15 }
 0x265   : > { %2932 = vmatmul.mubr.msk.f32.gmra.mrb[6].mxu1 %vm901_vm2, %v4404_v54 }
 0x266   : > { %2942 = vmatprep.mubr.msk.f32.mxu1 %vm901_vm2, %v4291_v37  ;;  %v2048_v37 = vld [vmem:[%s4751_s25 + $0x18] sm:$0xff] }
 0x269   : > { %2943 = vmatmul.mubr.msk.f32.vlgmr.msra.gmra.mrb[0].mxu1 %vm901_vm2, %v4301_v46 }
 0x26a   : > { %3157 = vmatpush3.bf16.msra.mxu1 %v3154_v33  ;;  %2945 = vmatprep.mubr.msk.f32.mxu1 %vm901_vm2, %v4305_v49 }
 0x26b   : > { %3159 = vmatprep.subr.bf16.mxu1 %v3158_v34 }
 0x26d   : > { %2946 = vmatmul.mubr.msk.f32.gmra.mrb[2].mxu1 %vm901_vm2, %v4319_v58 }
 0x26e   : > { %2948 = vmatprep.mubr.msk.f32.mxu1 %vm901_vm2, %v4270_v10  ;;  %3161 = vmatpush3.bf16.msra.mxu1 %v3158_v34  ;;  %v2047_v10 = vld [vmem:[%s4751_s25 + $0x10] sm:$0xff] }
 0x271   : > { %2949 = vmatmul.mubr.msk.f32.gmra.mrb[4].mxu1 %vm901_vm2, %v4268_v8  ;;  %v891_v8 = vsel %vm861_vm1, %v878_v47, 0.0 }
 0x272   : > { %2951 = vmatprep.mubr.msk.f32.mxu1 %vm901_vm2, %v4388_v42 }
 0x275   : > { %2952 = vmatmul.mubr.msk.f32.gmra.mrb[6].mxu1 %vm901_vm2, %v4386_v41 }
 0x276   : > { %2962 = vmatprep.mubr.msk.f32.mxu1 %vm901_vm2, %v4368_v22 }
 0x279   : > { %2963 = vmatmul.mubr.msk.f32.vlgmr.msra.gmra.mrb[0].mxu1 %vm901_vm2, %v4377_v36 }
 0x27a   : > { %2965 = vmatprep.mubr.msk.f32.mxu1 %vm901_vm2, %v4382_v39 }
 0x27d   : > { %2966 = vmatmul.mubr.msk.f32.gmra.mrb[2].mxu1 %vm901_vm2, %v4391_v51 }
 0x27e   : > { %2968 = vmatprep.mubr.msk.f32.mxu1 %vm901_vm2, %v4284_v16  ;;  %v3166_v16 = vpack.c.bf16 %v2048_v37, %v2047_v10 }
 0x280   : > { %3167 = vmatprep.subr.bf16.mxu0 %v3166_v16 }
 0x281   : > { %2969 = vmatmul.mubr.msk.f32.gmra.mrb[4].mxu1 %vm901_vm2, %v890_v2  ;;  %3169 = vmatpush3.bf16.msra.mxu0 %v3166_v16 }
 0x282   : > { %2971 = vmatprep.mubr.msk.f32.mxu1 %vm901_vm2, %v4409_v59 }
 0x285   : > { %2972 = vmatmul.mubr.msk.f32.gmra.mrb[6].mxu1 %vm901_vm2, %v891_v8 }
 0x2d9   : > { %v2804_v46 = vpop.f32.mrb[12].mxu0 }
 0x2da   : > { %v984_v49 = vpop.f32.mrb[13].mxu0 }
 0x2dd   : > { %v2807_v58 = vpop.f32.mrb[14].mxu0 }
 0x2de   : > { %v994_v22 = vpop.f32.mrb[15].mxu0 }
 0x2e1   : > { %v2810_v61 = vpop.f32.mrb[16].mxu0 }
 0x2e2   : > { %v1004_v35 = vpop.f32.mrb[17].mxu0 }
 0x2e5   : > { %v2813_v36 = vpop.f32.mrb[18].mxu0 }
 0x2e6   : > { %v1014_v38 = vpop.f32.mrb[19].mxu0 }
 0x34c   : > { %v2964_v39 = vpop.f32.mrb[0].mxu1 }
 0x34d   : > { %v3170_v41 = vadd.f32 %v2964_v39, %v2804_v46  ;;  %v1975_v42 = vpop.f32.mrb[1].mxu1 }
 0x34e   : > { %v3171_v51 = vadd.f32 %v1975_v42, %v984_v49 }
 0x34f   : > { %v2030_v43 = vadd.f32 %v3170_v41, %v2481_v40 }
 0x350   : > { %v2029_v44 = vadd.f32 %v3171_v51, %v2481_v40  ;;  %v2967_v45 = vpop.f32.mrb[2].mxu1 }
 0x351   : > { %v3172_v47 = vadd.f32 %v2967_v45, %v2807_v58  ;;  %v1985_v48 = vpop.f32.mrb[3].mxu1  ;;  %v2038_v54 = vmax.f32 %v2030_v43, 0.0 }
 0x352   : > { %v2037_v52 = vmax.f32 %v2029_v44, 0.0  ;;  %v3173_v53 = vadd.f32 %v1985_v48, %v994_v22 }
 0x353   : > { %v2032_v59 = vadd.f32 %v3172_v47, %v2481_v40 }
 0x354   : > { %v2031_v60 = vadd.f32 %v3173_v53, %v2481_v40  ;;  %v2970_v62 = vpop.f32.mrb[4].mxu1  ;;  %2982 = vmatprep.mubr.msk.f32.mxu0 %vm901_vm2, %v2037_v52 }
 0x355   : > { %v3174_v55 = vadd.f32 %v2970_v62, %v2810_v61  ;;  %v1995_v1 = vpop.f32.mrb[5].mxu1  ;;  %2983 = vmatmul.mubr.msk.f32.vlgmr.msra.gmra.mrb[20].mxu0 %vm901_vm2, %v2038_v54  ;;  %v2040_v6 = vmax.f32 %v2032_v59, 0.0 }
 0x356   : > { %v2039_v0 = vmax.f32 %v2031_v60, 0.0  ;;  %v3175_v5 = vadd.f32 %v1995_v1, %v1004_v35 }
 0x357   : > { %v2034_v7 = vadd.f32 %v3174_v55, %v2481_v40 }
 0x358   : > { %v2033_v11 = vadd.f32 %v3175_v5, %v2481_v40  ;;  %v2973_v13 = vpop.f32.mrb[6].mxu1  ;;  %2985 = vmatprep.mubr.msk.f32.mxu0 %vm901_vm2, %v2039_v0 }
 0x359   : > { %v3176_v56 = vadd.f32 %v2973_v13, %v2813_v36  ;;  %v2005_v57 = vpop.f32.mrb[7].mxu1  ;;  %2986 = vmatmul.mubr.msk.f32.gmra.mrb[22].mxu0 %vm901_vm2, %v2040_v6  ;;  %v2042_v18 = vmax.f32 %v2034_v7, 0.0 }
 0x35a   : > { %v2041_v14 = vmax.f32 %v2033_v11, 0.0  ;;  %v3177_v17 = vadd.f32 %v2005_v57, %v1014_v38 }
 0x35b   : > { %v2036_v19 = vadd.f32 %v3176_v56, %v2481_v40 }
 0x35c   : > { %v2035_v2 = vadd.f32 %v3177_v17, %v2481_v40  ;;  %2988 = vmatprep.mubr.msk.f32.mxu0 %vm901_vm2, %v2041_v14 }
 0x35d   : > { %2989 = vmatmul.mubr.msk.f32.gmra.mrb[24].mxu0 %vm901_vm2, %v2042_v18  ;;  %v2044_v21 = vmax.f32 %v2036_v19, 0.0 }
 0x35e   : > { %v2043_v20 = vmax.f32 %v2035_v2, 0.0 }
 0x360   : > { %2991 = vmatprep.mubr.msk.f32.mxu0 %vm901_vm2, %v2043_v20 }
 0x361   : > { %2992 = vmatmul.mubr.msk.f32.gmra.mrb[26].mxu0 %vm901_vm2, %v2044_v21 }
 0x428   : > { %v2984_v24 = vpop.f32.mrb[20].mxu0 }
 0x429   : > { %v2152_v32 = vadd.f32 %v2984_v24, %v2482_v23  ;;  %v2146_v33 = vpop.f32.mrb[21].mxu0 }
 0x42a   : > { %v2147_v12 = vadd.f32 %v2482_v23, %v2146_v33 }
 0x42b   : > { %v2186_v50 = vadd.f32 %v2152_v32, %v4185_v25 }
 0x42c   : > { %v2185_v63 = vadd.f32 %v2147_v12, %v4140_v9  ;;  %v2987_v3 = vpop.f32.mrb[22].mxu0 }
 0x42d   : > { %v2194_v4 = vmax.f32 %v2186_v50, 0.0  ;;  %v2162_v34 = vadd.f32 %v2987_v3, %v2482_v23  ;;  %v2156_v15 = vpop.f32.mrb[23].mxu0 }
 0x42e   : > { %v2193_v8 = vmax.f32 %v2185_v63, 0.0  ;;  %v2157_v10 = vadd.f32 %v2482_v23, %v2156_v15 }
 0x42f   : > { %2202 = vst [vmem:[%s4541_s17 + $0x8] sm:$0xff] %v2194_v4  ;;  %v2188_v37 = vadd.f32 %v2162_v34, %v4195_v27 }
 0x430   : > { %2201 = vst [vmem:[%s4541_s17] sm:$0xff] %v2193_v8  ;;  %v2187_v9 = vadd.f32 %v2157_v10, %v4189_v26  ;;  %v2990_v25 = vpop.f32.mrb[24].mxu0 }
 0x431   : > { %v2196_v16 = vmax.f32 %v2188_v37, 0.0  ;;  %v2172_v46 = vadd.f32 %v2990_v25, %v2482_v23  ;;  %v2166_v49 = vpop.f32.mrb[25].mxu0 }
 0x432   : > { %v2195_v58 = vmax.f32 %v2187_v9, 0.0  ;;  %v2167_v22 = vadd.f32 %v2482_v23, %v2166_v49 }
 0x433   : > { %2204 = vst [vmem:[%s4541_s17 + $0x18] sm:$0xff] %v2196_v16  ;;  %v2190_v61 = vadd.f32 %v2172_v46, %v4205_v29 }
 0x434   : > { %2203 = vst [vmem:[%s4541_s17 + $0x10] sm:$0xff] %v2195_v58  ;;  %v2189_v27 = vadd.f32 %v2167_v22, %v4199_v28  ;;  %v2993_v35 = vpop.f32.mrb[26].mxu0 }
 0x435   : > { %v2198_v26 = vmax.f32 %v2190_v61, 0.0  ;;  %v2182_v36 = vadd.f32 %v2993_v35, %v2482_v23  ;;  %v2176_v38 = vpop.f32.mrb[27].mxu0 }
 0x436   : > { %v2197_v39 = vmax.f32 %v2189_v27, 0.0  ;;  %v2177_v40 = vadd.f32 %v2482_v23, %v2176_v38 }
 0x437   : > { %2206 = vst [vmem:[%s4541_s17 + $0x28] sm:$0xff] %v2198_v26  ;;  %v2192_v41 = vadd.f32 %v2182_v36, %v4215_v31 }
 0x438   : > { %2205 = vst [vmem:[%s4541_s17 + $0x20] sm:$0xff] %v2197_v39  ;;  %v2191_v28 = vadd.f32 %v2177_v40, %v4209_v30 }
 0x439   : > { %v2200_v29 = vmax.f32 %v2192_v41, 0.0 }
 0x43a   : > { %v2199_v42 = vmax.f32 %v2191_v28, 0.0 }
 0x43b   : > { %2208 = vst [vmem:[%s4541_s17 + $0x38] sm:$0xff] %v2200_v29 }
 0x43c   : > { %2207 = vst [vmem:[%s4541_s17 + $0x30] sm:$0xff] %v2199_v42 }
 0x43d   : > { %3516 = shalt.err (!%p3513_p0)
}
 0x43e   : > { %s3517_s10 = scalar_lea.hbm %s4563_s27, 1024  ;;  %s3521_s19 = scalar_lea.hbm %s4756_s9, 8192 }
 0x43f   : > { %p3518_p9 = scmp.ne.s32.totalorder %s4563_s27, %s3517_s10  ;;  %p3522_p10 = scmp.lt.u32.totalorder %s4563_s27, %s4756_s9 }
 0x440   : > { %p3523_p7 = scmp.lt.u32.totalorder %s3521_s19, %s3517_s10  ;;  %p3525_p13 = scmp.lt.u32.totalorder %s3517_s10, %s4563_s27 }
 0x441   : > { %p3519_p5 = pnand %p3518_p9, %p4757_p12 }
 0x442   : > { %p3524_p1 = por %p3523_p7, %p3522_p10 }
 0x443   : > { %p3520_p4 = pneg %p3519_p5 }
 0x444   : > { %p3526_p8 = por %p3525_p13, %p3524_p1 }
 0x446   : > { %p3527_p11 = pnand %p3526_p8, %p3520_p4 }
 0x448   : > { %3530 = shalt.err (!%p3527_p11)
}
 0x449   : > { %s3670_s18 = smov 128   ;;  %s3671_s12 = smov 8  }
 0x44a   : > { %3244 = dma.vmem_to_hbm [thread:$0]  (%p4757_p12), %s4556_s5, 1024, %s4563_s27, %s2210_s2, %s3670_s18, %s3670_s18, %s3671_s12  }
 0x44b PF: > { %s4758_s1 = sld [smem:[#allocation31_spill]]  ;;  %p3267_p6 = scmp.ge.s32.totalorder %s3661_s22, 2 }
 0x44c   : > { %s2241_s23 = sand.u32 1, %s3633_s15  }
 0x44d   : > { %s2242_s11 = scalar_lea.sflag [#allocation4], %s2241_s23 }
 0x451   : > { %p4759_p2 = scmp.ne.s32.totalorder %s4758_s1, 0 }
 0x453   : > { %p3261_p3 = pnand %p3267_p6, %p4759_p2 }
 0x455   : > { %3604 = dma.done.wait (!%p3261_p3), %s2242_s11, 1024  }
 0x456   : > { %3606 = vsyncadd (!%p3261_p3), %s2242_s11, 4294966272  ;;  %s29_s22 = sadd.s32 1, %s3661_s22   ;;  %s4761_s30 = sld [smem:[#allocation17_spill]] }
 0x457   : > { %p4596_p0 = scmp.ge.s32.totalorder %s29_s22, 10   ;;  %s4762_s10 = sld [smem:[#allocation18_spill]] }
 0x458   : > { %s4763_s28 = sld [smem:[#allocation19_spill]]  ;;  %s4764_s14 = sld [smem:[#allocation29_spill]] }
 0x459   : > { %s4765_s29 = sld [smem:[#allocation20_spill]]  ;;  %s4766_s17 = sld [smem:[#allocation30_spill]] }
 0x45a   : > { %s4767_s18 = sld [smem:[#allocation23_spill]]  ;;  %s4768_s19 = sld [smem:[#allocation24_spill]] }
 0x45b   : > { %s4769_s20 = sld [smem:[#allocation25_spill]]  ;;  %s4770_s5 = sld [smem:[#allocation26_spill]] }
 0x45c   : > { %s4772_s11 = smov %s4793_s24  ;;  %s4773_s12 = smov %s3625_s13 }
 0x45d   : > { %s4775_s15 = smov %s3637_s16  ;;  %28 = sbr.rel (!%p4596_p0) target bundleno = 24 (0x18), region = 137 }
 0x45e   : > { %s4774_s13 = smov %s4763_s28 }
 0x45f   : > { %s4776_s16 = smov %s4765_s29 }
 0x461   : > { %s4777_s21 = smov %s4770_s5 }
 0x464   :  { %2247 = vsyncpa [#allocation3], 1 }
 0x465   :  { %2249 = vsyncpa [#allocation3 + $0x1], 1 }
 0x466   :  { %2250 = vsyncpa [#allocation6], 1 }
 0x467   :  { %2252 = vsyncpa [#allocation6 + $0x1], 1 }
 0x468   :  { %2253 = vsyncpa [#allocation9], 1 }
 0x469   :  { %2254 = vsyncpa [#allocation4], 1 }
 0x46a   :  { %2256 = vsyncpa [#allocation4 + $0x1], 1 }

// kernel: tpu_custom_call.1
= control target key start
LH: loop header
LB: loop body
LE: loop exit
PB: predicated region body
PF: predicated region fallthrough
CT: control target
= control target key end

     0   :  { %s4643_s0 = inlined_call_operand.hbm [shape: f32[2,16,16,128], index: 0, kind: input, shape index: {}]   ;;  %s4644_s1 = inlined_call_operand.hbm [shape: f32[2,16,16,128], index: 1, kind: input, shape index: {}]   ;;  %s4645_s2 = inlined_call_operand.hbm [shape: f32[2,16,16,128], index: 2, kind: input, shape index: {}]   ;;  %s4646_s3 = inlined_call_operand.vmem [shape: f32[128,32], index: 3, kind: input, shape index: {}]   ;;  %s4647_s4 = inlined_call_operand.vmem [shape: f32[1,32], index: 4, kind: input, shape index: {}]   ;;  %s4648_s5 = inlined_call_operand.hbm [shape: f32[9,32,32], index: 5, kind: input, shape index: {}]   ;;  %s4649_s6 = inlined_call_operand.vmem [shape: f32[1,32], index: 6, kind: input, shape index: {}]   ;;  %s4650_s7 = inlined_call_operand.vmem [shape: f32[32,128], index: 7, kind: input, shape index: {}]   ;;  %s4651_s8 = inlined_call_operand.vmem [shape: f32[1,128], index: 8, kind: input, shape index: {}]   ;;  %s4652_s9 = inlined_call_operand.hbm [shape: f32[2,16,16,128], index: 9, kind: output, shape index: {}]  }
   0x1   :  { %4681 = sst [smem:[#allocation32_spill]] %s4643_s0 }
   0x2   :  { %4682 = sst [smem:[#allocation33_spill]] %s4644_s1 }
   0x3   :  { %4683 = sst [smem:[#allocation34_spill]] %s4645_s2 }
   0x4   :  { %4684 = sst [smem:[#allocation35_spill]] %s4646_s3 }
   0x5   :  { %4685 = sst [smem:[#allocation36_spill]] %s4647_s4 }
   0x6   :  { %4686 = sst [smem:[#allocation37_spill]] %s4648_s5 }
   0x7   :  { %4687 = sst [smem:[#allocation38_spill]] %s4649_s6 }
   0x8   :  { %4688 = sst [smem:[#allocation39_spill]] %s4650_s7 }
   0x9   :  { %4689 = sst [smem:[#allocation40_spill]] %s4651_s8 }
   0xa   :  { %4690 = sst [smem:[#allocation41_spill]] %s4652_s9 }
   0xb   :  { %14 = vsyncpa [#allocation3], 0 }
   0xc   :  { %16 = vsyncpa [#allocation3 + $0x1], 0 }
   0xd   :  { %17 = vsyncpa [#allocation6], 0 }
   0xe   :  { %19 = vsyncpa [#allocation6 + $0x1], 0 }
   0xf   :  { %20 = vsyncpa [#allocation9], 0 }
  0x10   :  { %21 = vsyncpa [#allocation4], 0 }
  0x11   :  { %23 = vsyncpa [#allocation4 + $0x1], 0  ;;  %s3722_s30 = smov 0   ;;  %s3724_s10 = smov 0  }
  0x12   :  { %s3726_s11 = smov 0   ;;  %s3728_s12 = smov 0  }
  0x13   :  { %s3730_s13 = smov 0   ;;  %s3732_s14 = smov 0  }
  0x14   :  { %s3734_s15 = smov 0   ;;  %s3736_s16 = smov 0  }
  0x15   :  { %s3738_s17 = smov 0   ;;  %s3740_s18 = smov 0  }
  0x16   :  { %s3742_s19 = smov 0   ;;  %s3744_s20 = smov 0  }
  0x17   :  { %s3746_s21 = smov 0   ;;  %s3748_s22 = smov 0  }
  0x18 LB: > { %4691 = sst [smem:[#allocation16_spill]] %s3609_s30  ;;  %s38_s23 = sadd.s32 1, %s3653_s20  ;;  %s3661_s22 = sphi %s3748_s22, %s29_s22   ;;  %s3657_s21 = sphi %s3746_s21, %s4777_s21   ;;  %s3653_s20 = sphi %s3744_s20, %s4769_s20   ;;  %s3649_s19 = sphi %s3742_s19, %s4768_s19   ;;  %s3645_s18 = sphi %s3740_s18, %s4767_s18   ;;  %s3641_s17 = sphi %s3738_s17, %s4766_s17   ;;  %s3637_s16 = sphi %s3736_s16, %s4776_s16   ;;  %s3633_s15 = sphi %s3734_s15, %s4775_s15   ;;  %s3629_s14 = sphi %s3732_s14, %s4764_s14   ;;  %s3625_s13 = sphi %s3730_s13, %s4774_s13   ;;  %s3621_s12 = sphi %s3728_s12, %s4773_s12   ;;  %s3617_s11 = sphi %s3726_s11, %s4772_s11   ;;  %s3613_s10 = sphi %s3724_s10, %s4762_s10   ;;  %s3609_s30 = sphi %s3722_s30, %s4761_s30  }
  0x19   : > { %4692 = sst [smem:[#allocation17_spill]] %s3613_s10  ;;  %s41_s24 = sadd.s32 1, %s3657_s21 }
  0x1a   : > { %4693 = sst [smem:[#allocation18_spill]] %s3617_s11  ;;  %p39_p0 = scmp.ge.s32.totalorder %s38_s23, 4 }
  0x1b   : > { %4694 = sst [smem:[#allocation19_spill]] %s3629_s14  ;;  %p4666_p1 = scmp.eq.s32.totalorder %s3661_s22, 0 }
  0x1c   : > { %4695 = sst [smem:[#allocation20_spill]] %s3641_s17  ;;  %s2377_s25 = sshll.u32 %s3653_s20, 2 }
  0x1d   : > { %4696 = sst [smem:[#allocation21_spill]] %s3645_s18  ;;  %s86_s26 = sadd.s32 1, %s3629_s14 }
  0x1e   : > { %4697 = sst [smem:[#allocation22_spill]] %s3649_s19  ;;  %s4779_s23 = smov (%p39_p0, %s38_s23), 0 }
  0x1f   : > { %4698 = sst [smem:[#allocation23_spill]] %s3653_s20  ;;  %s4781_s24 = smov (!%p39_p0, %s41_s24), %s3657_s21 }
  0x20   : > { %4699 = sst [smem:[#allocation24_spill]] %s3657_s21  ;;  %s46_s27 = ssub.s32 %s3653_s20, %s4779_s23 }
  0x21   : > { %4700 = sst [smem:[#allocation25_spill]] %s4779_s23  ;;  %s2378_s28 = sadd.s32 4294967295, %s2377_s25 }
  0x22   : > { %p43_p2 = scmp.ge.s32.totalorder %s4781_s24, 2  ;;  %p75_p3 = scmp.gt.s32.totalorder %s2378_s28, 0 }
  0x23   : > { %s2379_s29 = sshll.u32 %s4779_s23, 2  ;;  %p93_p4 = scmp.ne.s32.totalorder %s3629_s14, %s3625_s13 }
  0x24   : > { %s4783_s24 = smov (%p43_p2, %s4781_s24), 0  ;;  %s4785_s28 = smov (!%p75_p3, %s2378_s28), 0 }
  0x25   : > { %4701 = sst [smem:[#allocation26_spill]] %s4783_s24  ;;  %s3809_s9 = ssub.s32 %s3657_s21, %s4783_s24 }
  0x26   : > { %4702 = sst [smem:[#allocation27_spill]] %s3809_s9  ;;  %s2380_s19 = sadd.s32 4294967295, %s2379_s29 }
  0x27   : > { %s3812_s8 = sor.u32 %s46_s27, %s3809_s9  ;;  %p79_p5 = scmp.gt.s32.totalorder %s2380_s19, 0 }
  0x28   : > { %p3817_p7 = por %p93_p4, %p4666_p1  ;;  %p99_p8 = scmp.ne.s32.totalorder %s3625_s13, %s3621_s12 }
  0x29   : > { %s4787_s19 = smov (!%p79_p5, %s2380_s19), 0  ;;  %s3823_s24 = sadd.s32 4, %s2377_s25 }
  0x2a   : > { %4704 = sst [smem:[#allocation28_spill]] %s3823_s24  ;;  %s82_s6 = ssub.s32 %s4785_s28, %s4787_s19 }
  0x2b   : > { %s83_s7 = sor.u32 %s82_s6, %s3809_s9  ;;  %s3827_s27 = sadd.s32 4, %s2379_s29 }
  0x2c   : > { %p84_p10 = scmp.eq.s32.totalorder %s83_s7, 0  ;;  %p4665_p12 = scmp.lt.s32.totalorder %s3661_s22, 8 }
  0x2d   : > { %s3835_s4 = sshll.u32 %s3657_s21, 5  ;;  %s365_s3 = sand.u32 1, %s3661_s22  }
  0x2e   : > { %s3831_s18 = scalar_select %p84_p10, %s3629_s14, %s86_s26  }
  0x2f   : > { %s367_s25 = sand.u32 1, %s3629_s14   ;;  %s2394_s30 = sshll.u32 %s4785_s28, 1 }
  0x30   : > { %4705 = sst [smem:[#allocation29_spill]] %s3831_s18  ;;  %s2391_s2 = sshll.u32 %s367_s25, 4 }
  0x31   : > { %s379_s19 = sadd.s32 %s2394_s30, %s3835_s4  ;;  %s369_s6 = scalar_lea.vmem [#allocation5], %s2391_s2 }
  0x32   : > { %s2396_s10 = sshll.u32 %s379_s19, 7  ;;  %s382_s29 = sshll.u32 %s369_s6, 4  ;;  %s3845_s29 = int_to_ptr.vmem [resolvable:$true] %s382_s29 }
  0x33   : > { %s4706_s1 = sld [smem:[#allocation33_spill]]  ;;  %p3851_p13 = pnand %p4665_p12, %p3817_p7 }
  0x34   : > { %s3855_s2 = scalar_lea.sflag [#allocation6], %s365_s3 }
  0x35   : > { %p3387_p2 = pneg %p3851_p13 }
  0x39   : > { %s3843_s11 = scalar_lea.hbm %s4706_s1, %s2396_s10  ;;  %s3390_s23 = scalar_lea.hbm %s4706_s1, 8192 }
  0x3a   : > { %s3385_s30 = scalar_lea.hbm %s3843_s11, 256  ;;  %p3391_p5 = scmp.lt.u32.totalorder %s3843_s11, %s4706_s1 }
  0x3b   : > { %p3386_p0 = scmp.ne.s32.totalorder %s3843_s11, %s3385_s30  ;;  %p3392_p7 = scmp.lt.u32.totalorder %s3390_s23, %s3385_s30 }
  0x3c   : > { %p3394_p11 = scmp.lt.u32.totalorder %s3385_s30, %s3843_s11 }
  0x3d   : > { %p3388_p3 = pnand %p3387_p2, %p3386_p0  ;;  %p3393_p10 = por %p3392_p7, %p3391_p5 }
  0x3f   : > { %p3389_p4 = pneg %p3388_p3  ;;  %p3395_p9 = por %p3394_p11, %p3393_p10 }
  0x41   : > { %p3396_p12 = pnand %p3395_p9, %p3389_p4 }
  0x43   : > { %3399 = shalt.err (!%p3396_p12)
}
  0x44   : > { %s3400_s3 = scalar_lea.vmem %s3845_s29, 256  ;;  %s3663_s28 = smov [#allocation5]  }
  0x45   : > { %p3401_p0 = scmp.ne.s32.totalorder %s3845_s29, %s3400_s3  ;;  %s3405_s25 = sshll.u32 %s3663_s28, 4  ;;  %s3406_s25 = int_to_ptr.vmem [resolvable:$false] %s3405_s25 }
  0x46   : > { %s3407_s19 = scalar_lea.vmem %s3406_s25, 512  ;;  %p3408_p6 = scmp.lt.s32.totalorder %s3845_s29, %s3406_s25 }
  0x47   : > { %p3403_p3 = pnand %p3401_p0, %p3387_p2  ;;  %p3409_p5 = scmp.lt.s32.totalorder %s3407_s19, %s3400_s3 }
  0x49   : > { %p3404_p1 = pneg %p3403_p3  ;;  %p3410_p7 = por %p3409_p5, %p3408_p6 }
  0x4b   : > { %p3411_p11 = pnand %p3410_p7, %p3404_p1 }
  0x4d   : > { %3414 = shalt.err (!%p3411_p11)
}
  0x4e   : > { %s4667_s6 = smov 128   ;;  %s4669_s30 = smov 8  }
  0x4f   : > { %3256 = dma.hbm_to_vmem [thread:$0]  (!%p3851_p13), %s3843_s11, 256, %s3845_s29, %s3855_s2, %s4667_s6, %s4667_s6, %s4669_s30  }
  0x50   : > { %s3887_s9 = sadd.s32 4294967295, %s3661_s22   ;;  %p2383_p1 = scmp.ge.s32.totalorder %s3661_s22, 1 }
  0x51   : > { %p4671_p6 = scmp.eq.s32.totalorder %s3887_s9, 0  ;;  %p300_p12 = scmp.lt.s32.totalorder %s3661_s22, 9 }
  0x52   : > { %s3666_s11 = smov [#allocation8]   ;;  %s2376_s12 = sadd.s32 4294967294, %s3661_s22  }
  0x53   : > { %p3898_p2 = por %p99_p8, %p4671_p6  ;;  %p3902_p4 = pnand %p2383_p1, %p300_p12 }
  0x54   : > { %s318_s29 = sshll.u32 %s3666_s11, 4  ;;  %s50_s24 = sadd.s32 1, %s3641_s17  ;;  %s319_s29 = int_to_ptr.vmem [resolvable:$true] %s318_s29 }
  0x55   : > { %s4708_s10 = scalar_select %p3898_p2, 1, 0 }
  0x56   : > { %s4709_s7 = scalar_select %p3902_p4, 1, 0 }
  0x57   : > { %p3246_p13 = pneg %p3902_p4  ;;  %s4711_s5 = sld [smem:[#allocation37_spill]] }
  0x59   : > { %p3910_p10 = pnand %p3246_p13, %p4671_p6 }
  0x5b   : > { %p3417_p0 = pneg %p3910_p10 }
  0x5d   : > { %s3415_s28 = scalar_lea.hbm %s4711_s5, 4608 }
  0x5e   : > { %p3416_p8 = scmp.ne.s32.totalorder %s4711_s5, %s3415_s28  ;;  %p3422_p7 = scmp.lt.u32.totalorder %s3415_s28, %s4711_s5 }
  0x60   : > { %p3418_p3 = pnand %p3417_p0, %p3416_p8 }
  0x62   : > { %p3419_p5 = pneg %p3418_p3 }
  0x64   : > { %p3424_p11 = pnand %p3422_p7, %p3419_p5 }
  0x66   : > { %3427 = shalt.err (!%p3424_p11)
}
  0x67   : > { %s3428_s30 = scalar_lea.vmem %s319_s29, 4608  ;;  %p3436_p9 = scmp.lt.s32.totalorder %s319_s29, %s319_s29 }
  0x68   : > { %p3429_p1 = scmp.ne.s32.totalorder %s319_s29, %s3428_s30  ;;  %p3437_p6 = scmp.lt.s32.totalorder %s3428_s30, %s3428_s30 }
  0x6a   : > { %p3431_p12 = pnand %p3429_p1, %p3417_p0  ;;  %p3438_p2 = por %p3437_p6, %p3436_p9 }
  0x6c   : > { %p3432_p13 = pneg %p3431_p12 }
  0x6e   : > { %p3439_p4 = pnand %p3438_p2, %p3432_p13 }
  0x70   : > { %3442 = shalt.err (!%p3439_p4)
}
  0x71   : > { %s4712_s26 = smov 8   ;;  %s4713_s3 = smov 128  }
  0x72   : > { %3249 = dma.hbm_to_vmem [thread:$0]  (!%p3910_p10), %s4711_s5, 4608, %s319_s29, [#allocation9], %s4713_s3, %s4713_s3, %s4712_s26  }
  0x73   : > { %p4714_p6 = scmp.eq.s32.totalorder %s3812_s8, 0  ;;  %p57_p9 = scmp.ne.s32.totalorder %s3641_s17, %s3637_s16 }
  0x74   : > { %p63_p2 = scmp.ne.s32.totalorder %s3637_s16, %s3633_s15  ;;  %p293_p4 = scmp.eq.s32.totalorder %s2376_s12, 7 }
  0x75   : > { %s3938_s6 = scalar_select %p4714_p6, %s3641_s17, %s50_s24  }
  0x76   : > { %s341_s30 = sand.u32 1, %s3641_s17   ;;  %p4716_p8 = scmp.eq.s32.totalorder %s3661_s22, 0 }
  0x77   : > { %4715 = sst [smem:[#allocation30_spill]] %s3938_s6  ;;  %p4717_p3 = scmp.eq.s32.totalorder %s3887_s9, 0 }
  0x78   : > { %p59_p0 = por %p4716_p8, %p57_p9  ;;  %p4719_p7 = scmp.eq.s32.totalorder %s3887_s9, 7 }
  0x79   : > { %p3949_p5 = por %p4717_p3, %p63_p2  ;;  %p3959_p10 = por %p293_p4, %p63_p2 }
  0x7a   : > { %p3955_p11 = por %p4719_p7, %p57_p9  ;;  %s2386_s29 = sshll.u32 %s341_s30, 6 }
  0x7b   : > { %s4721_s8 = scalar_select %p3959_p10, 1, 0 }
  0x7c   : > { %s4720_s28 = scalar_select %p3955_p11, 1, 0 }
  0x7d   : > { %4722 = sst [smem:[#allocation31_spill]] %s4721_s8  ;;  %s2498_s24 = sshll.u32 %s3653_s20, 3 }
  0x7e   : > { %s352_s12 = sadd.s32 %s2498_s24, %s3835_s4  ;;  %s345_s11 = scalar_lea.vmem [#allocation2], %s2386_s29 }
  0x7f   : > { %s355_s25 = sshll.u32 %s345_s11, 4  ;;  %s2390_s19 = sshll.u32 %s352_s12, 7  ;;  %s3965_s25 = int_to_ptr.vmem [resolvable:$true] %s355_s25 }
  0x80   : > { %s4723_s0 = sld [smem:[#allocation32_spill]]  ;;  %p4724_p1 = scmp.lt.s32.totalorder %s3661_s22, 8 }
  0x81   : > { %s3978_s29 = scalar_lea.sflag [#allocation3], %s341_s30 }
  0x82   : > { %p3974_p12 = pnand %p4724_p1, %p59_p0 }
  0x84   : > { %p3445_p6 = pneg %p3974_p12 }
  0x86   : > { %s3970_s21 = scalar_lea.hbm %s4723_s0, %s2390_s19  ;;  %s3448_s12 = scalar_lea.hbm %s4723_s0, 8192 }
  0x87   : > { %s3443_s24 = scalar_lea.hbm %s3970_s21, 1024  ;;  %p3449_p4 = scmp.lt.u32.totalorder %s3970_s21, %s4723_s0 }
  0x88   : > { %p3444_p13 = scmp.ne.s32.totalorder %s3970_s21, %s3443_s24  ;;  %p3450_p8 = scmp.lt.u32.totalorder %s3448_s12, %s3443_s24 }
  0x89   : > { %p3452_p3 = scmp.lt.u32.totalorder %s3443_s24, %s3970_s21 }
  0x8a   : > { %p3446_p9 = pnand %p3445_p6, %p3444_p13  ;;  %p3451_p0 = por %p3450_p8, %p3449_p4 }
  0x8c   : > { %p3447_p2 = pneg %p3446_p9  ;;  %p3453_p7 = por %p3452_p3, %p3451_p0 }
  0x8e   : > { %p3454_p1 = pnand %p3453_p7, %p3447_p2 }
  0x90   : > { %3457 = shalt.err (!%p3454_p1)
}
  0x91   : > { %s3458_s30 = scalar_lea.vmem %s3965_s25, 1024  ;;  %s3667_s1 = smov [#allocation2]  }
  0x92   : > { %p3459_p13 = scmp.ne.s32.totalorder %s3965_s25, %s3458_s30  ;;  %s3463_s5 = sshll.u32 %s3667_s1, 4  ;;  %s3464_s5 = int_to_ptr.vmem [resolvable:$false] %s3463_s5 }
  0x93   : > { %s3465_s11 = scalar_lea.vmem %s3464_s5, 2048  ;;  %p3466_p11 = scmp.lt.s32.totalorder %s3965_s25, %s3464_s5 }
  0x94   : > { %p3461_p9 = pnand %p3459_p13, %p3445_p6  ;;  %p3467_p4 = scmp.lt.s32.totalorder %s3465_s11, %s3458_s30 }
  0x96   : > { %p3462_p10 = pneg %p3461_p9  ;;  %p3468_p8 = por %p3467_p4, %p3466_p11 }
  0x98   : > { %p3469_p0 = pnand %p3468_p8, %p3462_p10 }
  0x9a   : > { %3472 = shalt.err (!%p3469_p0)
}
  0x9b   : > { %s4726_s24 = sld [smem:[#allocation18_spill]]  ;;  %s4727_s12 = sld [smem:[#allocation28_spill]] }
  0x9c   : > { %s4728_s19 = sld [smem:[#allocation17_spill]]  ;;  %s4729_s1 = sld [smem:[#allocation16_spill]] }
  0x9d   : > { %s4730_s30 = sld [smem:[#allocation27_spill]]  ;;  %p4732_p10 = scmp.lt.s32.totalorder %s3827_s27, 15 }
  0x9e   : > { %3253 = dma.hbm_to_vmem [thread:$0]  (!%p3974_p12), %s3970_s21, 1024, %s3965_s25, %s3978_s29, %s4713_s3, %s4713_s3, %s4712_s26  }
  0x9f   : > { %s4791_s27 = smov (!%p4732_p10, %s3827_s27), 15  ;;  %p4733_p3 = scmp.eq.s32.totalorder %s3661_s22, 0 }
  0xa0   : > { %p4734_p13 = scmp.eq.s32.totalorder %s3887_s9, 0  ;;  %s4736_s14 = sld [smem:[#allocation34_spill]] }
  0xa1   : > { %s122_s6 = sadd.s32 1, %s4726_s24  ;;  %p4731_p11 = scmp.lt.s32.totalorder %s4727_s12, 15 }
  0xa2   : > { %p129_p6 = scmp.ne.s32.totalorder %s4726_s24, %s4728_s19  ;;  %p135_p2 = scmp.ne.s32.totalorder %s4728_s19, %s4729_s1 }
  0xa3   : > { %s4789_s12 = smov (!%p4731_p11, %s4727_s12), 15  ;;  %s394_s11 = sand.u32 1, %s4726_s24  }
  0xa4   : > { %s118_s5 = ssub.s32 %s4789_s12, %s4791_s27  ;;  %p131_p7 = por %p129_p6, %p4733_p3 }
  0xa5   : > { %s119_s0 = sor.u32 %s118_s5, %s4730_s30  ;;  %p4026_p9 = por %p135_p2, %p4734_p13 }
  0xa6   : > { %p120_p1 = scmp.eq.s32.totalorder %s119_s0, 0  ;;  %s2397_s21 = sshll.u32 %s394_s11, 4 }
  0xa7   : > { %s4735_s20 = scalar_select %p4026_p9, 1, 0 }
  0xa8   : > { %s2399_s25 = sshll.u32 %s4789_s12, 1  ;;  %s4793_s24 = smov (!%p120_p1, %s4726_s24), %s122_s6 }
  0xa9   : > { %s406_s29 = sadd.s32 %s2399_s25, %s3835_s4  ;;  %s396_s18 = scalar_lea.vmem [#allocation7], %s2397_s21 }
  0xaa   : > { %s2401_s17 = sshll.u32 %s406_s29, 7  ;;  %s409_s19 = sshll.u32 %s396_s18, 4  ;;  %s4039_s19 = int_to_ptr.vmem [resolvable:$true] %s409_s19 }
  0xab   : > { %s4737_s8 = smov %s4736_s14  ;;  %s4037_s30 = scalar_lea.hbm %s4736_s14, %s2401_s17 }
  0xac   : > { %p4738_p12 = scmp.lt.s32.totalorder %s3661_s22, 8  ;;  %s3473_s4 = scalar_lea.hbm %s4037_s30, 256 }
  0xad   : > { %p3474_p8 = scmp.ne.s32.totalorder %s4037_s30, %s3473_s4  ;;  %s3478_s18 = scalar_lea.hbm %s4737_s8, 8192 }
  0xae   : > { %p4043_p4 = pnand %p4738_p12, %p131_p7  ;;  %p3479_p6 = scmp.lt.u32.totalorder %s4037_s30, %s4737_s8 }
  0xaf   : > { %p3480_p2 = scmp.lt.u32.totalorder %s3478_s18, %s3473_s4  ;;  %p3482_p7 = scmp.lt.u32.totalorder %s3473_s4, %s4037_s30 }
  0xb0   : > { %p3475_p0 = pneg %p4043_p4 }
  0xb1   : > { %p3481_p3 = por %p3480_p2, %p3479_p6 }
  0xb2   : > { %p3476_p11 = pnand %p3475_p0, %p3474_p8 }
  0xb3   : > { %p3483_p1 = por %p3482_p7, %p3481_p3 }
  0xb4   : > { %p3477_p10 = pneg %p3476_p11 }
  0xb6   : > { %p3484_p13 = pnand %p3483_p1, %p3477_p10 }
  0xb8   : > { %3487 = shalt.err (!%p3484_p13)
}
  0xb9   : > { %s3488_s5 = scalar_lea.vmem %s4039_s19, 256  ;;  %s3668_s11 = smov [#allocation7]  }
  0xba   : > { %p3489_p12 = scmp.ne.s32.totalorder %s4039_s19, %s3488_s5  ;;  %s3493_s21 = sshll.u32 %s3668_s11, 4  ;;  %s3494_s21 = int_to_ptr.vmem [resolvable:$false] %s3493_s21 }
  0xbb   : > { %s3495_s25 = scalar_lea.vmem %s3494_s21, 512  ;;  %p3496_p9 = scmp.lt.s32.totalorder %s4039_s19, %s3494_s21 }
  0xbc   : > { %p3491_p8 = pnand %p3489_p12, %p3475_p0  ;;  %p3497_p6 = scmp.lt.s32.totalorder %s3495_s25, %s3488_s5 }
  0xbe   : > { %p3492_p11 = pneg %p3491_p8  ;;  %p3498_p2 = por %p3497_p6, %p3496_p9 }
  0xc0   : > { %p3499_p3 = pnand %p3498_p2, %p3492_p11 }
  0xc2   : > { %3502 = shalt.err (!%p3499_p3)
}
  0xc3   : > { %3259 = dma.hbm_to_vmem [thread:$0]  (!%p4043_p4), %s4037_s30, 256, %s4039_s19, %s3855_s2, %s4713_s3, %s4713_s3, %s4712_s26  }
  0xc4   : > { %p4740_p0 = scmp.ne.s32.totalorder %s4709_s7, 0 }
  0xc5   : > { %s4079_s29 = sand.u32 (!%p4740_p0), 1, %s3637_s16  }
  0xc6   : > { %421 = sbr.rel (%p4740_p0) target bundleno = 1099 (0x44b), region = 56  ;;  %s2403_s1 = sshll.u32 (!%p4740_p0), %s4079_s29, 6 }
  0xc7   : > { %s424_s27 = scalar_lea.sflag (!%p4740_p0), [#allocation3], %s4079_s29  ;;  %s4085_s0 = scalar_lea.vmem (!%p4740_p0), [#allocation2], %s2403_s1 }
  0xcd   : > { %3588 = dma.done.wait (%p3949_p5), %s424_s27, 1024  }
  0xce   : > { %3590 = vsyncadd (%p3949_p5), %s424_s27, 4294966272  ;;  %s432_s2 = sand.u32 1, %s3887_s9   ;;  %s434_s7 = sand.u32 1, %s3625_s13  }
  0xcf   : > { %s4093_s26 = sshll.u32 %s434_s7, 4  ;;  %s433_s3 = scalar_lea.sflag [#allocation6], %s432_s2 }
  0xd0   : > { %s436_s19 = scalar_lea.vmem [#allocation5], %s4093_s26  ;;  %p4741_p9 = scmp.ne.s32.totalorder %s4708_s10, 0 }
  0xd2   : > { %3592 = dma.done.wait (%p4741_p9), %s433_s3, 256  }
  0xd3   : > { %3594 = vsyncadd (%p4741_p9), %s433_s3, 4294967040  ;;  %s4742_s30 = sld [smem:[#allocation17_spill]]  ;;  %p4743_p5 = scmp.ne.s32.totalorder %s4735_s20, 0 }
  0xd9   : > { %s443_s4 = sand.u32 1, %s4742_s30  }
  0xda   : > { %s4101_s23 = sshll.u32 %s443_s4, 4 }
  0xdb   : > { %s445_s14 = scalar_lea.vmem [#allocation7], %s4101_s23 }
  0xdc   : > { %3596 = dma.done.wait (%p4743_p5), %s433_s3, 256  }
  0xdd   : > { %3598 = vsyncadd (%p4743_p5), %s433_s3, 4294967040  ;;  %p4744_p4 = scmp.eq.s32.totalorder %s3887_s9, 0 }
  0xdf   : > { %3600 = dma.done.wait (%p4744_p4), [#allocation9], 4608   ;;  %p4745_p10 = pmov %p4744_p4 }
  0xe0   : > { %s4746_s18 = sld [smem:[#allocation35_spill]]  ;;  %v4140_v9 = vld [vmem:[%s4085_s0] sm:$0xff]  ;;  %v4185_v25 = vld [vmem:[%s4085_s0 + $0x8] sm:$0xff]  ;;  %v4189_v26 = vld [vmem:[%s4085_s0 + $0x10] sm:$0xff]  ;;  %vm830_vm0 = vcmask 1040384   ;;  %vm861_vm1 = vcmask 1046528  }
  0xe1   : > { %3602 = vsyncadd (%p4745_p10), [#allocation9], 4294962688  ;;  %2712 = vmatprep.mubr.f32.mxu0 %v4140_v9  ;;  %v4195_v27 = vld [vmem:[%s4085_s0 + $0x18] sm:$0xff]  ;;  %v4199_v28 = vld [vmem:[%s4085_s0 + $0x20] sm:$0xff]  ;;  %s4749_s23 = sld [smem:[#allocation21_spill]]  ;;  %vm901_vm2 = vcmask 261120  }
  0xe2   : > { %v4205_v29 = vld [vmem:[%s4085_s0 + $0x28] sm:$0xff]  ;;  %v4209_v30 = vld [vmem:[%s4085_s0 + $0x30] sm:$0xff]  ;;  %v4215_v31 = vld [vmem:[%s4085_s0 + $0x38] sm:$0xff]  ;;  %s4750_s21 = sld [smem:[#allocation39_spill]]  ;;  %s4752_s10 = sld [smem:[#allocation38_spill]] }
  0xe3   : > { %v654_v32 = vld [vmem:[%s436_s19] sm:$0xff]  ;;  %v655_v33 = vld [vmem:[%s436_s19 + $0x8] sm:$0xff]  ;;  %s4748_s19 = sld [smem:[#allocation36_spill]]  ;;  %s4755_s20 = sld [smem:[#allocation41_spill]] }
  0xe4   : > { %v736_v34 = vld [vmem:[%s445_s14] sm:$0xff]  ;;  %v737_v35 = vld [vmem:[%s445_s14 + $0x8] sm:$0xff]  ;;  %s2210_s2 = scalar_lea.sflag [#allocation4], %s4079_s29  ;;  %p4757_p12 = scmp.ne.s32.totalorder %s4720_s28, 0 }
  0xe5   : > { %v897_v36 = vld [vmem:[#allocation8 + $0x20] sm:$0xff]  ;;  %v898_v37 = vld [vmem:[#allocation8 + $0x28] sm:$0xff]  ;;  %v899_v42 = vld [vmem:[#allocation8 + $0x30] sm:$0xff]  ;;  %s3669_s3 = smov [#allocation10]  }
  0xe6   : > { %s4747_s6 = smov %s4746_s18  ;;  %v504_v0 = vld [vmem:[%s4746_s18] sm:$0xff]  ;;  %v3090_v38 = vpack.c.bf16 %v898_v37, %v897_v36  ;;  %v893_v40 = vld [vmem:[#allocation8 + $0x8] sm:$0xff]  ;;  %v900_v43 = vld [vmem:[#allocation8 + $0x38] sm:$0xff]  ;;  %s3507_s30 = sshll.u32 %s3669_s3, 4  ;;  %s3508_s30 = int_to_ptr.vmem [resolvable:$false] %s3507_s30 }
  0xe7   : > { %v505_v1 = vld [vmem:[%s4747_s6 + $0x8] sm:$0xff]  ;;  %v506_v2 = vld [vmem:[%s4747_s6 + $0x10] sm:$0xff]  ;;  %v507_v4 = vld [vmem:[%s4747_s6 + $0x18] sm:$0xff]  ;;  %v3094_v44 = vpack.c.bf16 %v900_v43, %v899_v42  ;;  %p529_p7 = scmp.gt.s32.totalorder %s4749_s23, 0  ;;  %p532_p1 = scmp.lt.s32.totalorder %s4749_s23, 3 }
  0xe8   : > { %v4121_v3 = vpack.c.bf16 %v505_v1, %v504_v0  ;;  %v4126_v5 = vpack.c.bf16 %v507_v4, %v506_v2  ;;  %v508_v6 = vld [vmem:[%s4747_s6 + $0x20] sm:$0xff]  ;;  %v509_v7 = vld [vmem:[%s4747_s6 + $0x28] sm:$0xff]  ;;  %v510_v10 = vld [vmem:[%s4747_s6 + $0x30] sm:$0xff]  ;;  %s4751_s25 = smov %s4750_s21  ;;  %s3509_s4 = scalar_lea.vmem %s3508_s30, 2048 }
  0xe9   : > { %v4137_v8 = vpack.c.bf16 %v509_v7, %v508_v6  ;;  %v511_v11 = vld [vmem:[%s4747_s6 + $0x38] sm:$0xff]  ;;  %v512_v13 = vld [vmem:[%s4747_s6 + $0x40] sm:$0xff]  ;;  %v513_v14 = vld [vmem:[%s4747_s6 + $0x48] sm:$0xff]  ;;  %s530_s14 = scalar_select %p529_p7, 1, 0 }
  0xea   : > { %2995 = vmatprep.subr.bf16.mxu0 %v4121_v3  ;;  %v4151_v12 = vpack.c.bf16 %v511_v11, %v510_v10  ;;  %v4161_v15 = vpack.c.bf16 %v513_v14, %v512_v13  ;;  %v514_v16 = vld [vmem:[%s4747_s6 + $0x50] sm:$0xff]  ;;  %v515_v17 = vld [vmem:[%s4747_s6 + $0x58] sm:$0xff]  ;;  %v516_v19 = vld [vmem:[%s4747_s6 + $0x60] sm:$0xff]  ;;  %s533_s18 = scalar_select %p532_p1, 1, 0 }
  0xeb   : > { %2997 = vmatpush3.bf16.msra.mxu0 %v4121_v3  ;;  %v3014_v18 = vpack.c.bf16 %v515_v17, %v514_v16  ;;  %v517_v20 = vld [vmem:[%s4747_s6 + $0x68] sm:$0xff]  ;;  %v518_v22 = vld [vmem:[%s4747_s6 + $0x70] sm:$0xff]  ;;  %v519_v23 = vld [vmem:[%s4747_s6 + $0x78] sm:$0xff]  ;;  %s531_s17 = scvt.s32.f32 %s530_s14  ;;  %s4754_s14 = sld [smem:[#allocation22_spill]] }
  0xec   : > { %2999 = vmatprep.subr.bf16.mxu0 %v4126_v5  ;;  %v3018_v21 = vpack.c.bf16 %v517_v20, %v516_v19  ;;  %v3022_v24 = vpack.c.bf16 %v519_v23, %v518_v22  ;;  %v892_v39 = vld [vmem:[#allocation8] sm:$0xff]  ;;  %v894_v45 = vld [vmem:[#allocation8 + $0x10] sm:$0xff]  ;;  %v895_v46 = vld [vmem:[#allocation8 + $0x18] sm:$0xff]  ;;  %s534_s12 = scvt.s32.f32 %s533_s18  ;;  %s2499_s18 = sshll.u32 %s4749_s23, 3 }
  0xed   : > { %v3098_v41 = vpack.c.bf16 %v893_v40, %v892_v39  ;;  %v3102_v47 = vpack.c.bf16 %v895_v46, %v894_v45  ;;  %v1149_v48 = vld [vmem:[#allocation8 + $0x40] sm:$0xff]  ;;  %v1150_v49 = vld [vmem:[#allocation8 + $0x48] sm:$0xff]  ;;  %v733_v20 = vstv %s531_s17  ;;  %v1152_v42 = vld [vmem:[#allocation8 + $0x58] sm:$0xff]  ;;  %s4541_s17 = scalar_lea.vmem [#allocation10], %s2403_s1  ;;  %s4756_s9 = smov %s4755_s20 }
  0xee   : > { %v4240_v50 = vpack.c.bf16 %v1150_v49, %v1149_v48  ;;  %v4246_v51 = vld [vmem:[%s4748_s19] ss:$0 sm:$0xff]  ;;  %s4753_s19 = sld [smem:[#allocation40_spill]]  ;;  %s2226_s5 = sshll.u32 %s4541_s17, 4  ;;  %s4556_s5 = int_to_ptr.vmem [resolvable:$true] %s2226_s5 }
  0xef   : > { %3001 = vmatpush3.bf16.msra.mxu0 %v4126_v5  ;;  %3099 = vmatprep.subr.bf16.mxu1 %v3098_v41  ;;  %s3503_s7 = scalar_lea.vmem %s4556_s5, 1024  ;;  %p3510_p6 = scmp.lt.s32.totalorder %s4556_s5, %s3508_s30 }
  0xf0   : > { %3003 = vmatprep.subr.bf16.mxu0 %v4137_v8  ;;  %3101 = vmatpush3.bf16.msra.mxu1 %v3098_v41  ;;  %v1151_v41 = vld [vmem:[#allocation8 + $0x50] sm:$0xff]  ;;  %p3504_p13 = scmp.ne.s32.totalorder %s4556_s5, %s3503_s7  ;;  %p3511_p2 = scmp.lt.s32.totalorder %s3509_s4, %s3503_s7 }
  0xf1   : > { %3103 = vmatprep.subr.bf16.mxu1 %v3102_v47  ;;  %v3110_v48 = vpack.c.bf16 %v1152_v42, %v1151_v41 }
  0xf2   : > { %p3505_p8 = pnand %p3504_p13, %p4757_p12  ;;  %p3512_p3 = por %p3511_p2, %p3510_p6 }
  0xf3   : > { %3005 = vmatpush3.bf16.msra.mxu0 %v4137_v8 }
  0xf4   : > { %3007 = vmatprep.subr.bf16.mxu0 %v4151_v12  ;;  %3105 = vmatpush3.bf16.msra.mxu1 %v3102_v47  ;;  %p3506_p11 = pneg %p3505_p8 }
  0xf5   : > { %3107 = vmatprep.subr.bf16.mxu1 %v4240_v50 }
  0xf6   : > { %p3513_p0 = pnand %p3512_p3, %p3506_p11 }
  0xf7   : > { %3009 = vmatpush3.bf16.msra.mxu0 %v4151_v12 }
  0xf8   : > { %3011 = vmatprep.subr.bf16.mxu0 %v4161_v15 }
  0xfb   : > { %3013 = vmatpush3.bf16.msra.mxu0 %v4161_v15 }
  0xfc   : > { %3015 = vmatprep.subr.bf16.mxu0 %v3014_v18 }
  0xff   : > { %3017 = vmatpush3.bf16.msra.mxu0 %v3014_v18 }
 0x100   : > { %3019 = vmatprep.subr.bf16.mxu0 %v3018_v21 }
 0x103   : > { %3021 = vmatpush3.bf16.msra.mxu0 %v3018_v21 }
 0x104   : > { %3023 = vmatprep.subr.bf16.mxu0 %v3022_v24 }
 0x107   : > { %3025 = vmatpush3.bf16.msra.mxu0 %v3022_v24 }
 0x108   : > { %3027 = vmatprep.subr.bf16.mxu0 %v4121_v3 }
 0x10a   : > { %2713 = vmatmul.mubr.f32.vlgmr.msra.gmra.mrb[0].mxu0 %v4185_v25 }
 0x10b   : > { %3029 = vmatpush3.bf16.msra.mxu0 %v4121_v3  ;;  %2715 = vmatprep.mubr.f32.mxu0 %v4189_v26 }
 0x10c   : > { %3031 = vmatprep.subr.bf16.mxu0 %v4126_v5 }
 0x10e   : > { %2716 = vmatmul.mubr.f32.gmra.mrb[2].mxu0 %v4195_v27 }
 0x10f   : > { %3033 = vmatpush3.bf16.msra.mxu0 %v4126_v5  ;;  %2718 = vmatprep.mubr.f32.mxu0 %v4199_v28 }
 0x110   : > { %3035 = vmatprep.subr.bf16.mxu0 %v4137_v8 }
 0x112   : > { %2719 = vmatmul.mubr.f32.gmra.mrb[4].mxu0 %v4205_v29 }
 0x113   : > { %3037 = vmatpush3.bf16.msra.mxu0 %v4137_v8  ;;  %2721 = vmatprep.mubr.f32.mxu0 %v4209_v30 }
 0x114   : > { %3039 = vmatprep.subr.bf16.mxu0 %v4151_v12 }
 0x116   : > { %2722 = vmatmul.mubr.f32.gmra.mrb[6].mxu0 %v4215_v31 }
 0x117   : > { %3041 = vmatpush3.bf16.msra.mxu0 %v4151_v12  ;;  %2756 = vmatprep.mubr.f32.mxu0 %v654_v32 }
 0x118   : > { %3043 = vmatprep.subr.bf16.mxu0 %v4161_v15 }
 0x11b   : > { %3045 = vmatpush3.bf16.msra.mxu0 %v4161_v15 }
 0x11c   : > { %3047 = vmatprep.subr.bf16.mxu0 %v3014_v18 }
 0x11f   : > { %3049 = vmatpush3.bf16.msra.mxu0 %v3014_v18 }
 0x120   : > { %3051 = vmatprep.subr.bf16.mxu0 %v3018_v21 }
 0x123   : > { %3053 = vmatpush3.bf16.msra.mxu0 %v3018_v21 }
 0x124   : > { %3055 = vmatprep.subr.bf16.mxu0 %v3022_v24 }
 0x127   : > { %3057 = vmatpush3.bf16.msra.mxu0 %v3022_v24 }
 0x128   : > { %3059 = vmatprep.subr.bf16.mxu0 %v4121_v3 }
 0x12a   : > { %2757 = vmatmul.mubr.f32.vlgmr.msra.gmra.mrb[8].mxu0 %v655_v33 }
 0x12b   : > { %3061 = vmatpush3.bf16.msra.mxu0 %v4121_v3  ;;  %2791 = vmatprep.mubr.f32.mxu0 %v736_v34 }
 0x12c   : > { %3063 = vmatprep.subr.bf16.mxu0 %v4126_v5 }
 0x12f   : > { %3065 = vmatpush3.bf16.msra.mxu0 %v4126_v5 }
 0x130   : > { %3067 = vmatprep.subr.bf16.mxu0 %v4137_v8 }
 0x133   : > { %3069 = vmatpush3.bf16.msra.mxu0 %v4137_v8 }
 0x134   : > { %3071 = vmatprep.subr.bf16.mxu0 %v4151_v12 }
 0x137   : > { %3073 = vmatpush3.bf16.msra.mxu0 %v4151_v12 }
 0x138   : > { %3075 = vmatprep.subr.bf16.mxu0 %v4161_v15 }
 0x13b   : > { %3077 = vmatpush3.bf16.msra.mxu0 %v4161_v15 }
 0x13c   : > { %3079 = vmatprep.subr.bf16.mxu0 %v3014_v18 }
 0x13f   : > { %3081 = vmatpush3.bf16.msra.mxu0 %v3014_v18 }
 0x140   : > { %3083 = vmatprep.subr.bf16.mxu0 %v3018_v21 }
 0x143   : > { %3085 = vmatpush3.bf16.msra.mxu0 %v3018_v21 }
 0x144   : > { %3087 = vmatprep.subr.bf16.mxu0 %v3022_v24 }
 0x147   : > { %3089 = vmatpush3.bf16.msra.mxu0 %v3022_v24 }
 0x148   : > { %3091 = vmatprep.subr.bf16.mxu0 %v3090_v38 }
 0x14a   : > { %2792 = vmatmul.mubr.f32.vlgmr.msra.gmra.mrb[10].mxu0 %v737_v35 }
 0x14b   : > { %3093 = vmatpush3.bf16.msra.mxu0 %v3090_v38 }
 0x14c   : > { %3095 = vmatprep.subr.bf16.mxu0 %v3094_v44 }
 0x14f   : > { %3097 = vmatpush3.bf16.msra.mxu0 %v3094_v44 }
 0x1dd   : > { %v2714_v52 = vpop.f32.mrb[0].mxu0 }
 0x1de   : > { %v613_v53 = vadd.f32 %v2714_v52, %v4246_v51  ;;  %v607_v54 = vpop.f32.mrb[1].mxu0 }
 0x1df   : > { %v608_v55 = vadd.f32 %v4246_v51, %v607_v54  ;;  %v1288_v54 = vld [vmem:[#allocation8 + $0x68] sm:$0xff] }
 0x1e0   : > { %v4250_v56 = vmax.f32 %v613_v53, 0.0  ;;  %v1287_v53 = vld [vmem:[#allocation8 + $0x60] sm:$0xff] }
 0x1e1   : > { %v4252_v57 = vmax.f32 %v608_v55, 0.0  ;;  %v2717_v58 = vpop.f32.mrb[2].mxu0 }
 0x1e2   : > { %v617_v59 = vpop.f32.mrb[3].mxu0  ;;  %v835_v60 = vrot.slane %v4250_v56, 7  ;;  %v866_v61 = vrot.slane %v4250_v56, 1  ;;  %v623_v34 = vadd.f32 %v2717_v58, %v4246_v51 }
 0x1e3   : > { %v834_v62 = vrot.slane %v4252_v57, 7  ;;  %v865_v63 = vrot.slane %v4252_v57, 1  ;;  %v618_v23 = vadd.f32 %v4246_v51, %v617_v59 }
 0x1e4   : > { %v4301_v46 = vmax.f32 %v623_v34, 0.0 }
 0x1e5   : > { %v2720_v0 = vpop.f32.mrb[4].mxu0  ;;  %v4259_v1 = vsel %vm830_vm0, %v834_v62, %v835_v60  ;;  %v4264_v2 = vsel %vm861_vm1, %v865_v63, %v866_v61  ;;  %v4291_v37 = vmax.f32 %v618_v23, 0.0  ;;  %v4313_v55 = vsel %vm830_vm0, 0.0, %v834_v62 }
 0x1e6   : > { %v627_v3 = vpop.f32.mrb[5].mxu0  ;;  %v633_v47 = vadd.f32 %v2720_v0, %v4246_v51  ;;  %v838_v59 = vrot.slane %v4301_v46, 7  ;;  %v3114_v60 = vpack.c.bf16 %v1288_v54, %v1287_v53 }
 0x1e7   : > { %v628_v38 = vadd.f32 %v4246_v51, %v627_v3  ;;  %v837_v52 = vrot.slane %v4291_v37, 7 }
 0x1e8   : > { %v4319_v58 = vmax.f32 %v633_v47, 0.0 }
 0x1e9   : > { %v2723_v4 = vpop.f32.mrb[6].mxu0  ;;  %v4305_v49 = vmax.f32 %v628_v38, 0.0  ;;  %v4335_v63 = vsel %vm830_vm0, %v837_v52, %v838_v59 }
 0x1ea   : > { %v643_v5 = vadd.f32 %v2723_v4, %v4246_v51  ;;  %v637_v6 = vpop.f32.mrb[7].mxu0  ;;  %v841_v0 = vrot.slane %v4319_v58, 7 }
 0x1eb   : > { %v638_v7 = vadd.f32 %v4246_v51, %v637_v6  ;;  %v840_v62 = vrot.slane %v4305_v49, 7  ;;  %v1290_v6 = vld [vmem:[#allocation8 + $0x78] sm:$0xff]  ;;  %v871_v23 = vrot.slane %v4305_v49, 1 }
 0x1ec   : > { %v4268_v8 = vmax.f32 %v643_v5, 0.0  ;;  %v1289_v5 = vld [vmem:[#allocation8 + $0x70] sm:$0xff] }
 0x1ed   : > { %v4270_v10 = vmax.f32 %v638_v7, 0.0  ;;  %v4341_v3 = vsel %vm830_vm0, 0.0, %v840_v62  ;;  %v4349_v4 = vsel %vm830_vm0, %v840_v62, %v841_v0  ;;  %v3118_v7 = vpack.c.bf16 %v1290_v6, %v1289_v5  ;;  %v1533_v62 = vld [vmem:[#allocation8 + $0xa8] sm:$0xff]  ;;  %v1534_v0 = vld [vmem:[#allocation8 + $0xb0] sm:$0xff]  ;;  %v1535_v5 = vld [vmem:[#allocation8 + $0xb8] sm:$0xff] }
 0x1ee   : > { %v844_v11 = vrot.slane %v4268_v8, 7  ;;  %v875_v12 = vrot.slane %v4268_v8, 1  ;;  %v3134_v6 = vpack.c.bf16 %v1535_v5, %v1534_v0 }
 0x1ef   : > { %v843_v13 = vrot.slane %v4270_v10, 7  ;;  %v874_v14 = vrot.slane %v4270_v10, 1 }
 0x1f1   : > { %v4279_v15 = vsel %vm830_vm0, %v843_v13, %v844_v11  ;;  %v4284_v16 = vsel %vm861_vm1, %v874_v14, %v875_v12  ;;  %v1410_v14 = vld [vmem:[#allocation8 + $0x80] sm:$0xff] }
 0x1fd   : > { %v2758_v17 = vpop.f32.mrb[8].mxu0 }
 0x1fe   : > { %v728_v18 = vadd.f32 %v2758_v17, %v4246_v51  ;;  %v722_v19 = vpop.f32.mrb[9].mxu0  ;;  %v1411_v17 = vld [vmem:[#allocation8 + $0x88] sm:$0xff] }
 0x1ff   : > { %v723_v21 = vadd.f32 %v4246_v51, %v722_v19  ;;  %v869_v19 = vrot.slane %v4301_v46, 1 }
 0x200   : > { %v732_v22 = vmax.f32 %v728_v18, 0.0  ;;  %v868_v18 = vrot.slane %v4291_v37, 1 }
 0x201   : > { %v731_v24 = vmax.f32 %v723_v21, 0.0  ;;  %v4363_v21 = vsel %vm861_vm1, %v866_v61, 0.0  ;;  %v815_v61 = vstv %s534_s12  ;;  %s2494_s12 = sshll.u32 %s4754_s14, 5 }
 0x202   : > { %v735_v32 = vmul.f32 %v733_v20, %v732_v22  ;;  %v4368_v22 = vsel %vm861_vm1, %v868_v18, %v869_v19  ;;  %v1779_v18 = vld [vmem:[#allocation8 + $0xe8] sm:$0xff]  ;;  %s2223_s1 = sadd.s32 %s2499_s18, %s2494_s12 }
 0x203   : > { %v734_v33 = vmul.f32 %v733_v20, %v731_v24  ;;  %v3122_v20 = vpack.c.bf16 %v1411_v17, %v1410_v14  ;;  %v872_v24 = vrot.slane %v4319_v58, 1  ;;  %v1778_v17 = vld [vmem:[#allocation8 + $0xe0] sm:$0xff]  ;;  %s2495_s23 = sshll.u32 %s2223_s1, 7 }
 0x204   : > { %v832_v35 = vrot.slane %v735_v32, 7  ;;  %v863_v36 = vrot.slane %v735_v32, 1  ;;  %s4563_s27 = scalar_lea.hbm %s4755_s20, %s2495_s23 }
 0x205   : > { %v862_v39 = vrot.slane %v734_v33, 1  ;;  %2802 = vmatprep.mubr.msk.f32.mxu0 %vm901_vm2, %v734_v33  ;;  %v831_v40 = vrot.slane %v734_v33, 7 }
 0x206   : > { %2803 = vmatmul.mubr.msk.f32.vlgmr.msra.gmra.mrb[12].mxu0 %vm901_vm2, %v735_v32  ;;  %v886_v11 = vsel %vm861_vm1, %v863_v36, 0.0 }
 0x207   : > { %2805 = vmatprep.mubr.msk.f32.mxu0 %vm901_vm2, %v4252_v57  ;;  %v855_v43 = vsel %vm830_vm0, 0.0, %v831_v40  ;;  %v833_v44 = vsel %vm830_vm0, %v831_v40, %v832_v35  ;;  %v864_v45 = vsel %vm861_vm1, %v862_v39, %v863_v36  ;;  %v4377_v36 = vsel %vm861_vm1, %v869_v19, 0.0 }
 0x208   : > { %2822 = vmatprep.mubr.msk.f32.mxu1 %vm901_vm2, %v855_v43  ;;  %v4382_v39 = vsel %vm861_vm1, %v871_v23, %v872_v24  ;;  %v1412_v43 = vld [vmem:[#allocation8 + $0x90] sm:$0xff]  ;;  %v3146_v19 = vpack.c.bf16 %v1779_v18, %v1778_v17 }
 0x209   : > { %2823 = vmatmul.mubr.msk.f32.vlgmr.msra.gmra.mrb[0].mxu1 %vm901_vm2, %v833_v44  ;;  %v1413_v44 = vld [vmem:[#allocation8 + $0x98] sm:$0xff] }
 0x20a   : > { %3109 = vmatpush3.bf16.msra.mxu1 %v4240_v50  ;;  %2806 = vmatmul.mubr.msk.f32.gmra.mrb[14].mxu0 %vm901_vm2, %v4250_v56  ;;  %v4325_v50 = vsel %vm830_vm0, 0.0, %v837_v52  ;;  %v3126_v53 = vpack.c.bf16 %v1413_v44, %v1412_v43 }
 0x20b   : > { %2825 = vmatprep.mubr.msk.f32.mxu1 %vm901_vm2, %v4313_v55  ;;  %2808 = vmatprep.mubr.msk.f32.mxu0 %vm901_vm2, %v4291_v37 }
 0x20c   : > { %3111 = vmatprep.subr.bf16.mxu1 %v3110_v48 }
 0x20d   : > { %2826 = vmatmul.mubr.msk.f32.gmra.mrb[2].mxu1 %vm901_vm2, %v4259_v1 }
 0x20e   : > { %2809 = vmatmul.mubr.msk.f32.gmra.mrb[16].mxu0 %vm901_vm2, %v4301_v46  ;;  %2828 = vmatprep.mubr.msk.f32.mxu1 %vm901_vm2, %v4325_v50 }
 0x20f   : > { %2811 = vmatprep.mubr.msk.f32.mxu0 %vm901_vm2, %v4305_v49  ;;  %3113 = vmatpush3.bf16.msra.mxu1 %v3110_v48 }
 0x210   : > { %3115 = vmatprep.subr.bf16.mxu1 %v3114_v60 }
 0x211   : > { %2829 = vmatmul.mubr.msk.f32.gmra.mrb[4].mxu1 %vm901_vm2, %v4335_v63 }
 0x212   : > { %2812 = vmatmul.mubr.msk.f32.gmra.mrb[18].mxu0 %vm901_vm2, %v4319_v58  ;;  %2831 = vmatprep.mubr.msk.f32.mxu1 %vm901_vm2, %v4341_v3 }
 0x215   : > { %2832 = vmatmul.mubr.msk.f32.gmra.mrb[6].mxu1 %vm901_vm2, %v4349_v4 }
 0x216   : > { %2842 = vmatprep.mubr.msk.f32.mxu1 %vm901_vm2, %v864_v45 }
 0x219   : > { %2843 = vmatmul.mubr.msk.f32.vlgmr.msra.gmra.mrb[0].mxu1 %vm901_vm2, %v886_v11  ;;  %v1656_v11 = vld [vmem:[#allocation8 + $0xc8] sm:$0xff] }
 0x21a   : > { %3117 = vmatpush3.bf16.msra.mxu1 %v3114_v60  ;;  %2845 = vmatprep.mubr.msk.f32.mxu1 %vm901_vm2, %v4264_v2  ;;  %v1532_v60 = vld [vmem:[#allocation8 + $0xa0] sm:$0xff] }
 0x21b   : > { %3119 = vmatprep.subr.bf16.mxu1 %v3118_v7 }
 0x21d   : > { %2846 = vmatmul.mubr.msk.f32.gmra.mrb[2].mxu1 %vm901_vm2, %v4363_v21  ;;  %v2793_v32 = vpop.f32.mrb[10].mxu0 }
 0x21e   : > { %2848 = vmatprep.mubr.msk.f32.mxu1 %vm901_vm2, %v4368_v22  ;;  %3121 = vmatpush3.bf16.msra.mxu1 %v3118_v7  ;;  %v810_v33 = vadd.f32 %v2793_v32, %v4246_v51  ;;  %v804_v34 = vpop.f32.mrb[11].mxu0  ;;  %v1655_v7 = vld [vmem:[#allocation8 + $0xc0] sm:$0xff]  ;;  %v1901_v32 = vld [vmem:[#allocation8 + $0x108] sm:$0xff] }
 0x21f   : > { %3123 = vmatprep.subr.bf16.mxu1 %v3122_v20  ;;  %v805_v35 = vadd.f32 %v4246_v51, %v804_v34  ;;  %v4391_v51 = vsel %vm861_vm1, %v872_v24, 0.0  ;;  %v1900_v24 = vld [vmem:[#allocation8 + $0x100] sm:$0xff] }
 0x220   : > { %v814_v38 = vmax.f32 %v810_v33, 0.0  ;;  %v3154_v33 = vpack.c.bf16 %v1901_v32, %v1900_v24 }
 0x221   : > { %2849 = vmatmul.mubr.msk.f32.gmra.mrb[4].mxu1 %vm901_vm2, %v4377_v36  ;;  %v813_v40 = vmax.f32 %v805_v35, 0.0 }
 0x222   : > { %2851 = vmatprep.mubr.msk.f32.mxu1 %vm901_vm2, %v4382_v39  ;;  %v4386_v41 = vmul.f32 %v815_v61, %v814_v38 }
 0x223   : > { %v4388_v42 = vmul.f32 %v815_v61, %v813_v40  ;;  %v2481_v40 = vld [vmem:[%s4752_s10] ss:$0 sm:$0xff] }
 0x224   : > { %v847_v45 = vrot.slane %v4386_v41, 7  ;;  %v878_v47 = vrot.slane %v4386_v41, 1 }
 0x225   : > { %2852 = vmatmul.mubr.msk.f32.gmra.mrb[6].mxu1 %vm901_vm2, %v4391_v51  ;;  %v877_v48 = vrot.slane %v4388_v42, 1  ;;  %v846_v52 = vrot.slane %v4388_v42, 7 }
 0x226   : > { %2862 = vmatprep.mubr.msk.f32.mxu1 %vm901_vm2, %v4313_v55  ;;  %v3130_v55 = vpack.c.bf16 %v1533_v62, %v1532_v60 }
 0x227   : > { %v4404_v54 = vsel %vm830_vm0, %v846_v52, %v847_v45  ;;  %v4409_v59 = vsel %vm861_vm1, %v877_v48, %v878_v47 }
 0x229   : > { %2863 = vmatmul.mubr.msk.f32.vlgmr.msra.gmra.mrb[0].mxu1 %vm901_vm2, %v4259_v1  ;;  %v859_v1 = vsel %vm830_vm0, 0.0, %v843_v13  ;;  %v3138_v13 = vpack.c.bf16 %v1656_v11, %v1655_v7 }
 0x22a   : > { %3125 = vmatpush3.bf16.msra.mxu1 %v3122_v20  ;;  %2865 = vmatprep.mubr.msk.f32.mxu1 %vm901_vm2, %v4325_v50  ;;  %v1780_v20 = vld [vmem:[#allocation8 + $0xf0] sm:$0xff] }
 0x22b   : > { %3127 = vmatprep.subr.bf16.mxu1 %v3126_v53 }
 0x22d   : > { %2866 = vmatmul.mubr.msk.f32.gmra.mrb[2].mxu1 %vm901_vm2, %v4335_v63 }
 0x22e   : > { %2868 = vmatprep.mubr.msk.f32.mxu1 %vm901_vm2, %v4341_v3  ;;  %3129 = vmatpush3.bf16.msra.mxu1 %v3126_v53 }
 0x22f   : > { %3131 = vmatprep.subr.bf16.mxu1 %v3130_v55 }
 0x231   : > { %2869 = vmatmul.mubr.msk.f32.gmra.mrb[4].mxu1 %vm901_vm2, %v4349_v4 }
 0x232   : > { %2871 = vmatprep.mubr.msk.f32.mxu1 %vm901_vm2, %v859_v1 }
 0x235   : > { %2872 = vmatmul.mubr.msk.f32.gmra.mrb[6].mxu1 %vm901_vm2, %v4279_v15 }
 0x236   : > { %2882 = vmatprep.mubr.msk.f32.mxu1 %vm901_vm2, %v4252_v57  ;;  %v1658_v57 = vld [vmem:[#allocation8 + $0xd8] sm:$0xff] }
 0x239   : > { %2883 = vmatmul.mubr.msk.f32.vlgmr.msra.gmra.mrb[0].mxu1 %vm901_vm2, %v4250_v56  ;;  %v1657_v56 = vld [vmem:[#allocation8 + $0xd0] sm:$0xff] }
 0x23a   : > { %3133 = vmatpush3.bf16.msra.mxu1 %v3130_v55  ;;  %2885 = vmatprep.mubr.msk.f32.mxu1 %vm901_vm2, %v4291_v37  ;;  %v3142_v14 = vpack.c.bf16 %v1658_v57, %v1657_v56 }
 0x23b   : > { %3135 = vmatprep.subr.bf16.mxu1 %v3134_v6 }
 0x23d   : > { %2886 = vmatmul.mubr.msk.f32.gmra.mrb[2].mxu1 %vm901_vm2, %v4301_v46 }
 0x23e   : > { %2888 = vmatprep.mubr.msk.f32.mxu1 %vm901_vm2, %v4305_v49  ;;  %3137 = vmatpush3.bf16.msra.mxu1 %v3134_v6 }
 0x23f   : > { %3139 = vmatprep.subr.bf16.mxu1 %v3138_v13 }
 0x241   : > { %2889 = vmatmul.mubr.msk.f32.gmra.mrb[4].mxu1 %vm901_vm2, %v4319_v58 }
 0x242   : > { %2891 = vmatprep.mubr.msk.f32.mxu1 %vm901_vm2, %v4270_v10 }
 0x245   : > { %2892 = vmatmul.mubr.msk.f32.gmra.mrb[6].mxu1 %vm901_vm2, %v4268_v8 }
 0x246   : > { %2902 = vmatprep.mubr.msk.f32.mxu1 %vm901_vm2, %v4264_v2  ;;  %v890_v2 = vsel %vm861_vm1, %v875_v12, 0.0  ;;  %v860_v12 = vsel %vm830_vm0, 0.0, %v846_v52 }
 0x249   : > { %2903 = vmatmul.mubr.msk.f32.vlgmr.msra.gmra.mrb[0].mxu1 %vm901_vm2, %v4363_v21  ;;  %v1781_v21 = vld [vmem:[#allocation8 + $0xf8] sm:$0xff] }
 0x24a   : > { %3141 = vmatpush3.bf16.msra.mxu1 %v3138_v13  ;;  %2905 = vmatprep.mubr.msk.f32.mxu1 %vm901_vm2, %v4368_v22  ;;  %v3150_v23 = vpack.c.bf16 %v1781_v21, %v1780_v20 }
 0x24b   : > { %3143 = vmatprep.subr.bf16.mxu1 %v3142_v14 }
 0x24d   : > { %2906 = vmatmul.mubr.msk.f32.gmra.mrb[2].mxu1 %vm901_vm2, %v4377_v36 }
 0x24e   : > { %2908 = vmatprep.mubr.msk.f32.mxu1 %vm901_vm2, %v4382_v39  ;;  %3145 = vmatpush3.bf16.msra.mxu1 %v3142_v14 }
 0x24f   : > { %3147 = vmatprep.subr.bf16.mxu1 %v3146_v19 }
 0x251   : > { %2909 = vmatmul.mubr.msk.f32.gmra.mrb[4].mxu1 %vm901_vm2, %v4391_v51 }
 0x252   : > { %2911 = vmatprep.mubr.msk.f32.mxu1 %vm901_vm2, %v4284_v16 }
 0x255   : > { %2912 = vmatmul.mubr.msk.f32.gmra.mrb[6].mxu1 %vm901_vm2, %v890_v2 }
 0x256   : > { %2922 = vmatprep.mubr.msk.f32.mxu1 %vm901_vm2, %v4325_v50  ;;  %v1902_v50 = vld [vmem:[#allocation8 + $0x110] sm:$0xff] }
 0x259   : > { %2923 = vmatmul.mubr.msk.f32.vlgmr.msra.gmra.mrb[0].mxu1 %vm901_vm2, %v4335_v63  ;;  %v1903_v63 = vld [vmem:[#allocation8 + $0x118] sm:$0xff] }
 0x25a   : > { %3149 = vmatpush3.bf16.msra.mxu1 %v3146_v19  ;;  %2925 = vmatprep.mubr.msk.f32.mxu1 %vm901_vm2, %v4341_v3  ;;  %v2045_v3 = vld [vmem:[%s4750_s21] sm:$0xff]  ;;  %v3158_v34 = vpack.c.bf16 %v1903_v63, %v1902_v50 }
 0x25b   : > { %3151 = vmatprep.subr.bf16.mxu1 %v3150_v23 }
 0x25d   : > { %2926 = vmatmul.mubr.msk.f32.gmra.mrb[2].mxu1 %vm901_vm2, %v4349_v4  ;;  %v2046_v4 = vld [vmem:[%s4751_s25 + $0x8] sm:$0xff] }
 0x25e   : > { %2928 = vmatprep.mubr.msk.f32.mxu1 %vm901_vm2, %v859_v1  ;;  %3153 = vmatpush3.bf16.msra.mxu1 %v3150_v23  ;;  %v2482_v23 = vld [vmem:[%s4753_s19] ss:$0 sm:$0xff] }
 0x25f   : > { %3155 = vmatprep.subr.bf16.mxu1 %v3154_v33 }
 0x261   : > { %2929 = vmatmul.mubr.msk.f32.gmra.mrb[4].mxu1 %vm901_vm2, %v4279_v15  ;;  %v3162_v15 = vpack.c.bf16 %v2046_v4, %v2045_v3 }
 0x262   : > { %2931 = vmatprep.mubr.msk.f32.mxu1 %vm901_vm2, %v860_v12 }
 0x263   : > { %3163 = vmatprep.subr.bf16.mxu0 %v3162_v15 }
 0x264   : > { %3165 = vmatpush3.bf16.msra.mxu0 %v3162_v15 }
 0x265   : > { %2932 = vmatmul.mubr.msk.f32.gmra.mrb[6].mxu1 %vm901_vm2, %v4404_v54 }
 0x266   : > { %2942 = vmatprep.mubr.msk.f32.mxu1 %vm901_vm2, %v4291_v37  ;;  %v2048_v37 = vld [vmem:[%s4751_s25 + $0x18] sm:$0xff] }
 0x269   : > { %2943 = vmatmul.mubr.msk.f32.vlgmr.msra.gmra.mrb[0].mxu1 %vm901_vm2, %v4301_v46 }
 0x26a   : > { %3157 = vmatpush3.bf16.msra.mxu1 %v3154_v33  ;;  %2945 = vmatprep.mubr.msk.f32.mxu1 %vm901_vm2, %v4305_v49 }
 0x26b   : > { %3159 = vmatprep.subr.bf16.mxu1 %v3158_v34 }
 0x26d   : > { %2946 = vmatmul.mubr.msk.f32.gmra.mrb[2].mxu1 %vm901_vm2, %v4319_v58 }
 0x26e   : > { %2948 = vmatprep.mubr.msk.f32.mxu1 %vm901_vm2, %v4270_v10  ;;  %3161 = vmatpush3.bf16.msra.mxu1 %v3158_v34  ;;  %v2047_v10 = vld [vmem:[%s4751_s25 + $0x10] sm:$0xff] }
 0x271   : > { %2949 = vmatmul.mubr.msk.f32.gmra.mrb[4].mxu1 %vm901_vm2, %v4268_v8  ;;  %v891_v8 = vsel %vm861_vm1, %v878_v47, 0.0 }
 0x272   : > { %2951 = vmatprep.mubr.msk.f32.mxu1 %vm901_vm2, %v4388_v42 }
 0x275   : > { %2952 = vmatmul.mubr.msk.f32.gmra.mrb[6].mxu1 %vm901_vm2, %v4386_v41 }
 0x276   : > { %2962 = vmatprep.mubr.msk.f32.mxu1 %vm901_vm2, %v4368_v22 }
 0x279   : > { %2963 = vmatmul.mubr.msk.f32.vlgmr.msra.gmra.mrb[0].mxu1 %vm901_vm2, %v4377_v36 }
 0x27a   : > { %2965 = vmatprep.mubr.msk.f32.mxu1 %vm901_vm2, %v4382_v39 }
 0x27d   : > { %2966 = vmatmul.mubr.msk.f32.gmra.mrb[2].mxu1 %vm901_vm2, %v4391_v51 }
 0x27e   : > { %2968 = vmatprep.mubr.msk.f32.mxu1 %vm901_vm2, %v4284_v16  ;;  %v3166_v16 = vpack.c.bf16 %v2048_v37, %v2047_v10 }
 0x280   : > { %3167 = vmatprep.subr.bf16.mxu0 %v3166_v16 }
 0x281   : > { %2969 = vmatmul.mubr.msk.f32.gmra.mrb[4].mxu1 %vm901_vm2, %v890_v2  ;;  %3169 = vmatpush3.bf16.msra.mxu0 %v3166_v16 }
 0x282   : > { %2971 = vmatprep.mubr.msk.f32.mxu1 %vm901_vm2, %v4409_v59 }
 0x285   : > { %2972 = vmatmul.mubr.msk.f32.gmra.mrb[6].mxu1 %vm901_vm2, %v891_v8 }
 0x2d9   : > { %v2804_v46 = vpop.f32.mrb[12].mxu0 }
 0x2da   : > { %v984_v49 = vpop.f32.mrb[13].mxu0 }
 0x2dd   : > { %v2807_v58 = vpop.f32.mrb[14].mxu0 }
 0x2de   : > { %v994_v22 = vpop.f32.mrb[15].mxu0 }
 0x2e1   : > { %v2810_v61 = vpop.f32.mrb[16].mxu0 }
 0x2e2   : > { %v1004_v35 = vpop.f32.mrb[17].mxu0 }
 0x2e5   : > { %v2813_v36 = vpop.f32.mrb[18].mxu0 }
 0x2e6   : > { %v1014_v38 = vpop.f32.mrb[19].mxu0 }
 0x34c   : > { %v2964_v39 = vpop.f32.mrb[0].mxu1 }
 0x34d   : > { %v3170_v41 = vadd.f32 %v2964_v39, %v2804_v46  ;;  %v1975_v42 = vpop.f32.mrb[1].mxu1 }
 0x34e   : > { %v3171_v51 = vadd.f32 %v1975_v42, %v984_v49 }
 0x34f   : > { %v2030_v43 = vadd.f32 %v3170_v41, %v2481_v40 }
 0x350   : > { %v2029_v44 = vadd.f32 %v3171_v51, %v2481_v40  ;;  %v2967_v45 = vpop.f32.mrb[2].mxu1 }
 0x351   : > { %v3172_v47 = vadd.f32 %v2967_v45, %v2807_v58  ;;  %v1985_v48 = vpop.f32.mrb[3].mxu1  ;;  %v2038_v54 = vmax.f32 %v2030_v43, 0.0 }
 0x352   : > { %v2037_v52 = vmax.f32 %v2029_v44, 0.0  ;;  %v3173_v53 = vadd.f32 %v1985_v48, %v994_v22 }
 0x353   : > { %v2032_v59 = vadd.f32 %v3172_v47, %v2481_v40 }
 0x354   : > { %v2031_v60 = vadd.f32 %v3173_v53, %v2481_v40  ;;  %v2970_v62 = vpop.f32.mrb[4].mxu1  ;;  %2982 = vmatprep.mubr.msk.f32.mxu0 %vm901_vm2, %v2037_v52 }
 0x355   : > { %v3174_v55 = vadd.f32 %v2970_v62, %v2810_v61  ;;  %v1995_v1 = vpop.f32.mrb[5].mxu1  ;;  %2983 = vmatmul.mubr.msk.f32.vlgmr.msra.gmra.mrb[20].mxu0 %vm901_vm2, %v2038_v54  ;;  %v2040_v6 = vmax.f32 %v2032_v59, 0.0 }
 0x356   : > { %v2039_v0 = vmax.f32 %v2031_v60, 0.0  ;;  %v3175_v5 = vadd.f32 %v1995_v1, %v1004_v35 }
 0x357   : > { %v2034_v7 = vadd.f32 %v3174_v55, %v2481_v40 }
 0x358   : > { %v2033_v11 = vadd.f32 %v3175_v5, %v2481_v40  ;;  %v2973_v13 = vpop.f32.mrb[6].mxu1  ;;  %2985 = vmatprep.mubr.msk.f32.mxu0 %vm901_vm2, %v2039_v0 }
 0x359   : > { %v3176_v56 = vadd.f32 %v2973_v13, %v2813_v36  ;;  %v2005_v57 = vpop.f32.mrb[7].mxu1  ;;  %2986 = vmatmul.mubr.msk.f32.gmra.mrb[22].mxu0 %vm901_vm2, %v2040_v6  ;;  %v2042_v18 = vmax.f32 %v2034_v7, 0.0 }
 0x35a   : > { %v2041_v14 = vmax.f32 %v2033_v11, 0.0  ;;  %v3177_v17 = vadd.f32 %v2005_v57, %v1014_v38 }
 0x35b   : > { %v2036_v19 = vadd.f32 %v3176_v56, %v2481_v40 }
 0x35c   : > { %v2035_v2 = vadd.f32 %v3177_v17, %v2481_v40  ;;  %2988 = vmatprep.mubr.msk.f32.mxu0 %vm901_vm2, %v2041_v14 }
 0x35d   : > { %2989 = vmatmul.mubr.msk.f32.gmra.mrb[24].mxu0 %vm901_vm2, %v2042_v18  ;;  %v2044_v21 = vmax.f32 %v2036_v19, 0.0 }
 0x35e   : > { %v2043_v20 = vmax.f32 %v2035_v2, 0.0 }
 0x360   : > { %2991 = vmatprep.mubr.msk.f32.mxu0 %vm901_vm2, %v2043_v20 }
 0x361   : > { %2992 = vmatmul.mubr.msk.f32.gmra.mrb[26].mxu0 %vm901_vm2, %v2044_v21 }
 0x428   : > { %v2984_v24 = vpop.f32.mrb[20].mxu0 }
 0x429   : > { %v2152_v32 = vadd.f32 %v2984_v24, %v2482_v23  ;;  %v2146_v33 = vpop.f32.mrb[21].mxu0 }
 0x42a   : > { %v2147_v12 = vadd.f32 %v2482_v23, %v2146_v33 }
 0x42b   : > { %v2186_v50 = vadd.f32 %v2152_v32, %v4185_v25 }
 0x42c   : > { %v2185_v63 = vadd.f32 %v2147_v12, %v4140_v9  ;;  %v2987_v3 = vpop.f32.mrb[22].mxu0 }
 0x42d   : > { %v2194_v4 = vmax.f32 %v2186_v50, 0.0  ;;  %v2162_v34 = vadd.f32 %v2987_v3, %v2482_v23  ;;  %v2156_v15 = vpop.f32.mrb[23].mxu0 }
 0x42e   : > { %v2193_v8 = vmax.f32 %v2185_v63, 0.0  ;;  %v2157_v10 = vadd.f32 %v2482_v23, %v2156_v15 }
 0x42f   : > { %2202 = vst [vmem:[%s4541_s17 + $0x8] sm:$0xff] %v2194_v4  ;;  %v2188_v37 = vadd.f32 %v2162_v34, %v4195_v27 }
 0x430   : > { %2201 = vst [vmem:[%s4541_s17] sm:$0xff] %v2193_v8  ;;  %v2187_v9 = vadd.f32 %v2157_v10, %v4189_v26  ;;  %v2990_v25 = vpop.f32.mrb[24].mxu0 }
 0x431   : > { %v2196_v16 = vmax.f32 %v2188_v37, 0.0  ;;  %v2172_v46 = vadd.f32 %v2990_v25, %v2482_v23  ;;  %v2166_v49 = vpop.f32.mrb[25].mxu0 }
 0x432   : > { %v2195_v58 = vmax.f32 %v2187_v9, 0.0  ;;  %v2167_v22 = vadd.f32 %v2482_v23, %v2166_v49 }
 0x433   : > { %2204 = vst [vmem:[%s4541_s17 + $0x18] sm:$0xff] %v2196_v16  ;;  %v2190_v61 = vadd.f32 %v2172_v46, %v4205_v29 }
 0x434   : > { %2203 = vst [vmem:[%s4541_s17 + $0x10] sm:$0xff] %v2195_v58  ;;  %v2189_v27 = vadd.f32 %v2167_v22, %v4199_v28  ;;  %v2993_v35 = vpop.f32.mrb[26].mxu0 }
 0x435   : > { %v2198_v26 = vmax.f32 %v2190_v61, 0.0  ;;  %v2182_v36 = vadd.f32 %v2993_v35, %v2482_v23  ;;  %v2176_v38 = vpop.f32.mrb[27].mxu0 }
 0x436   : > { %v2197_v39 = vmax.f32 %v2189_v27, 0.0  ;;  %v2177_v40 = vadd.f32 %v2482_v23, %v2176_v38 }
 0x437   : > { %2206 = vst [vmem:[%s4541_s17 + $0x28] sm:$0xff] %v2198_v26  ;;  %v2192_v41 = vadd.f32 %v2182_v36, %v4215_v31 }
 0x438   : > { %2205 = vst [vmem:[%s4541_s17 + $0x20] sm:$0xff] %v2197_v39  ;;  %v2191_v28 = vadd.f32 %v2177_v40, %v4209_v30 }
 0x439   : > { %v2200_v29 = vmax.f32 %v2192_v41, 0.0 }
 0x43a   : > { %v2199_v42 = vmax.f32 %v2191_v28, 0.0 }
 0x43b   : > { %2208 = vst [vmem:[%s4541_s17 + $0x38] sm:$0xff] %v2200_v29 }
 0x43c   : > { %2207 = vst [vmem:[%s4541_s17 + $0x30] sm:$0xff] %v2199_v42 }
 0x43d   : > { %3516 = shalt.err (!%p3513_p0)
}
 0x43e   : > { %s3517_s10 = scalar_lea.hbm %s4563_s27, 1024  ;;  %s3521_s19 = scalar_lea.hbm %s4756_s9, 8192 }
 0x43f   : > { %p3518_p9 = scmp.ne.s32.totalorder %s4563_s27, %s3517_s10  ;;  %p3522_p10 = scmp.lt.u32.totalorder %s4563_s27, %s4756_s9 }
 0x440   : > { %p3523_p7 = scmp.lt.u32.totalorder %s3521_s19, %s3517_s10  ;;  %p3525_p13 = scmp.lt.u32.totalorder %s3517_s10, %s4563_s27 }
 0x441   : > { %p3519_p5 = pnand %p3518_p9, %p4757_p12 }
 0x442   : > { %p3524_p1 = por %p3523_p7, %p3522_p10 }
 0x443   : > { %p3520_p4 = pneg %p3519_p5 }
 0x444   : > { %p3526_p8 = por %p3525_p13, %p3524_p1 }
 0x446   : > { %p3527_p11 = pnand %p3526_p8, %p3520_p4 }
 0x448   : > { %3530 = shalt.err (!%p3527_p11)
}
 0x449   : > { %s3670_s18 = smov 128   ;;  %s3671_s12 = smov 8  }
 0x44a   : > { %3244 = dma.vmem_to_hbm [thread:$0]  (%p4757_p12), %s4556_s5, 1024, %s4563_s27, %s2210_s2, %s3670_s18, %s3670_s18, %s3671_s12  }
 0x44b PF: > { %s4758_s1 = sld [smem:[#allocation31_spill]]  ;;  %p3267_p6 = scmp.ge.s32.totalorder %s3661_s22, 2 }
 0x44c   : > { %s2241_s23 = sand.u32 1, %s3633_s15  }
 0x44d   : > { %s2242_s11 = scalar_lea.sflag [#allocation4], %s2241_s23 }
 0x451   : > { %p4759_p2 = scmp.ne.s32.totalorder %s4758_s1, 0 }
 0x453   : > { %p3261_p3 = pnand %p3267_p6, %p4759_p2 }
 0x455   : > { %3604 = dma.done.wait (!%p3261_p3), %s2242_s11, 1024  }
 0x456   : > { %3606 = vsyncadd (!%p3261_p3), %s2242_s11, 4294966272  ;;  %s29_s22 = sadd.s32 1, %s3661_s22   ;;  %s4761_s30 = sld [smem:[#allocation17_spill]] }
 0x457   : > { %p4596_p0 = scmp.ge.s32.totalorder %s29_s22, 10   ;;  %s4762_s10 = sld [smem:[#allocation18_spill]] }
 0x458   : > { %s4763_s28 = sld [smem:[#allocation19_spill]]  ;;  %s4764_s14 = sld [smem:[#allocation29_spill]] }
 0x459   : > { %s4765_s29 = sld [smem:[#allocation20_spill]]  ;;  %s4766_s17 = sld [smem:[#allocation30_spill]] }
 0x45a   : > { %s4767_s18 = sld [smem:[#allocation23_spill]]  ;;  %s4768_s19 = sld [smem:[#allocation24_spill]] }
 0x45b   : > { %s4769_s20 = sld [smem:[#allocation25_spill]]  ;;  %s4770_s5 = sld [smem:[#allocation26_spill]] }
 0x45c   : > { %s4772_s11 = smov %s4793_s24  ;;  %s4773_s12 = smov %s3625_s13 }
 0x45d   : > { %s4775_s15 = smov %s3637_s16  ;;  %28 = sbr.rel (!%p4596_p0) target bundleno = 24 (0x18), region = 137 }
 0x45e   : > { %s4774_s13 = smov %s4763_s28 }
 0x45f   : > { %s4776_s16 = smov %s4765_s29 }
 0x461   : > { %s4777_s21 = smov %s4770_s5 }
 0x464   :  { %2247 = vsyncpa [#allocation3], 1 }
 0x465   :  { %2249 = vsyncpa [#allocation3 + $0x1], 1 }
 0x466   :  { %2250 = vsyncpa [#allocation6], 1 }
 0x467   :  { %2252 = vsyncpa [#allocation6 + $0x1], 1 }
 0x468   :  { %2253 = vsyncpa [#allocation9], 1 }
 0x469   :  { %2254 = vsyncpa [#allocation4], 1 }
 0x46a   :  { %2256 = vsyncpa [#allocation4 + $0x1], 1 }

</bundles_post_ra>
